<compile_context>
chip_gen: v7x
topology: tpu7x:2x2x1
jax: 0.10.0
libtpu: 0.0.40
codegen_flags: <defaults>
</compile_context>

<pallas_src>
import math

import jax
import jax.numpy as jnp
from jax.experimental import pallas as pl
from jax.experimental.pallas import tpu as pltpu

BN_EPS = 1e-5
# Rows of pooled output per grid step (x4 phases inside).  At Rt=1024, Kp=384
# the per-step working set is ~3 MiB patch tile x2 buffers + ~2 MiB of f32
# matmul temporaries -> ~10 MiB, inside every generation's default scoped VMEM
# (v5e 16 / v6e 32 / v7x 32 MiB); the limit below makes the budget explicit.
_MAX_ROW_TILE = 1024
_VMEM_LIMIT_BYTES = 32 * 1024 * 1024

_VMEM_SPEC = pl.BlockSpec(memory_space=pltpu.MemorySpace.VMEM)


def _round_up(x, m):
    return (x + m - 1) // m * m


# ----------------------------------------------------------------------------
# Pallas kernels
# ----------------------------------------------------------------------------
def _make_block_kernel(n_valid, fuse_fc):
    """Fused conv + BN-stats + BN + ReLU + 2x2 maxpool (+ optional FC) kernel.

    Grid = (2, n_tiles): phase 0 accumulates per-channel sum/sumsq of the conv
    output; phase 1 derives scale/shift once (tile 0) and recomputes the conv
    matmul per tile to normalize + pool, so the conv intermediate never
    round-trips HBM.
    """
    inv_cnt = 1.0 / float(n_valid)  # n_valid = 4 * R (true, unpadded rows)

    def kernel(p_ref, w_ref, gb_ref, *rest):
        if fuse_fc:
            fcw_ref, fcb_ref, o_ref, sum_ref, sq_ref, ss_ref = rest
        else:
            o_ref, sum_ref, sq_ref, ss_ref = rest

        phase = pl.program_id(0)
        tile = pl.program_id(1)

        @pl.when((phase == 0) & (tile == 0))
        def _():
            sum_ref[...] = jnp.zeros_like(sum_ref)
            sq_ref[...] = jnp.zeros_like(sq_ref)

        nph, rt, kp = p_ref.shape
        cp = w_ref.shape[1]
        # One fused (4*Rt, Kp) @ (Kp, Cp) matmul keeps the MXU fed; padded K
        # columns / padded rows are zero so they contribute nothing to y or
        # to the BN statistics.
        y = jnp.dot(p_ref[...].reshape(nph * rt, kp), w_ref[...],
                    preferred_element_type=jnp.float32)

        @pl.when(phase == 0)
        def _():
            # TODO(synk): E[x^2]-E[x]^2 in f32 is cancellation-prone when
            # |mean| >> std; switch to a shifted accumulation if stats drift.
            sum_ref[...] += jnp.sum(y, axis=0, keepdims=True)
            sq_ref[...] += jnp.sum(y * y, axis=0, keepdims=True)

        @pl.when((phase == 1) & (tile == 0))
        def _():
            mean = sum_ref[...] * inv_cnt
            var = jnp.maximum(sq_ref[...] * inv_cnt - mean * mean, 0.0)
            scale = gb_ref[0:1, :] * jax.lax.rsqrt(var + BN_EPS)
            ss_ref[0:1, :] = scale
            ss_ref[1:2, :] = gb_ref[1:2, :] - mean * scale

        @pl.when(phase == 1)
        def _():
            scale = ss_ref[0:1, :]
            shift = ss_ref[1:2, :]
            y4 = y.reshape(nph, rt, cp)
            # max_p(relu(scale*y_p + shift)) == max(max_p(scale*y_p) + shift, 0)
            m = jnp.maximum(y4[0] * scale, y4[1] * scale)
            m = jnp.maximum(m, y4[2] * scale)
            m = jnp.maximum(m, y4[3] * scale)
            pooled = jnp.maximum(m + shift, 0.0)
            if fuse_fc:
                # Pooled spatial is 1x1 -> rows are exactly the FC features
                # (padded channels are exactly zero: gamma_pad = beta_pad = 0).
                o_ref[...] = (jnp.dot(pooled, fcw_ref[...],
                                      preferred_element_type=jnp.float32)
                              + fcb_ref[...])
            else:
                o_ref[...] = pooled.astype(o_ref.dtype)

    return kernel


def fc_kernel(x_ref, w_ref, b_ref, o_ref):
    """Fallback Linear: o = x @ w + b (used only when final spatial != 1x1)."""
    o_ref[...] = jnp.dot(x_ref[...], w_ref[...],
                         preferred_element_type=jnp.float32) + b_ref[...]


# ----------------------------------------------------------------------------
# JAX glue (im2col, layout plumbing, parameter setup)
# ----------------------------------------------------------------------------
def _im2col_pool_phases(x, Rp, Kp):
    """x: (N, H, W, C) bf16 -> (4, Rp, Kp) bf16 zero-padded im2col patches,
    split by 2x2 pooling phase; rows ordered (n, ho, wo)."""
    N, H, W, C = x.shape
    Ho, Wo = (H + 1) // 2, (W + 1) // 2
    K = 9 * C
    xp = jnp.pad(x, ((0, 0), (1, 1), (1, 1), (0, 0)))   # conv padding=1 (zeros)
    cols = [xp[:, dy:dy + H, dx:dx + W, :] for dy in range(3) for dx in range(3)]
    patches = jnp.concatenate(cols, axis=-1)             # (N, H, W, 9C) bf16
    if (H % 2) or (W % 2):
        # ceil_mode pooling: clamp (duplicate) the last row/col; max unaffected.
        # TODO(synk): for odd H/W the duplicated rows slightly perturb the
        # train-mode BN statistics; exact for the even sizes used here.
        h_idx = jnp.minimum(jnp.arange(2 * Ho), H - 1)
        w_idx = jnp.minimum(jnp.arange(2 * Wo), W - 1)
        patches = patches[:, h_idx][:, :, w_idx]          # (N, 2Ho, 2Wo, 9C)
    patches = patches.reshape(N, Ho, 2, Wo, 2, K)
    P = patches.transpose(2, 4, 0, 1, 3, 5).reshape(4, N * Ho * Wo, K)
    return jnp.pad(P, ((0, 0), (0, Rp - N * Ho * Wo), (0, Kp - K)))


def conv_block(x, w, gamma, beta, fc_w=None, fc_b=None):
    """One fused block: conv3x3(pad=1, no bias) -> train-mode BN -> ReLU ->
    2x2 ceil-mode maxpool [-> optional Linear when the pooled spatial is 1x1].

    x: (N, H, W, Cin) NHWC; w: (Cout, Cin, 3, 3) PyTorch layout.
    Conv bias is intentionally NOT applied: training-mode BatchNorm subtracts
    the batch mean, which cancels any per-channel bias exactly.
    """
    x = x.astype(jnp.bfloat16)          # cast BEFORE im2col (MXU consumes bf16)
    N, H, W, Cin = x.shape
    Cout = w.shape[0]
    Ho, Wo = (H + 1) // 2, (W + 1) // 2
    R = N * Ho * Wo
    K = 9 * Cin
    Kp = _round_up(K, 128)                               # lane-dense contraction
    Cp = _round_up(Cout, 128)                            # lane-dense output
    Rt = min(_round_up(R, 8), _MAX_ROW_TILE)             # row tile (mult of 8)
    Rp = _round_up(R, Rt)
    n_tiles = Rp // Rt

    P = _im2col_pool_phases(x, Rp, Kp)                   # (4, Rp, Kp) bf16

    Wmat = jnp.transpose(w, (2, 3, 1, 0)).reshape(K, Cout)
    W_pad = jnp.pad(Wmat, ((0, Kp - K), (0, Cp - Cout))).astype(jnp.bfloat16)
    gb = jnp.stack([jnp.pad(gamma, (0, Cp - Cout)),
                    jnp.pad(beta, (0, Cp - Cout))]).astype(jnp.float32)

    fuse_fc = fc_w is not None
    operands = [P, W_pad, gb]
    in_specs = [
        pl.BlockSpec((4, Rt, Kp), lambda ph, i: (0, i, 0)),
        pl.BlockSpec((Kp, Cp), lambda ph, i: (0, 0)),
        pl.BlockSpec((2, Cp), lambda ph, i: (0, 0)),
    ]
    if fuse_fc:
        out_dim, feat_dim = fc_w.shape
        assert feat_dim == Cout, "fused FC requires 1x1 pooled spatial"
        Op = _round_up(out_dim, 128)
        fcw_p = jnp.pad(jnp.transpose(fc_w).astype(jnp.float32),
                        ((0, Cp - feat_dim), (0, Op - out_dim)))
        fcb_p = jnp.pad(fc_b.astype(jnp.float32), (0, Op - out_dim)).reshape(1, Op)
        operands += [fcw_p, fcb_p]
        in_specs += [pl.BlockSpec((Cp, Op), lambda ph, i: (0, 0)),
                     pl.BlockSpec((1, Op), lambda ph, i: (0, 0))]
        # Output only written in phase 1; phase 0 pins the block index to 0 so
        # no garbage block is ever flushed.
        out_specs = pl.BlockSpec((Rt, Op), lambda ph, i: (i * ph, 0))
        out_shape = jax.ShapeDtypeStruct((Rp, Op), jnp.float32)
    else:
        out_specs = pl.BlockSpec((Rt, Cp), lambda ph, i: (i * ph, 0))
        out_shape = jax.ShapeDtypeStruct((Rp, Cp), jnp.bfloat16)

    out = pl.pallas_call(
        _make_block_kernel(4 * R, fuse_fc),
        grid=(2, n_tiles),
        in_specs=in_specs,
        out_specs=out_specs,
        out_shape=out_shape,
        scratch_shapes=[pltpu.VMEM((1, Cp), jnp.float32),   # channel sum
                        pltpu.VMEM((1, Cp), jnp.float32),   # channel sumsq
                        pltpu.VMEM((2, Cp), jnp.float32)],  # scale / shift
        compiler_params=pltpu.CompilerParams(
            dimension_semantics=("arbitrary", "arbitrary"),
            vmem_limit_bytes=_VMEM_LIMIT_BYTES),
    )(*operands)

    if fuse_fc:
        return out[:N, :fc_w.shape[0]]
    # Slice off row/channel padding; rows are ordered (n, ho, wo).
    return out[:R, :Cout].reshape(N, Ho, Wo, Cout)


def linear(x, w, b):
    """Fallback Linear (only used when the final pooled spatial is not 1x1)."""
    x = x.astype(jnp.float32)
    N, K = x.shape
    out_dim = w.shape[0]
    Np = _round_up(N, 8)
    Kp = _round_up(K, 128)
    Op = _round_up(out_dim, 128)
    x_p = jnp.pad(x, ((0, Np - N), (0, Kp - K)))
    w_p = jnp.pad(jnp.transpose(w), ((0, Kp - K), (0, Op - out_dim)))
    b_p = jnp.pad(b, (0, Op - out_dim)).reshape(1, Op)
    out = pl.pallas_call(
        fc_kernel,
        out_shape=jax.ShapeDtypeStruct((Np, Op), jnp.float32),
        in_specs=[_VMEM_SPEC] * 3,
        out_specs=_VMEM_SPEC,
    )(x_p, w_p, b_p)
    return out[:N, :out_dim]


def cnn_encoder_forward(x_nchw, params):
    """Forward pass of CNNEncoder (weights=None branch). Input is NCHW."""
    x = jnp.transpose(x_nchw, (0, 2, 3, 1))              # -> NHWC
    for i in range(1, 4):
        x = conv_block(x, params[f'conv{i}']['w'],
                       params[f'bn{i}']['gamma'], params[f'bn{i}']['beta'])
    N, H, W, _ = x.shape
    Ho, Wo = (H + 1) // 2, (W + 1) // 2
    fuse_ok = (Ho == 1 and Wo == 1 and
               params['fc']['w'].shape[1] == params['conv4']['w'].shape[0])
    if fuse_ok:
        # Final pooled spatial is 1x1 -> fuse the Linear into block 4's pass.
        return conv_block(x, params['conv4']['w'],
                          params['bn4']['gamma'], params['bn4']['beta'],
                          fc_w=params['fc']['w'], fc_b=params['fc']['b'])
    x = conv_block(x, params['conv4']['w'],
                   params['bn4']['gamma'], params['bn4']['beta'])
    # PyTorch's out.view(N, -1) flattens NCHW order (C, H, W).
    feat = jnp.transpose(x, (0, 3, 1, 2)).reshape(N, -1)
    return linear(feat, params['fc']['w'], params['fc']['b'])


def init_params(key, class_num, num_channel, h_dim, embed_dim):
    """Deterministic init mirroring CNNEncoder.weights_init()."""
    keys = jax.random.split(key, 5)
    params = {}
    cin = num_channel
    conv_std = math.sqrt(2.0 / (3 * 3 * h_dim))
    for i in range(1, 5):
        params[f'conv{i}'] = {
            'w': conv_std * jax.random.normal(keys[i - 1], (h_dim, cin, 3, 3),
                                              jnp.float32),
            'b': jnp.zeros((h_dim,), jnp.float32),  # kept for parity; BN cancels it
        }
        params[f'bn{i}'] = {
            'gamma': jnp.ones((h_dim,), jnp.float32),
            'beta': jnp.zeros((h_dim,), jnp.float32),
        }
        cin = h_dim
    params['fc'] = {
        'w': 0.01 * jax.random.normal(keys[4], (class_num, embed_dim),
                                      jnp.float32),
        'b': jnp.ones((class_num,), jnp.float32),
    }
    return params


# ----------------------------------------------------------------------------
if __name__ == "__main__":
    key = jax.random.PRNGKey(0)
    kx, kp = jax.random.split(key)

    # Small shapes: batch=2, channels=4, spatial=16 -> 8 -> 4 -> 2 -> 1 after
    # four ceil-mode pools, so embed_dim = h_dim * 1 * 1.
    N, num_channel, spatial = 2, 4, 16
    h_dim, class_num = 32, 5
    embed_dim = h_dim * 1 * 1

    x = jax.random.normal(kx, (N, num_channel, spatial, spatial), jnp.float32)
    params = init_params(kp, class_num, num_channel, h_dim, embed_dim)

    fwd = jax.jit(cnn_encoder_forward)
    out = fwd(x, params)
    jax.block_until_ready(out)

    assert out.shape == (N, class_num), out.shape
    assert out.dtype == jnp.float32
    assert bool(jnp.all(jnp.isfinite(out)))
    print("KERNEL_OK")
</pallas_src>

<mosaic_0001>
module attributes {stable_mosaic.version = 11 : i64} {
  func.func @kernel(%arg0: i32, %arg1: i32, %arg2: memref<4x128x128xbf16, #tpu.memory_space<vmem>>, %arg3: memref<128x128xbf16, #tpu.memory_space<vmem>>, %arg4: memref<2x128xf32, #tpu.memory_space<vmem>>, %arg5: memref<128x128xbf16, #tpu.memory_space<vmem>>, %arg6: memref<1x128xf32, #tpu.memory_space<vmem>>, %arg7: memref<1x128xf32, #tpu.memory_space<vmem>>, %arg8: memref<2x128xf32, #tpu.memory_space<vmem>>) attributes {dimension_semantics = [#tpu.dimension_semantics<arbitrary>, #tpu.dimension_semantics<arbitrary>], iteration_bounds = array<i64: 2, 1>, scalar_prefetch = 0 : i64, scratch_operands = 3 : i64, tpu.core_type = #tpu.core_type<tc>, window_params = [{transform_indices = @transform_0, window_bounds = array<i64: 4, 128, 128>}, {pipeline_mode = #tpu.pipeline_mode<synchronous>, transform_indices = @transform_1, window_bounds = array<i64: 128, 128>}, {pipeline_mode = #tpu.pipeline_mode<synchronous>, transform_indices = @transform_2, window_bounds = array<i64: 2, 128>}, {transform_indices = @transform_3, window_bounds = array<i64: 128, 128>}]} {
    %c0_i32 = arith.constant 0 : i32
    %0 = arith.cmpi eq, %arg0, %c0_i32 : i32
    %c0_i32_0 = arith.constant 0 : i32
    %1 = arith.cmpi eq, %arg1, %c0_i32_0 : i32
    %2 = arith.andi %0, %1 : i1
    %3 = arith.extui %2 : i1 to i32
    %c0_i32_1 = arith.constant 0 : i32
    %4 = arith.cmpi ne, %3, %c0_i32_1 : i32
    scf.if %4 {
      %cst_12 = arith.constant 0.000000e+00 : f32
      %20 = vector.broadcast %cst_12 : f32 to vector<1x128xf32>
      %c0_13 = arith.constant 0 : index
      %c0_14 = arith.constant 0 : index
      %21 = vector.load %arg6[%c0_13, %c0_14] : memref<1x128xf32, #tpu.memory_space<vmem>>, vector<1x128xf32>
      tpu.vector_store %arg6[%c0_13, %c0_14], %20 {strides = array<i32>} : memref<1x128xf32, #tpu.memory_space<vmem>>, vector<1x128xf32>,
      %cst_15 = arith.constant 0.000000e+00 : f32
      %22 = vector.broadcast %cst_15 : f32 to vector<1x128xf32>
      %c0_16 = arith.constant 0 : index
      %c0_17 = arith.constant 0 : index
      %23 = vector.load %arg7[%c0_16, %c0_17] : memref<1x128xf32, #tpu.memory_space<vmem>>, vector<1x128xf32>
      tpu.vector_store %arg7[%c0_16, %c0_17], %22 {strides = array<i32>} : memref<1x128xf32, #tpu.memory_space<vmem>>, vector<1x128xf32>,
    } else {
    }
    %c0 = arith.constant 0 : index
    %c0_2 = arith.constant 0 : index
    %c0_3 = arith.constant 0 : index
    %5 = vector.load %arg2[%c0, %c0_2, %c0_3] : memref<4x128x128xbf16, #tpu.memory_space<vmem>>, vector<4x128x128xbf16>
    %6 = vector.shape_cast %5 : vector<4x128x128xbf16> to vector<512x128xbf16>
    %c0_4 = arith.constant 0 : index
    %c0_5 = arith.constant 0 : index
    %7 = vector.load %arg3[%c0_4, %c0_5] : memref<128x128xbf16, #tpu.memory_space<vmem>>, vector<128x128xbf16>
    %cst = arith.constant dense<0.000000e+00> : vector<512x128xf32>
    %8 = tpu.matmul %6, %7, %cst {dimension_numbers = #tpu.dot_dimension_numbers<[1], [0], [0], [1], [0, 0, 1, 1], [], []>} : vector<512x128xbf16>, vector<128x128xbf16>, vector<512x128xf32> -> vector<512x128xf32>
    %c0_i32_6 = arith.constant 0 : i32
    %9 = arith.cmpi eq, %arg0, %c0_i32_6 : i32
    %10 = arith.extui %9 : i1 to i32
    %c0_i32_7 = arith.constant 0 : i32
    %11 = arith.cmpi ne, %10, %c0_i32_7 : i32
    scf.if %11 {
      %c0_12 = arith.constant 0 : index
      %c0_13 = arith.constant 0 : index
      %20 = vector.load %arg6[%c0_12, %c0_13] : memref<1x128xf32, #tpu.memory_space<vmem>>, vector<1x128xf32>
      %cst_14 = arith.constant dense<0.000000e+00> : vector<128xf32>
      %21 = vector.multi_reduction <add>, %8, %cst_14 [0] : vector<512x128xf32> to vector<128xf32>
      %22 = vector.shape_cast %21 : vector<128xf32> to vector<1x128xf32>
      %23 = arith.addf %20, %22 : vector<1x128xf32>
      %c0_15 = arith.constant 0 : index
      %c0_16 = arith.constant 0 : index
      %24 = vector.load %arg6[%c0_15, %c0_16] : memref<1x128xf32, #tpu.memory_space<vmem>>, vector<1x128xf32>
      tpu.vector_store %arg6[%c0_15, %c0_16], %23 {strides = array<i32>} : memref<1x128xf32, #tpu.memory_space<vmem>>, vector<1x128xf32>,
      %c0_17 = arith.constant 0 : index
      %c0_18 = arith.constant 0 : index
      %25 = vector.load %arg7[%c0_17, %c0_18] : memref<1x128xf32, #tpu.memory_space<vmem>>, vector<1x128xf32>
      %26 = arith.mulf %8, %8 : vector<512x128xf32>
      %cst_19 = arith.constant dense<0.000000e+00> : vector<128xf32>
      %27 = vector.multi_reduction <add>, %26, %cst_19 [0] : vector<512x128xf32> to vector<128xf32>
      %28 = vector.shape_cast %27 : vector<128xf32> to vector<1x128xf32>
      %29 = arith.addf %25, %28 : vector<1x128xf32>
      %c0_20 = arith.constant 0 : index
      %c0_21 = arith.constant 0 : index
      %30 = vector.load %arg7[%c0_20, %c0_21] : memref<1x128xf32, #tpu.memory_space<vmem>>, vector<1x128xf32>
      tpu.vector_store %arg7[%c0_20, %c0_21], %29 {strides = array<i32>} : memref<1x128xf32, #tpu.memory_space<vmem>>, vector<1x128xf32>,
    } else {
    }
    %c1_i32 = arith.constant 1 : i32
    %12 = arith.cmpi eq, %arg0, %c1_i32 : i32
    %c0_i32_8 = arith.constant 0 : i32
    %13 = arith.cmpi eq, %arg1, %c0_i32_8 : i32
    %14 = arith.andi %12, %13 : i1
    %15 = arith.extui %14 : i1 to i32
    %c0_i32_9 = arith.constant 0 : i32
    %16 = arith.cmpi ne, %15, %c0_i32_9 : i32
    scf.if %16 {
      %c0_12 = arith.constant 0 : index
      %c0_13 = arith.constant 0 : index
      %20 = vector.load %arg6[%c0_12, %c0_13] : memref<1x128xf32, #tpu.memory_space<vmem>>, vector<1x128xf32>
      %cst_14 = arith.constant 0.001953125 : f32
      %21 = vector.broadcast %cst_14 : f32 to vector<1x128xf32>
      %22 = arith.mulf %20, %21 : vector<1x128xf32>
      %c0_15 = arith.constant 0 : index
      %c0_16 = arith.constant 0 : index
      %23 = vector.load %arg7[%c0_15, %c0_16] : memref<1x128xf32, #tpu.memory_space<vmem>>, vector<1x128xf32>
      %cst_17 = arith.constant 0.001953125 : f32
      %24 = vector.broadcast %cst_17 : f32 to vector<1x128xf32>
      %25 = arith.mulf %23, %24 : vector<1x128xf32>
      %26 = arith.mulf %22, %22 : vector<1x128xf32>
      %27 = arith.subf %25, %26 : vector<1x128xf32>
      %cst_18 = arith.constant 0.000000e+00 : f32
      %28 = vector.broadcast %cst_18 : f32 to vector<1x128xf32>
      %29 = arith.maximumf %27, %28 : vector<1x128xf32>
      %c0_19 = arith.constant 0 : index
      %c0_20 = arith.constant 0 : index
      %30 = vector.load %arg4[%c0_19, %c0_20] : memref<2x128xf32, #tpu.memory_space<vmem>>, vector<1x128xf32>
      %cst_21 = arith.constant 9.99999974E-6 : f32
      %31 = vector.broadcast %cst_21 : f32 to vector<1x128xf32>
      %32 = arith.addf %29, %31 : vector<1x128xf32>
      %33 = math.rsqrt %32 : vector<1x128xf32>
      %34 = arith.mulf %30, %33 : vector<1x128xf32>
      %c0_22 = arith.constant 0 : index
      %c0_23 = arith.constant 0 : index
      %35 = vector.load %arg8[%c0_22, %c0_23] : memref<2x128xf32, #tpu.memory_space<vmem>>, vector<1x128xf32>
      tpu.vector_store %arg8[%c0_22, %c0_23], %34 {strides = array<i32>} : memref<2x128xf32, #tpu.memory_space<vmem>>, vector<1x128xf32>,
      %c1 = arith.constant 1 : index
      %c0_24 = arith.constant 0 : index
      %36 = vector.load %arg4[%c1, %c0_24] : memref<2x128xf32, #tpu.memory_space<vmem>>, vector<1x128xf32>
      %37 = arith.mulf %22, %34 : vector<1x128xf32>
      %38 = arith.subf %36, %37 : vector<1x128xf32>
      %c1_25 = arith.constant 1 : index
      %c0_26 = arith.constant 0 : index
      %39 = vector.load %arg8[%c1_25, %c0_26] : memref<2x128xf32, #tpu.memory_space<vmem>>, vector<1x128xf32>
      tpu.vector_store %arg8[%c1_25, %c0_26], %38 {strides = array<i32>} : memref<2x128xf32, #tpu.memory_space<vmem>>, vector<1x128xf32>,
    } else {
    }
    %c1_i32_10 = arith.constant 1 : i32
    %17 = arith.cmpi eq, %arg0, %c1_i32_10 : i32
    %18 = arith.extui %17 : i1 to i32
    %c0_i32_11 = arith.constant 0 : i32
    %19 = arith.cmpi ne, %18, %c0_i32_11 : i32
    scf.if %19 {
      %c0_12 = arith.constant 0 : index
      %c0_13 = arith.constant 0 : index
      %20 = vector.load %arg8[%c0_12, %c0_13] : memref<2x128xf32, #tpu.memory_space<vmem>>, vector<1x128xf32>
      %c1 = arith.constant 1 : index
      %c0_14 = arith.constant 0 : index
      %21 = vector.load %arg8[%c1, %c0_14] : memref<2x128xf32, #tpu.memory_space<vmem>>, vector<1x128xf32>
      %22 = vector.shape_cast %8 : vector<512x128xf32> to vector<4x128x128xf32>
      %23 = vector.extract_strided_slice %22 {offsets = [0, 0, 0], sizes = [1, 128, 128], strides = [1, 1, 1]} : vector<4x128x128xf32> to vector<1x128x128xf32>
      %24 = vector.shape_cast %23 : vector<1x128x128xf32> to vector<128x128xf32>
      %25 = vector.broadcast %20 : vector<1x128xf32> to vector<128x128xf32>
      %26 = arith.mulf %24, %25 : vector<128x128xf32>
      %27 = vector.extract_strided_slice %22 {offsets = [1, 0, 0], sizes = [1, 128, 128], strides = [1, 1, 1]} : vector<4x128x128xf32> to vector<1x128x128xf32>
      %28 = vector.shape_cast %27 : vector<1x128x128xf32> to vector<128x128xf32>
      %29 = vector.broadcast %20 : vector<1x128xf32> to vector<128x128xf32>
      %30 = arith.mulf %28, %29 : vector<128x128xf32>
      %31 = arith.maximumf %26, %30 : vector<128x128xf32>
      %32 = vector.extract_strided_slice %22 {offsets = [2, 0, 0], sizes = [1, 128, 128], strides = [1, 1, 1]} : vector<4x128x128xf32> to vector<1x128x128xf32>
      %33 = vector.shape_cast %32 : vector<1x128x128xf32> to vector<128x128xf32>
      %34 = vector.broadcast %20 : vector<1x128xf32> to vector<128x128xf32>
      %35 = arith.mulf %33, %34 : vector<128x128xf32>
      %36 = arith.maximumf %31, %35 : vector<128x128xf32>
      %37 = vector.extract_strided_slice %22 {offsets = [3, 0, 0], sizes = [1, 128, 128], strides = [1, 1, 1]} : vector<4x128x128xf32> to vector<1x128x128xf32>
      %38 = vector.shape_cast %37 : vector<1x128x128xf32> to vector<128x128xf32>
      %39 = vector.broadcast %20 : vector<1x128xf32> to vector<128x128xf32>
      %40 = arith.mulf %38, %39 : vector<128x128xf32>
      %41 = arith.maximumf %36, %40 : vector<128x128xf32>
      %42 = vector.broadcast %21 : vector<1x128xf32> to vector<128x128xf32>
      %43 = arith.addf %41, %42 : vector<128x128xf32>
      %cst_15 = arith.constant 0.000000e+00 : f32
      %44 = vector.broadcast %cst_15 : f32 to vector<128x128xf32>
      %45 = arith.maximumf %43, %44 : vector<128x128xf32>
      %46 = arith.truncf %45 : vector<128x128xf32> to vector<128x128xbf16>
      %c0_16 = arith.constant 0 : index
      %c0_17 = arith.constant 0 : index
      %47 = vector.load %arg5[%c0_16, %c0_17] : memref<128x128xbf16, #tpu.memory_space<vmem>>, vector<128x128xbf16>
      tpu.vector_store %arg5[%c0_16, %c0_17], %46 {strides = array<i32>} : memref<128x128xbf16, #tpu.memory_space<vmem>>, vector<128x128xbf16>,
    } else {
    }
    return
  }
  func.func @transform_0(%arg0: i32, %arg1: i32) -> (i32, i32, i32) {
    %c0_i32 = arith.constant 0 : i32
    %c0_i32_0 = arith.constant 0 : i32
    %c0_i32_1 = arith.constant 0 : i32
    return %c0_i32, %arg1, %c0_i32_0 : i32, i32, i32
  }
  func.func @transform_1(%arg0: i32, %arg1: i32) -> (i32, i32) {
    %c0_i32 = arith.constant 0 : i32
    %c0_i32_0 = arith.constant 0 : i32
    %c0_i32_1 = arith.constant 0 : i32
    return %c0_i32, %c0_i32_0 : i32, i32
  }
  func.func @transform_2(%arg0: i32, %arg1: i32) -> (i32, i32) {
    %c0_i32 = arith.constant 0 : i32
    %c0_i32_0 = arith.constant 0 : i32
    %c0_i32_1 = arith.constant 0 : i32
    return %c0_i32, %c0_i32_0 : i32, i32
  }
  func.func @transform_3(%arg0: i32, %arg1: i32) -> (i32, i32) {
    %0 = arith.muli %arg1, %arg0 : i32
    %c0_i32 = arith.constant 0 : i32
    %c0_i32_0 = arith.constant 0 : i32
    return %0, %c0_i32 : i32, i32
  }
}

module attributes {stable_mosaic.version = 11 : i64} {
  func.func @kernel(%arg0: i32, %arg1: i32, %arg2: memref<4x32x384xbf16, #tpu.memory_space<vmem>>, %arg3: memref<384x128xbf16, #tpu.memory_space<vmem>>, %arg4: memref<2x128xf32, #tpu.memory_space<vmem>>, %arg5: memref<32x128xbf16, #tpu.memory_space<vmem>>, %arg6: memref<1x128xf32, #tpu.memory_space<vmem>>, %arg7: memref<1x128xf32, #tpu.memory_space<vmem>>, %arg8: memref<2x128xf32, #tpu.memory_space<vmem>>) attributes {dimension_semantics = [#tpu.dimension_semantics<arbitrary>, #tpu.dimension_semantics<arbitrary>], iteration_bounds = array<i64: 2, 1>, scalar_prefetch = 0 : i64, scratch_operands = 3 : i64, tpu.core_type = #tpu.core_type<tc>, window_params = [{transform_indices = @transform_0, window_bounds = array<i64: 4, 32, 384>}, {pipeline_mode = #tpu.pipeline_mode<synchronous>, transform_indices = @transform_1, window_bounds = array<i64: 384, 128>}, {pipeline_mode = #tpu.pipeline_mode<synchronous>, transform_indices = @transform_2, window_bounds = array<i64: 2, 128>}, {transform_indices = @transform_3, window_bounds = array<i64: 32, 128>}]} {
    %c0_i32 = arith.constant 0 : i32
    %0 = arith.cmpi eq, %arg0, %c0_i32 : i32
    %c0_i32_0 = arith.constant 0 : i32
    %1 = arith.cmpi eq, %arg1, %c0_i32_0 : i32
    %2 = arith.andi %0, %1 : i1
    %3 = arith.extui %2 : i1 to i32
    %c0_i32_1 = arith.constant 0 : i32
    %4 = arith.cmpi ne, %3, %c0_i32_1 : i32
    scf.if %4 {
      %cst_12 = arith.constant 0.000000e+00 : f32
      %20 = vector.broadcast %cst_12 : f32 to vector<1x128xf32>
      %c0_13 = arith.constant 0 : index
      %c0_14 = arith.constant 0 : index
      %21 = vector.load %arg6[%c0_13, %c0_14] : memref<1x128xf32, #tpu.memory_space<vmem>>, vector<1x128xf32>
      tpu.vector_store %arg6[%c0_13, %c0_14], %20 {strides = array<i32>} : memref<1x128xf32, #tpu.memory_space<vmem>>, vector<1x128xf32>,
      %cst_15 = arith.constant 0.000000e+00 : f32
      %22 = vector.broadcast %cst_15 : f32 to vector<1x128xf32>
      %c0_16 = arith.constant 0 : index
      %c0_17 = arith.constant 0 : index
      %23 = vector.load %arg7[%c0_16, %c0_17] : memref<1x128xf32, #tpu.memory_space<vmem>>, vector<1x128xf32>
      tpu.vector_store %arg7[%c0_16, %c0_17], %22 {strides = array<i32>} : memref<1x128xf32, #tpu.memory_space<vmem>>, vector<1x128xf32>,
    } else {
    }
    %c0 = arith.constant 0 : index
    %c0_2 = arith.constant 0 : index
    %c0_3 = arith.constant 0 : index
    %5 = vector.load %arg2[%c0, %c0_2, %c0_3] : memref<4x32x384xbf16, #tpu.memory_space<vmem>>, vector<4x32x384xbf16>
    %6 = vector.shape_cast %5 : vector<4x32x384xbf16> to vector<128x384xbf16>
    %c0_4 = arith.constant 0 : index
    %c0_5 = arith.constant 0 : index
    %7 = vector.load %arg3[%c0_4, %c0_5] : memref<384x128xbf16, #tpu.memory_space<vmem>>, vector<384x128xbf16>
    %cst = arith.constant dense<0.000000e+00> : vector<128x128xf32>
    %8 = tpu.matmul %6, %7, %cst {dimension_numbers = #tpu.dot_dimension_numbers<[1], [0], [0], [1], [0, 0, 1, 1], [], []>} : vector<128x384xbf16>, vector<384x128xbf16>, vector<128x128xf32> -> vector<128x128xf32>
    %c0_i32_6 = arith.constant 0 : i32
    %9 = arith.cmpi eq, %arg0, %c0_i32_6 : i32
    %10 = arith.extui %9 : i1 to i32
    %c0_i32_7 = arith.constant 0 : i32
    %11 = arith.cmpi ne, %10, %c0_i32_7 : i32
    scf.if %11 {
      %c0_12 = arith.constant 0 : index
      %c0_13 = arith.constant 0 : index
      %20 = vector.load %arg6[%c0_12, %c0_13] : memref<1x128xf32, #tpu.memory_space<vmem>>, vector<1x128xf32>
      %cst_14 = arith.constant dense<0.000000e+00> : vector<128xf32>
      %21 = vector.multi_reduction <add>, %8, %cst_14 [0] : vector<128x128xf32> to vector<128xf32>
      %22 = vector.shape_cast %21 : vector<128xf32> to vector<1x128xf32>
      %23 = arith.addf %20, %22 : vector<1x128xf32>
      %c0_15 = arith.constant 0 : index
      %c0_16 = arith.constant 0 : index
      %24 = vector.load %arg6[%c0_15, %c0_16] : memref<1x128xf32, #tpu.memory_space<vmem>>, vector<1x128xf32>
      tpu.vector_store %arg6[%c0_15, %c0_16], %23 {strides = array<i32>} : memref<1x128xf32, #tpu.memory_space<vmem>>, vector<1x128xf32>,
      %c0_17 = arith.constant 0 : index
      %c0_18 = arith.constant 0 : index
      %25 = vector.load %arg7[%c0_17, %c0_18] : memref<1x128xf32, #tpu.memory_space<vmem>>, vector<1x128xf32>
      %26 = arith.mulf %8, %8 : vector<128x128xf32>
      %cst_19 = arith.constant dense<0.000000e+00> : vector<128xf32>
      %27 = vector.multi_reduction <add>, %26, %cst_19 [0] : vector<128x128xf32> to vector<128xf32>
      %28 = vector.shape_cast %27 : vector<128xf32> to vector<1x128xf32>
      %29 = arith.addf %25, %28 : vector<1x128xf32>
      %c0_20 = arith.constant 0 : index
      %c0_21 = arith.constant 0 : index
      %30 = vector.load %arg7[%c0_20, %c0_21] : memref<1x128xf32, #tpu.memory_space<vmem>>, vector<1x128xf32>
      tpu.vector_store %arg7[%c0_20, %c0_21], %29 {strides = array<i32>} : memref<1x128xf32, #tpu.memory_space<vmem>>, vector<1x128xf32>,
    } else {
    }
    %c1_i32 = arith.constant 1 : i32
    %12 = arith.cmpi eq, %arg0, %c1_i32 : i32
    %c0_i32_8 = arith.constant 0 : i32
    %13 = arith.cmpi eq, %arg1, %c0_i32_8 : i32
    %14 = arith.andi %12, %13 : i1
    %15 = arith.extui %14 : i1 to i32
    %c0_i32_9 = arith.constant 0 : i32
    %16 = arith.cmpi ne, %15, %c0_i32_9 : i32
    scf.if %16 {
      %c0_12 = arith.constant 0 : index
      %c0_13 = arith.constant 0 : index
      %20 = vector.load %arg6[%c0_12, %c0_13] : memref<1x128xf32, #tpu.memory_space<vmem>>, vector<1x128xf32>
      %cst_14 = arith.constant 7.812500e-03 : f32
      %21 = vector.broadcast %cst_14 : f32 to vector<1x128xf32>
      %22 = arith.mulf %20, %21 : vector<1x128xf32>
      %c0_15 = arith.constant 0 : index
      %c0_16 = arith.constant 0 : index
      %23 = vector.load %arg7[%c0_15, %c0_16] : memref<1x128xf32, #tpu.memory_space<vmem>>, vector<1x128xf32>
      %cst_17 = arith.constant 7.812500e-03 : f32
      %24 = vector.broadcast %cst_17 : f32 to vector<1x128xf32>
      %25 = arith.mulf %23, %24 : vector<1x128xf32>
      %26 = arith.mulf %22, %22 : vector<1x128xf32>
      %27 = arith.subf %25, %26 : vector<1x128xf32>
      %cst_18 = arith.constant 0.000000e+00 : f32
      %28 = vector.broadcast %cst_18 : f32 to vector<1x128xf32>
      %29 = arith.maximumf %27, %28 : vector<1x128xf32>
      %c0_19 = arith.constant 0 : index
      %c0_20 = arith.constant 0 : index
      %30 = vector.load %arg4[%c0_19, %c0_20] : memref<2x128xf32, #tpu.memory_space<vmem>>, vector<1x128xf32>
      %cst_21 = arith.constant 9.99999974E-6 : f32
      %31 = vector.broadcast %cst_21 : f32 to vector<1x128xf32>
      %32 = arith.addf %29, %31 : vector<1x128xf32>
      %33 = math.rsqrt %32 : vector<1x128xf32>
      %34 = arith.mulf %30, %33 : vector<1x128xf32>
      %c0_22 = arith.constant 0 : index
      %c0_23 = arith.constant 0 : index
      %35 = vector.load %arg8[%c0_22, %c0_23] : memref<2x128xf32, #tpu.memory_space<vmem>>, vector<1x128xf32>
      tpu.vector_store %arg8[%c0_22, %c0_23], %34 {strides = array<i32>} : memref<2x128xf32, #tpu.memory_space<vmem>>, vector<1x128xf32>,
      %c1 = arith.constant 1 : index
      %c0_24 = arith.constant 0 : index
      %36 = vector.load %arg4[%c1, %c0_24] : memref<2x128xf32, #tpu.memory_space<vmem>>, vector<1x128xf32>
      %37 = arith.mulf %22, %34 : vector<1x128xf32>
      %38 = arith.subf %36, %37 : vector<1x128xf32>
      %c1_25 = arith.constant 1 : index
      %c0_26 = arith.constant 0 : index
      %39 = vector.load %arg8[%c1_25, %c0_26] : memref<2x128xf32, #tpu.memory_space<vmem>>, vector<1x128xf32>
      tpu.vector_store %arg8[%c1_25, %c0_26], %38 {strides = array<i32>} : memref<2x128xf32, #tpu.memory_space<vmem>>, vector<1x128xf32>,
    } else {
    }
    %c1_i32_10 = arith.constant 1 : i32
    %17 = arith.cmpi eq, %arg0, %c1_i32_10 : i32
    %18 = arith.extui %17 : i1 to i32
    %c0_i32_11 = arith.constant 0 : i32
    %19 = arith.cmpi ne, %18, %c0_i32_11 : i32
    scf.if %19 {
      %c0_12 = arith.constant 0 : index
      %c0_13 = arith.constant 0 : index
      %20 = vector.load %arg8[%c0_12, %c0_13] : memref<2x128xf32, #tpu.memory_space<vmem>>, vector<1x128xf32>
      %c1 = arith.constant 1 : index
      %c0_14 = arith.constant 0 : index
      %21 = vector.load %arg8[%c1, %c0_14] : memref<2x128xf32, #tpu.memory_space<vmem>>, vector<1x128xf32>
      %22 = vector.shape_cast %8 : vector<128x128xf32> to vector<4x32x128xf32>
      %23 = vector.extract_strided_slice %22 {offsets = [0, 0, 0], sizes = [1, 32, 128], strides = [1, 1, 1]} : vector<4x32x128xf32> to vector<1x32x128xf32>
      %24 = vector.shape_cast %23 : vector<1x32x128xf32> to vector<32x128xf32>
      %25 = vector.broadcast %20 : vector<1x128xf32> to vector<32x128xf32>
      %26 = arith.mulf %24, %25 : vector<32x128xf32>
      %27 = vector.extract_strided_slice %22 {offsets = [1, 0, 0], sizes = [1, 32, 128], strides = [1, 1, 1]} : vector<4x32x128xf32> to vector<1x32x128xf32>
      %28 = vector.shape_cast %27 : vector<1x32x128xf32> to vector<32x128xf32>
      %29 = vector.broadcast %20 : vector<1x128xf32> to vector<32x128xf32>
      %30 = arith.mulf %28, %29 : vector<32x128xf32>
      %31 = arith.maximumf %26, %30 : vector<32x128xf32>
      %32 = vector.extract_strided_slice %22 {offsets = [2, 0, 0], sizes = [1, 32, 128], strides = [1, 1, 1]} : vector<4x32x128xf32> to vector<1x32x128xf32>
      %33 = vector.shape_cast %32 : vector<1x32x128xf32> to vector<32x128xf32>
      %34 = vector.broadcast %20 : vector<1x128xf32> to vector<32x128xf32>
      %35 = arith.mulf %33, %34 : vector<32x128xf32>
      %36 = arith.maximumf %31, %35 : vector<32x128xf32>
      %37 = vector.extract_strided_slice %22 {offsets = [3, 0, 0], sizes = [1, 32, 128], strides = [1, 1, 1]} : vector<4x32x128xf32> to vector<1x32x128xf32>
      %38 = vector.shape_cast %37 : vector<1x32x128xf32> to vector<32x128xf32>
      %39 = vector.broadcast %20 : vector<1x128xf32> to vector<32x128xf32>
      %40 = arith.mulf %38, %39 : vector<32x128xf32>
      %41 = arith.maximumf %36, %40 : vector<32x128xf32>
      %42 = vector.broadcast %21 : vector<1x128xf32> to vector<32x128xf32>
      %43 = arith.addf %41, %42 : vector<32x128xf32>
      %cst_15 = arith.constant 0.000000e+00 : f32
      %44 = vector.broadcast %cst_15 : f32 to vector<32x128xf32>
      %45 = arith.maximumf %43, %44 : vector<32x128xf32>
      %46 = arith.truncf %45 : vector<32x128xf32> to vector<32x128xbf16>
      %c0_16 = arith.constant 0 : index
      %c0_17 = arith.constant 0 : index
      %47 = vector.load %arg5[%c0_16, %c0_17] : memref<32x128xbf16, #tpu.memory_space<vmem>>, vector<32x128xbf16>
      tpu.vector_store %arg5[%c0_16, %c0_17], %46 {strides = array<i32>} : memref<32x128xbf16, #tpu.memory_space<vmem>>, vector<32x128xbf16>,
    } else {
    }
    return
  }
  func.func @transform_0(%arg0: i32, %arg1: i32) -> (i32, i32, i32) {
    %c0_i32 = arith.constant 0 : i32
    %c0_i32_0 = arith.constant 0 : i32
    %c0_i32_1 = arith.constant 0 : i32
    return %c0_i32, %arg1, %c0_i32_0 : i32, i32, i32
  }
  func.func @transform_1(%arg0: i32, %arg1: i32) -> (i32, i32) {
    %c0_i32 = arith.constant 0 : i32
    %c0_i32_0 = arith.constant 0 : i32
    %c0_i32_1 = arith.constant 0 : i32
    return %c0_i32, %c0_i32_0 : i32, i32
  }
  func.func @transform_2(%arg0: i32, %arg1: i32) -> (i32, i32) {
    %c0_i32 = arith.constant 0 : i32
    %c0_i32_0 = arith.constant 0 : i32
    %c0_i32_1 = arith.constant 0 : i32
    return %c0_i32, %c0_i32_0 : i32, i32
  }
  func.func @transform_3(%arg0: i32, %arg1: i32) -> (i32, i32) {
    %0 = arith.muli %arg1, %arg0 : i32
    %c0_i32 = arith.constant 0 : i32
    %c0_i32_0 = arith.constant 0 : i32
    return %0, %c0_i32 : i32, i32
  }
}

module attributes {stable_mosaic.version = 11 : i64} {
  func.func @kernel(%arg0: i32, %arg1: i32, %arg2: memref<4x8x384xbf16, #tpu.memory_space<vmem>>, %arg3: memref<384x128xbf16, #tpu.memory_space<vmem>>, %arg4: memref<2x128xf32, #tpu.memory_space<vmem>>, %arg5: memref<8x128xbf16, #tpu.memory_space<vmem>>, %arg6: memref<1x128xf32, #tpu.memory_space<vmem>>, %arg7: memref<1x128xf32, #tpu.memory_space<vmem>>, %arg8: memref<2x128xf32, #tpu.memory_space<vmem>>) attributes {dimension_semantics = [#tpu.dimension_semantics<arbitrary>, #tpu.dimension_semantics<arbitrary>], iteration_bounds = array<i64: 2, 1>, scalar_prefetch = 0 : i64, scratch_operands = 3 : i64, tpu.core_type = #tpu.core_type<tc>, window_params = [{transform_indices = @transform_0, window_bounds = array<i64: 4, 8, 384>}, {pipeline_mode = #tpu.pipeline_mode<synchronous>, transform_indices = @transform_1, window_bounds = array<i64: 384, 128>}, {pipeline_mode = #tpu.pipeline_mode<synchronous>, transform_indices = @transform_2, window_bounds = array<i64: 2, 128>}, {transform_indices = @transform_3, window_bounds = array<i64: 8, 128>}]} {
    %c0_i32 = arith.constant 0 : i32
    %0 = arith.cmpi eq, %arg0, %c0_i32 : i32
    %c0_i32_0 = arith.constant 0 : i32
    %1 = arith.cmpi eq, %arg1, %c0_i32_0 : i32
    %2 = arith.andi %0, %1 : i1
    %3 = arith.extui %2 : i1 to i32
    %c0_i32_1 = arith.constant 0 : i32
    %4 = arith.cmpi ne, %3, %c0_i32_1 : i32
    scf.if %4 {
      %cst_12 = arith.constant 0.000000e+00 : f32
      %20 = vector.broadcast %cst_12 : f32 to vector<1x128xf32>
      %c0_13 = arith.constant 0 : index
      %c0_14 = arith.constant 0 : index
      %21 = vector.load %arg6[%c0_13, %c0_14] : memref<1x128xf32, #tpu.memory_space<vmem>>, vector<1x128xf32>
      tpu.vector_store %arg6[%c0_13, %c0_14], %20 {strides = array<i32>} : memref<1x128xf32, #tpu.memory_space<vmem>>, vector<1x128xf32>,
      %cst_15 = arith.constant 0.000000e+00 : f32
      %22 = vector.broadcast %cst_15 : f32 to vector<1x128xf32>
      %c0_16 = arith.constant 0 : index
      %c0_17 = arith.constant 0 : index
      %23 = vector.load %arg7[%c0_16, %c0_17] : memref<1x128xf32, #tpu.memory_space<vmem>>, vector<1x128xf32>
      tpu.vector_store %arg7[%c0_16, %c0_17], %22 {strides = array<i32>} : memref<1x128xf32, #tpu.memory_space<vmem>>, vector<1x128xf32>,
    } else {
    }
    %c0 = arith.constant 0 : index
    %c0_2 = arith.constant 0 : index
    %c0_3 = arith.constant 0 : index
    %5 = vector.load %arg2[%c0, %c0_2, %c0_3] : memref<4x8x384xbf16, #tpu.memory_space<vmem>>, vector<4x8x384xbf16>
    %6 = vector.shape_cast %5 : vector<4x8x384xbf16> to vector<32x384xbf16>
    %c0_4 = arith.constant 0 : index
    %c0_5 = arith.constant 0 : index
    %7 = vector.load %arg3[%c0_4, %c0_5] : memref<384x128xbf16, #tpu.memory_space<vmem>>, vector<384x128xbf16>
    %cst = arith.constant dense<0.000000e+00> : vector<32x128xf32>
    %8 = tpu.matmul %6, %7, %cst {dimension_numbers = #tpu.dot_dimension_numbers<[1], [0], [0], [1], [0, 0, 1, 1], [], []>} : vector<32x384xbf16>, vector<384x128xbf16>, vector<32x128xf32> -> vector<32x128xf32>
    %c0_i32_6 = arith.constant 0 : i32
    %9 = arith.cmpi eq, %arg0, %c0_i32_6 : i32
    %10 = arith.extui %9 : i1 to i32
    %c0_i32_7 = arith.constant 0 : i32
    %11 = arith.cmpi ne, %10, %c0_i32_7 : i32
    scf.if %11 {
      %c0_12 = arith.constant 0 : index
      %c0_13 = arith.constant 0 : index
      %20 = vector.load %arg6[%c0_12, %c0_13] : memref<1x128xf32, #tpu.memory_space<vmem>>, vector<1x128xf32>
      %cst_14 = arith.constant dense<0.000000e+00> : vector<128xf32>
      %21 = vector.multi_reduction <add>, %8, %cst_14 [0] : vector<32x128xf32> to vector<128xf32>
      %22 = vector.shape_cast %21 : vector<128xf32> to vector<1x128xf32>
      %23 = arith.addf %20, %22 : vector<1x128xf32>
      %c0_15 = arith.constant 0 : index
      %c0_16 = arith.constant 0 : index
      %24 = vector.load %arg6[%c0_15, %c0_16] : memref<1x128xf32, #tpu.memory_space<vmem>>, vector<1x128xf32>
      tpu.vector_store %arg6[%c0_15, %c0_16], %23 {strides = array<i32>} : memref<1x128xf32, #tpu.memory_space<vmem>>, vector<1x128xf32>,
      %c0_17 = arith.constant 0 : index
      %c0_18 = arith.constant 0 : index
      %25 = vector.load %arg7[%c0_17, %c0_18] : memref<1x128xf32, #tpu.memory_space<vmem>>, vector<1x128xf32>
      %26 = arith.mulf %8, %8 : vector<32x128xf32>
      %cst_19 = arith.constant dense<0.000000e+00> : vector<128xf32>
      %27 = vector.multi_reduction <add>, %26, %cst_19 [0] : vector<32x128xf32> to vector<128xf32>
      %28 = vector.shape_cast %27 : vector<128xf32> to vector<1x128xf32>
      %29 = arith.addf %25, %28 : vector<1x128xf32>
      %c0_20 = arith.constant 0 : index
      %c0_21 = arith.constant 0 : index
      %30 = vector.load %arg7[%c0_20, %c0_21] : memref<1x128xf32, #tpu.memory_space<vmem>>, vector<1x128xf32>
      tpu.vector_store %arg7[%c0_20, %c0_21], %29 {strides = array<i32>} : memref<1x128xf32, #tpu.memory_space<vmem>>, vector<1x128xf32>,
    } else {
    }
    %c1_i32 = arith.constant 1 : i32
    %12 = arith.cmpi eq, %arg0, %c1_i32 : i32
    %c0_i32_8 = arith.constant 0 : i32
    %13 = arith.cmpi eq, %arg1, %c0_i32_8 : i32
    %14 = arith.andi %12, %13 : i1
    %15 = arith.extui %14 : i1 to i32
    %c0_i32_9 = arith.constant 0 : i32
    %16 = arith.cmpi ne, %15, %c0_i32_9 : i32
    scf.if %16 {
      %c0_12 = arith.constant 0 : index
      %c0_13 = arith.constant 0 : index
      %20 = vector.load %arg6[%c0_12, %c0_13] : memref<1x128xf32, #tpu.memory_space<vmem>>, vector<1x128xf32>
      %cst_14 = arith.constant 3.125000e-02 : f32
      %21 = vector.broadcast %cst_14 : f32 to vector<1x128xf32>
      %22 = arith.mulf %20, %21 : vector<1x128xf32>
      %c0_15 = arith.constant 0 : index
      %c0_16 = arith.constant 0 : index
      %23 = vector.load %arg7[%c0_15, %c0_16] : memref<1x128xf32, #tpu.memory_space<vmem>>, vector<1x128xf32>
      %cst_17 = arith.constant 3.125000e-02 : f32
      %24 = vector.broadcast %cst_17 : f32 to vector<1x128xf32>
      %25 = arith.mulf %23, %24 : vector<1x128xf32>
      %26 = arith.mulf %22, %22 : vector<1x128xf32>
      %27 = arith.subf %25, %26 : vector<1x128xf32>
      %cst_18 = arith.constant 0.000000e+00 : f32
      %28 = vector.broadcast %cst_18 : f32 to vector<1x128xf32>
      %29 = arith.maximumf %27, %28 : vector<1x128xf32>
      %c0_19 = arith.constant 0 : index
      %c0_20 = arith.constant 0 : index
      %30 = vector.load %arg4[%c0_19, %c0_20] : memref<2x128xf32, #tpu.memory_space<vmem>>, vector<1x128xf32>
      %cst_21 = arith.constant 9.99999974E-6 : f32
      %31 = vector.broadcast %cst_21 : f32 to vector<1x128xf32>
      %32 = arith.addf %29, %31 : vector<1x128xf32>
      %33 = math.rsqrt %32 : vector<1x128xf32>
      %34 = arith.mulf %30, %33 : vector<1x128xf32>
      %c0_22 = arith.constant 0 : index
      %c0_23 = arith.constant 0 : index
      %35 = vector.load %arg8[%c0_22, %c0_23] : memref<2x128xf32, #tpu.memory_space<vmem>>, vector<1x128xf32>
      tpu.vector_store %arg8[%c0_22, %c0_23], %34 {strides = array<i32>} : memref<2x128xf32, #tpu.memory_space<vmem>>, vector<1x128xf32>,
      %c1 = arith.constant 1 : index
      %c0_24 = arith.constant 0 : index
      %36 = vector.load %arg4[%c1, %c0_24] : memref<2x128xf32, #tpu.memory_space<vmem>>, vector<1x128xf32>
      %37 = arith.mulf %22, %34 : vector<1x128xf32>
      %38 = arith.subf %36, %37 : vector<1x128xf32>
      %c1_25 = arith.constant 1 : index
      %c0_26 = arith.constant 0 : index
      %39 = vector.load %arg8[%c1_25, %c0_26] : memref<2x128xf32, #tpu.memory_space<vmem>>, vector<1x128xf32>
      tpu.vector_store %arg8[%c1_25, %c0_26], %38 {strides = array<i32>} : memref<2x128xf32, #tpu.memory_space<vmem>>, vector<1x128xf32>,
    } else {
    }
    %c1_i32_10 = arith.constant 1 : i32
    %17 = arith.cmpi eq, %arg0, %c1_i32_10 : i32
    %18 = arith.extui %17 : i1 to i32
    %c0_i32_11 = arith.constant 0 : i32
    %19 = arith.cmpi ne, %18, %c0_i32_11 : i32
    scf.if %19 {
      %c0_12 = arith.constant 0 : index
      %c0_13 = arith.constant 0 : index
      %20 = vector.load %arg8[%c0_12, %c0_13] : memref<2x128xf32, #tpu.memory_space<vmem>>, vector<1x128xf32>
      %c1 = arith.constant 1 : index
      %c0_14 = arith.constant 0 : index
      %21 = vector.load %arg8[%c1, %c0_14] : memref<2x128xf32, #tpu.memory_space<vmem>>, vector<1x128xf32>
      %22 = vector.shape_cast %8 : vector<32x128xf32> to vector<4x8x128xf32>
      %23 = vector.extract_strided_slice %22 {offsets = [0, 0, 0], sizes = [1, 8, 128], strides = [1, 1, 1]} : vector<4x8x128xf32> to vector<1x8x128xf32>
      %24 = vector.shape_cast %23 : vector<1x8x128xf32> to vector<8x128xf32>
      %25 = vector.broadcast %20 : vector<1x128xf32> to vector<8x128xf32>
      %26 = arith.mulf %24, %25 : vector<8x128xf32>
      %27 = vector.extract_strided_slice %22 {offsets = [1, 0, 0], sizes = [1, 8, 128], strides = [1, 1, 1]} : vector<4x8x128xf32> to vector<1x8x128xf32>
      %28 = vector.shape_cast %27 : vector<1x8x128xf32> to vector<8x128xf32>
      %29 = vector.broadcast %20 : vector<1x128xf32> to vector<8x128xf32>
      %30 = arith.mulf %28, %29 : vector<8x128xf32>
      %31 = arith.maximumf %26, %30 : vector<8x128xf32>
      %32 = vector.extract_strided_slice %22 {offsets = [2, 0, 0], sizes = [1, 8, 128], strides = [1, 1, 1]} : vector<4x8x128xf32> to vector<1x8x128xf32>
      %33 = vector.shape_cast %32 : vector<1x8x128xf32> to vector<8x128xf32>
      %34 = vector.broadcast %20 : vector<1x128xf32> to vector<8x128xf32>
      %35 = arith.mulf %33, %34 : vector<8x128xf32>
      %36 = arith.maximumf %31, %35 : vector<8x128xf32>
      %37 = vector.extract_strided_slice %22 {offsets = [3, 0, 0], sizes = [1, 8, 128], strides = [1, 1, 1]} : vector<4x8x128xf32> to vector<1x8x128xf32>
      %38 = vector.shape_cast %37 : vector<1x8x128xf32> to vector<8x128xf32>
      %39 = vector.broadcast %20 : vector<1x128xf32> to vector<8x128xf32>
      %40 = arith.mulf %38, %39 : vector<8x128xf32>
      %41 = arith.maximumf %36, %40 : vector<8x128xf32>
      %42 = vector.broadcast %21 : vector<1x128xf32> to vector<8x128xf32>
      %43 = arith.addf %41, %42 : vector<8x128xf32>
      %cst_15 = arith.constant 0.000000e+00 : f32
      %44 = vector.broadcast %cst_15 : f32 to vector<8x128xf32>
      %45 = arith.maximumf %43, %44 : vector<8x128xf32>
      %46 = arith.truncf %45 : vector<8x128xf32> to vector<8x128xbf16>
      %c0_16 = arith.constant 0 : index
      %c0_17 = arith.constant 0 : index
      %47 = vector.load %arg5[%c0_16, %c0_17] : memref<8x128xbf16, #tpu.memory_space<vmem>>, vector<8x128xbf16>
      tpu.vector_store %arg5[%c0_16, %c0_17], %46 {strides = array<i32>} : memref<8x128xbf16, #tpu.memory_space<vmem>>, vector<8x128xbf16>,
    } else {
    }
    return
  }
  func.func @transform_0(%arg0: i32, %arg1: i32) -> (i32, i32, i32) {
    %c0_i32 = arith.constant 0 : i32
    %c0_i32_0 = arith.constant 0 : i32
    %c0_i32_1 = arith.constant 0 : i32
    return %c0_i32, %arg1, %c0_i32_0 : i32, i32, i32
  }
  func.func @transform_1(%arg0: i32, %arg1: i32) -> (i32, i32) {
    %c0_i32 = arith.constant 0 : i32
    %c0_i32_0 = arith.constant 0 : i32
    %c0_i32_1 = arith.constant 0 : i32
    return %c0_i32, %c0_i32_0 : i32, i32
  }
  func.func @transform_2(%arg0: i32, %arg1: i32) -> (i32, i32) {
    %c0_i32 = arith.constant 0 : i32
    %c0_i32_0 = arith.constant 0 : i32
    %c0_i32_1 = arith.constant 0 : i32
    return %c0_i32, %c0_i32_0 : i32, i32
  }
  func.func @transform_3(%arg0: i32, %arg1: i32) -> (i32, i32) {
    %0 = arith.muli %arg1, %arg0 : i32
    %c0_i32 = arith.constant 0 : i32
    %c0_i32_0 = arith.constant 0 : i32
    return %0, %c0_i32 : i32, i32
  }
}

module attributes {stable_mosaic.version = 11 : i64} {
  func.func @kernel(%arg0: i32, %arg1: i32, %arg2: memref<4x8x384xbf16, #tpu.memory_space<vmem>>, %arg3: memref<384x128xbf16, #tpu.memory_space<vmem>>, %arg4: memref<2x128xf32, #tpu.memory_space<vmem>>, %arg5: memref<128x128xf32, #tpu.memory_space<vmem>>, %arg6: memref<1x128xf32, #tpu.memory_space<vmem>>, %arg7: memref<8x128xf32, #tpu.memory_space<vmem>>, %arg8: memref<1x128xf32, #tpu.memory_space<vmem>>, %arg9: memref<1x128xf32, #tpu.memory_space<vmem>>, %arg10: memref<2x128xf32, #tpu.memory_space<vmem>>) attributes {dimension_semantics = [#tpu.dimension_semantics<arbitrary>, #tpu.dimension_semantics<arbitrary>], iteration_bounds = array<i64: 2, 1>, scalar_prefetch = 0 : i64, scratch_operands = 3 : i64, tpu.core_type = #tpu.core_type<tc>, window_params = [{transform_indices = @transform_0, window_bounds = array<i64: 4, 8, 384>}, {pipeline_mode = #tpu.pipeline_mode<synchronous>, transform_indices = @transform_1, window_bounds = array<i64: 384, 128>}, {pipeline_mode = #tpu.pipeline_mode<synchronous>, transform_indices = @transform_2, window_bounds = array<i64: 2, 128>}, {pipeline_mode = #tpu.pipeline_mode<synchronous>, transform_indices = @transform_3, window_bounds = array<i64: 128, 128>}, {pipeline_mode = #tpu.pipeline_mode<synchronous>, transform_indices = @transform_4, window_bounds = array<i64: 1, 128>}, {transform_indices = @transform_5, window_bounds = array<i64: 8, 128>}]} {
    %c0_i32 = arith.constant 0 : i32
    %0 = arith.cmpi eq, %arg0, %c0_i32 : i32
    %c0_i32_0 = arith.constant 0 : i32
    %1 = arith.cmpi eq, %arg1, %c0_i32_0 : i32
    %2 = arith.andi %0, %1 : i1
    %3 = arith.extui %2 : i1 to i32
    %c0_i32_1 = arith.constant 0 : i32
    %4 = arith.cmpi ne, %3, %c0_i32_1 : i32
    scf.if %4 {
      %cst_12 = arith.constant 0.000000e+00 : f32
      %20 = vector.broadcast %cst_12 : f32 to vector<1x128xf32>
      %c0_13 = arith.constant 0 : index
      %c0_14 = arith.constant 0 : index
      %21 = vector.load %arg8[%c0_13, %c0_14] : memref<1x128xf32, #tpu.memory_space<vmem>>, vector<1x128xf32>
      tpu.vector_store %arg8[%c0_13, %c0_14], %20 {strides = array<i32>} : memref<1x128xf32, #tpu.memory_space<vmem>>, vector<1x128xf32>,
      %cst_15 = arith.constant 0.000000e+00 : f32
      %22 = vector.broadcast %cst_15 : f32 to vector<1x128xf32>
      %c0_16 = arith.constant 0 : index
      %c0_17 = arith.constant 0 : index
      %23 = vector.load %arg9[%c0_16, %c0_17] : memref<1x128xf32, #tpu.memory_space<vmem>>, vector<1x128xf32>
      tpu.vector_store %arg9[%c0_16, %c0_17], %22 {strides = array<i32>} : memref<1x128xf32, #tpu.memory_space<vmem>>, vector<1x128xf32>,
    } else {
    }
    %c0 = arith.constant 0 : index
    %c0_2 = arith.constant 0 : index
    %c0_3 = arith.constant 0 : index
    %5 = vector.load %arg2[%c0, %c0_2, %c0_3] : memref<4x8x384xbf16, #tpu.memory_space<vmem>>, vector<4x8x384xbf16>
    %6 = vector.shape_cast %5 : vector<4x8x384xbf16> to vector<32x384xbf16>
    %c0_4 = arith.constant 0 : index
    %c0_5 = arith.constant 0 : index
    %7 = vector.load %arg3[%c0_4, %c0_5] : memref<384x128xbf16, #tpu.memory_space<vmem>>, vector<384x128xbf16>
    %cst = arith.constant dense<0.000000e+00> : vector<32x128xf32>
    %8 = tpu.matmul %6, %7, %cst {dimension_numbers = #tpu.dot_dimension_numbers<[1], [0], [0], [1], [0, 0, 1, 1], [], []>} : vector<32x384xbf16>, vector<384x128xbf16>, vector<32x128xf32> -> vector<32x128xf32>
    %c0_i32_6 = arith.constant 0 : i32
    %9 = arith.cmpi eq, %arg0, %c0_i32_6 : i32
    %10 = arith.extui %9 : i1 to i32
    %c0_i32_7 = arith.constant 0 : i32
    %11 = arith.cmpi ne, %10, %c0_i32_7 : i32
    scf.if %11 {
      %c0_12 = arith.constant 0 : index
      %c0_13 = arith.constant 0 : index
      %20 = vector.load %arg8[%c0_12, %c0_13] : memref<1x128xf32, #tpu.memory_space<vmem>>, vector<1x128xf32>
      %cst_14 = arith.constant dense<0.000000e+00> : vector<128xf32>
      %21 = vector.multi_reduction <add>, %8, %cst_14 [0] : vector<32x128xf32> to vector<128xf32>
      %22 = vector.shape_cast %21 : vector<128xf32> to vector<1x128xf32>
      %23 = arith.addf %20, %22 : vector<1x128xf32>
      %c0_15 = arith.constant 0 : index
      %c0_16 = arith.constant 0 : index
      %24 = vector.load %arg8[%c0_15, %c0_16] : memref<1x128xf32, #tpu.memory_space<vmem>>, vector<1x128xf32>
      tpu.vector_store %arg8[%c0_15, %c0_16], %23 {strides = array<i32>} : memref<1x128xf32, #tpu.memory_space<vmem>>, vector<1x128xf32>,
      %c0_17 = arith.constant 0 : index
      %c0_18 = arith.constant 0 : index
      %25 = vector.load %arg9[%c0_17, %c0_18] : memref<1x128xf32, #tpu.memory_space<vmem>>, vector<1x128xf32>
      %26 = arith.mulf %8, %8 : vector<32x128xf32>
      %cst_19 = arith.constant dense<0.000000e+00> : vector<128xf32>
      %27 = vector.multi_reduction <add>, %26, %cst_19 [0] : vector<32x128xf32> to vector<128xf32>
      %28 = vector.shape_cast %27 : vector<128xf32> to vector<1x128xf32>
      %29 = arith.addf %25, %28 : vector<1x128xf32>
      %c0_20 = arith.constant 0 : index
      %c0_21 = arith.constant 0 : index
      %30 = vector.load %arg9[%c0_20, %c0_21] : memref<1x128xf32, #tpu.memory_space<vmem>>, vector<1x128xf32>
      tpu.vector_store %arg9[%c0_20, %c0_21], %29 {strides = array<i32>} : memref<1x128xf32, #tpu.memory_space<vmem>>, vector<1x128xf32>,
    } else {
    }
    %c1_i32 = arith.constant 1 : i32
    %12 = arith.cmpi eq, %arg0, %c1_i32 : i32
    %c0_i32_8 = arith.constant 0 : i32
    %13 = arith.cmpi eq, %arg1, %c0_i32_8 : i32
    %14 = arith.andi %12, %13 : i1
    %15 = arith.extui %14 : i1 to i32
    %c0_i32_9 = arith.constant 0 : i32
    %16 = arith.cmpi ne, %15, %c0_i32_9 : i32
    scf.if %16 {
      %c0_12 = arith.constant 0 : index
      %c0_13 = arith.constant 0 : index
      %20 = vector.load %arg8[%c0_12, %c0_13] : memref<1x128xf32, #tpu.memory_space<vmem>>, vector<1x128xf32>
      %cst_14 = arith.constant 1.250000e-01 : f32
      %21 = vector.broadcast %cst_14 : f32 to vector<1x128xf32>
      %22 = arith.mulf %20, %21 : vector<1x128xf32>
      %c0_15 = arith.constant 0 : index
      %c0_16 = arith.constant 0 : index
      %23 = vector.load %arg9[%c0_15, %c0_16] : memref<1x128xf32, #tpu.memory_space<vmem>>, vector<1x128xf32>
      %cst_17 = arith.constant 1.250000e-01 : f32
      %24 = vector.broadcast %cst_17 : f32 to vector<1x128xf32>
      %25 = arith.mulf %23, %24 : vector<1x128xf32>
      %26 = arith.mulf %22, %22 : vector<1x128xf32>
      %27 = arith.subf %25, %26 : vector<1x128xf32>
      %cst_18 = arith.constant 0.000000e+00 : f32
      %28 = vector.broadcast %cst_18 : f32 to vector<1x128xf32>
      %29 = arith.maximumf %27, %28 : vector<1x128xf32>
      %c0_19 = arith.constant 0 : index
      %c0_20 = arith.constant 0 : index
      %30 = vector.load %arg4[%c0_19, %c0_20] : memref<2x128xf32, #tpu.memory_space<vmem>>, vector<1x128xf32>
      %cst_21 = arith.constant 9.99999974E-6 : f32
      %31 = vector.broadcast %cst_21 : f32 to vector<1x128xf32>
      %32 = arith.addf %29, %31 : vector<1x128xf32>
      %33 = math.rsqrt %32 : vector<1x128xf32>
      %34 = arith.mulf %30, %33 : vector<1x128xf32>
      %c0_22 = arith.constant 0 : index
      %c0_23 = arith.constant 0 : index
      %35 = vector.load %arg10[%c0_22, %c0_23] : memref<2x128xf32, #tpu.memory_space<vmem>>, vector<1x128xf32>
      tpu.vector_store %arg10[%c0_22, %c0_23], %34 {strides = array<i32>} : memref<2x128xf32, #tpu.memory_space<vmem>>, vector<1x128xf32>,
      %c1 = arith.constant 1 : index
      %c0_24 = arith.constant 0 : index
      %36 = vector.load %arg4[%c1, %c0_24] : memref<2x128xf32, #tpu.memory_space<vmem>>, vector<1x128xf32>
      %37 = arith.mulf %22, %34 : vector<1x128xf32>
      %38 = arith.subf %36, %37 : vector<1x128xf32>
      %c1_25 = arith.constant 1 : index
      %c0_26 = arith.constant 0 : index
      %39 = vector.load %arg10[%c1_25, %c0_26] : memref<2x128xf32, #tpu.memory_space<vmem>>, vector<1x128xf32>
      tpu.vector_store %arg10[%c1_25, %c0_26], %38 {strides = array<i32>} : memref<2x128xf32, #tpu.memory_space<vmem>>, vector<1x128xf32>,
    } else {
    }
    %c1_i32_10 = arith.constant 1 : i32
    %17 = arith.cmpi eq, %arg0, %c1_i32_10 : i32
    %18 = arith.extui %17 : i1 to i32
    %c0_i32_11 = arith.constant 0 : i32
    %19 = arith.cmpi ne, %18, %c0_i32_11 : i32
    scf.if %19 {
      %c0_12 = arith.constant 0 : index
      %c0_13 = arith.constant 0 : index
      %20 = vector.load %arg10[%c0_12, %c0_13] : memref<2x128xf32, #tpu.memory_space<vmem>>, vector<1x128xf32>
      %c1 = arith.constant 1 : index
      %c0_14 = arith.constant 0 : index
      %21 = vector.load %arg10[%c1, %c0_14] : memref<2x128xf32, #tpu.memory_space<vmem>>, vector<1x128xf32>
      %22 = vector.shape_cast %8 : vector<32x128xf32> to vector<4x8x128xf32>
      %23 = vector.extract_strided_slice %22 {offsets = [0, 0, 0], sizes = [1, 8, 128], strides = [1, 1, 1]} : vector<4x8x128xf32> to vector<1x8x128xf32>
      %24 = vector.shape_cast %23 : vector<1x8x128xf32> to vector<8x128xf32>
      %25 = vector.broadcast %20 : vector<1x128xf32> to vector<8x128xf32>
      %26 = arith.mulf %24, %25 : vector<8x128xf32>
      %27 = vector.extract_strided_slice %22 {offsets = [1, 0, 0], sizes = [1, 8, 128], strides = [1, 1, 1]} : vector<4x8x128xf32> to vector<1x8x128xf32>
      %28 = vector.shape_cast %27 : vector<1x8x128xf32> to vector<8x128xf32>
      %29 = vector.broadcast %20 : vector<1x128xf32> to vector<8x128xf32>
      %30 = arith.mulf %28, %29 : vector<8x128xf32>
      %31 = arith.maximumf %26, %30 : vector<8x128xf32>
      %32 = vector.extract_strided_slice %22 {offsets = [2, 0, 0], sizes = [1, 8, 128], strides = [1, 1, 1]} : vector<4x8x128xf32> to vector<1x8x128xf32>
      %33 = vector.shape_cast %32 : vector<1x8x128xf32> to vector<8x128xf32>
      %34 = vector.broadcast %20 : vector<1x128xf32> to vector<8x128xf32>
      %35 = arith.mulf %33, %34 : vector<8x128xf32>
      %36 = arith.maximumf %31, %35 : vector<8x128xf32>
      %37 = vector.extract_strided_slice %22 {offsets = [3, 0, 0], sizes = [1, 8, 128], strides = [1, 1, 1]} : vector<4x8x128xf32> to vector<1x8x128xf32>
      %38 = vector.shape_cast %37 : vector<1x8x128xf32> to vector<8x128xf32>
      %39 = vector.broadcast %20 : vector<1x128xf32> to vector<8x128xf32>
      %40 = arith.mulf %38, %39 : vector<8x128xf32>
      %41 = arith.maximumf %36, %40 : vector<8x128xf32>
      %42 = vector.broadcast %21 : vector<1x128xf32> to vector<8x128xf32>
      %43 = arith.addf %41, %42 : vector<8x128xf32>
      %cst_15 = arith.constant 0.000000e+00 : f32
      %44 = vector.broadcast %cst_15 : f32 to vector<8x128xf32>
      %45 = arith.maximumf %43, %44 : vector<8x128xf32>
      %c0_16 = arith.constant 0 : index
      %c0_17 = arith.constant 0 : index
      %46 = vector.load %arg5[%c0_16, %c0_17] : memref<128x128xf32, #tpu.memory_space<vmem>>, vector<128x128xf32>
      %cst_18 = arith.constant dense<0.000000e+00> : vector<8x128xf32>
      %47 = tpu.matmul %45, %46, %cst_18 {dimension_numbers = #tpu.dot_dimension_numbers<[1], [0], [0], [1], [0, 0, 1, 1], [], []>} : vector<8x128xf32>, vector<128x128xf32>, vector<8x128xf32> -> vector<8x128xf32>
      %c0_19 = arith.constant 0 : index
      %c0_20 = arith.constant 0 : index
      %48 = vector.load %arg6[%c0_19, %c0_20] : memref<1x128xf32, #tpu.memory_space<vmem>>, vector<1x128xf32>
      %49 = vector.broadcast %48 : vector<1x128xf32> to vector<8x128xf32>
      %50 = arith.addf %47, %49 : vector<8x128xf32>
      %c0_21 = arith.constant 0 : index
      %c0_22 = arith.constant 0 : index
      %51 = vector.load %arg7[%c0_21, %c0_22] : memref<8x128xf32, #tpu.memory_space<vmem>>, vector<8x128xf32>
      tpu.vector_store %arg7[%c0_21, %c0_22], %50 {strides = array<i32>} : memref<8x128xf32, #tpu.memory_space<vmem>>, vector<8x128xf32>,
    } else {
    }
    return
  }
  func.func @transform_0(%arg0: i32, %arg1: i32) -> (i32, i32, i32) {
    %c0_i32 = arith.constant 0 : i32
    %c0_i32_0 = arith.constant 0 : i32
    %c0_i32_1 = arith.constant 0 : i32
    return %c0_i32, %arg1, %c0_i32_0 : i32, i32, i32
  }
  func.func @transform_1(%arg0: i32, %arg1: i32) -> (i32, i32) {
    %c0_i32 = arith.constant 0 : i32
    %c0_i32_0 = arith.constant 0 : i32
    %c0_i32_1 = arith.constant 0 : i32
    return %c0_i32, %c0_i32_0 : i32, i32
  }
  func.func @transform_2(%arg0: i32, %arg1: i32) -> (i32, i32) {
    %c0_i32 = arith.constant 0 : i32
    %c0_i32_0 = arith.constant 0 : i32
    %c0_i32_1 = arith.constant 0 : i32
    return %c0_i32, %c0_i32_0 : i32, i32
  }
  func.func @transform_3(%arg0: i32, %arg1: i32) -> (i32, i32) {
    %c0_i32 = arith.constant 0 : i32
    %c0_i32_0 = arith.constant 0 : i32
    %c0_i32_1 = arith.constant 0 : i32
    return %c0_i32, %c0_i32_0 : i32, i32
  }
  func.func @transform_4(%arg0: i32, %arg1: i32) -> (i32, i32) {
    %c0_i32 = arith.constant 0 : i32
    %c0_i32_0 = arith.constant 0 : i32
    %c0_i32_1 = arith.constant 0 : i32
    return %c0_i32, %c0_i32_0 : i32, i32
  }
  func.func @transform_5(%arg0: i32, %arg1: i32) -> (i32, i32) {
    %0 = arith.muli %arg1, %arg0 : i32
    %c0_i32 = arith.constant 0 : i32
    %c0_i32_0 = arith.constant 0 : i32
    return %0, %c0_i32 : i32, i32
  }
}

</mosaic_0001>

<bundles_post_ra>
// kernel: cnn_encoder_forward.4
= control target key start
LH: loop header
LB: loop body
LE: loop exit
PB: predicated region body
PF: predicated region fallthrough
CT: control target
= control target key end

     0   :  { %s1733_s12 = smov 0   ;;  %s1735_s13 = smov 0   ;;  %s2384_s0 = inlined_call_operand.vmem [shape: bf16[4,128,128], index: 0, kind: input, shape index: {}]   ;;  %s2385_s1 = inlined_call_operand.vmem [shape: bf16[128,128], index: 1, kind: input, shape index: {}]   ;;  %s2386_s2 = inlined_call_operand.vmem [shape: f32[2,128], index: 2, kind: input, shape index: {}]   ;;  %s2387_s3 = inlined_call_operand.vmem [shape: bf16[128,128], index: 3, kind: output, shape index: {}]  }
   0x1   :  { %s1737_s14 = smov 0  }
   0x2 LB: > { %s25_s15 = sadd.s32 1, %s1706_s13  ;;  %p1353_p0 = scmp.ge.s32.totalorder %s1710_s14, 1  ;;  %s1710_s14 = sphi %s1737_s14, %s13_s14   ;;  %s1706_s13 = sphi %s1735_s13, %s2479_s13   ;;  %s1702_s12 = sphi %s1733_s12, %s2478_s12  }
   0x3   : > { %p27_p1 = scmp.ge.s32.totalorder %s25_s15, 2  ;;  %p152_p2 = scmp.lt.s32.totalorder %s1710_s14, 3 }
   0x5   : > { %s2481_s15 = smov (%p27_p1, %s25_s15), 0  ;;  %p153_p3 = pnand %p1353_p0, %p152_p2 }
   0x7   : > { %156 = sbr.rel (%p153_p3) target bundleno = 557 (0x22d), region = 32 }
   0xe   : > { %p192_p4 = scmp.eq.s32.totalorder %s1702_s12, 0 }
   0xf   : > { %v1712_v0 = vmov (%p192_p4), 0.0  }
  0x10   : > { %197 = sbr.rel (!%p192_p4) target bundleno = 23 (0x17), region = 36  ;;  %198 = vst [vmem:[#allocation2] sm:$0x1] (%p192_p4), %v1712_v0  ;;  %199 = vst [vmem:[#allocation3] sm:$0x1] (%p192_p4), %v1712_v0 }
  0x17 PF: > { %v1646_v1 = vld [vmem:[%s2385_s1] sm:$0xff]   ;;  %v1647_v2 = vld [vmem:[%s2385_s1 + $0x8] sm:$0xff]   ;;  %v1648_v3 = vld [vmem:[%s2385_s1 + $0x10] sm:$0xff]   ;;  %p1395_p5 = scmp.ne.s32.totalorder %s1702_s12, 0 }
  0x18   : > { %1525 = vmatprep.subr.bf16.mxu0 %v1646_v1  ;;  %1605 = vmatprep.subr.bf16.mxu1 %v1646_v1  ;;  %v1649_v4 = vld [vmem:[%s2385_s1 + $0x18] sm:$0xff]   ;;  %v1654_v5 = vld [vmem:[%s2384_s0] sm:$0xff]   ;;  %v1651_v8 = vld [vmem:[%s2385_s1 + $0x28] sm:$0xff]  }
  0x19   : > { %1526 = vmatpush3.bf16.msra.mxu0 %v1646_v1  ;;  %1613 = vmatpush3.bf16.msra.mxu1 %v1646_v1  ;;  %v1655_v6 = vld [vmem:[%s2384_s0 + $0x80] sm:$0xff]   ;;  %v1652_v9 = vld [vmem:[%s2385_s1 + $0x30] sm:$0xff]   ;;  %v1653_v10 = vld [vmem:[%s2385_s1 + $0x38] sm:$0xff]  }
  0x1a   : > { %1527 = vmatprep.subr.bf16.mxu0 %v1647_v2  ;;  %1606 = vmatprep.subr.bf16.mxu1 %v1647_v2  ;;  %v1650_v7 = vld [vmem:[%s2385_s1 + $0x20] sm:$0xff]   ;;  %v1656_v11 = vld [vmem:[%s2384_s0 + $0x8] sm:$0xff]   ;;  %v1658_v13 = vld [vmem:[%s2384_s0 + $0x10] sm:$0xff]  }
  0x1b   : > { %1541 = vmatprep.mubr.bf16.mxu0 %v1654_v5  ;;  %1573 = vmatprep.mubr.bf16.mxu1 %v1655_v6  ;;  %v1657_v12 = vld [vmem:[%s2384_s0 + $0x88] sm:$0xff]   ;;  %v1659_v14 = vld [vmem:[%s2384_s0 + $0x90] sm:$0xff]   ;;  %v1660_v15 = vld [vmem:[%s2384_s0 + $0x18] sm:$0xff]  }
  0x1c   : > { %v1661_v16 = vld [vmem:[%s2384_s0 + $0x98] sm:$0xff]   ;;  %v1662_v17 = vld [vmem:[%s2384_s0 + $0x20] sm:$0xff]   ;;  %v1664_v19 = vld [vmem:[%s2384_s0 + $0x28] sm:$0xff]  }
  0x1d   : > { %1528 = vmatpush3.bf16.msra.mxu0 %v1647_v2  ;;  %1614 = vmatpush3.bf16.msra.mxu1 %v1647_v2  ;;  %v1663_v18 = vld [vmem:[%s2384_s0 + $0xa0] sm:$0xff]   ;;  %v1665_v20 = vld [vmem:[%s2384_s0 + $0xa8] sm:$0xff]   ;;  %v1666_v21 = vld [vmem:[%s2384_s0 + $0x30] sm:$0xff]  }
  0x1e   : > { %1529 = vmatprep.subr.bf16.mxu0 %v1648_v3  ;;  %1607 = vmatprep.subr.bf16.mxu1 %v1648_v3  ;;  %v1667_v22 = vld [vmem:[%s2384_s0 + $0xb0] sm:$0xff]   ;;  %v1668_v23 = vld [vmem:[%s2384_s0 + $0x38] sm:$0xff]   ;;  %v1670_v25 = vld [vmem:[%s2384_s0 + $0x40] sm:$0xff]  }
  0x1f   : > { %v1669_v24 = vld [vmem:[%s2384_s0 + $0xb8] sm:$0xff]   ;;  %v1671_v26 = vld [vmem:[%s2384_s0 + $0xc0] sm:$0xff]   ;;  %v1672_v27 = vld [vmem:[%s2384_s0 + $0x48] sm:$0xff]  }
  0x20   : > { %v1673_v28 = vld [vmem:[%s2384_s0 + $0xc8] sm:$0xff]   ;;  %v1674_v29 = vld [vmem:[%s2384_s0 + $0x50] sm:$0xff]   ;;  %v1676_v31 = vld [vmem:[%s2384_s0 + $0x58] sm:$0xff]  }
  0x21   : > { %1530 = vmatpush3.bf16.msra.mxu0 %v1648_v3  ;;  %1615 = vmatpush3.bf16.msra.mxu1 %v1648_v3  ;;  %v1675_v30 = vld [vmem:[%s2384_s0 + $0xd0] sm:$0xff]   ;;  %v1677_v32 = vld [vmem:[%s2384_s0 + $0xd8] sm:$0xff]   ;;  %v1678_v33 = vld [vmem:[%s2384_s0 + $0x60] sm:$0xff]  }
  0x22   : > { %1531 = vmatprep.subr.bf16.mxu0 %v1649_v4  ;;  %1608 = vmatprep.subr.bf16.mxu1 %v1649_v4  ;;  %v1679_v34 = vld [vmem:[%s2384_s0 + $0xe0] sm:$0xff]   ;;  %v1680_v35 = vld [vmem:[%s2384_s0 + $0x68] sm:$0xff]   ;;  %v1682_v37 = vld [vmem:[%s2384_s0 + $0x70] sm:$0xff]  }
  0x23   : > { %v1681_v36 = vld [vmem:[%s2384_s0 + $0xe8] sm:$0xff]   ;;  %v1683_v38 = vld [vmem:[%s2384_s0 + $0xf0] sm:$0xff]   ;;  %v1684_v39 = vld [vmem:[%s2384_s0 + $0x78] sm:$0xff]  }
  0x24   : > { %v1685_v40 = vld [vmem:[%s2384_s0 + $0xf8] sm:$0xff]  }
  0x25   : > { %1532 = vmatpush3.bf16.msra.mxu0 %v1649_v4  ;;  %1616 = vmatpush3.bf16.msra.mxu1 %v1649_v4 }
  0x26   : > { %1533 = vmatprep.subr.bf16.mxu0 %v1650_v7  ;;  %1609 = vmatprep.subr.bf16.mxu1 %v1650_v7 }
  0x29   : > { %1534 = vmatpush3.bf16.msra.mxu0 %v1650_v7  ;;  %1617 = vmatpush3.bf16.msra.mxu1 %v1650_v7 }
  0x2a   : > { %1535 = vmatprep.subr.bf16.mxu0 %v1651_v8  ;;  %1610 = vmatprep.subr.bf16.mxu1 %v1651_v8 }
  0x2d   : > { %1536 = vmatpush3.bf16.msra.mxu0 %v1651_v8  ;;  %1618 = vmatpush3.bf16.msra.mxu1 %v1651_v8 }
  0x2e   : > { %1537 = vmatprep.subr.bf16.mxu0 %v1652_v9  ;;  %1611 = vmatprep.subr.bf16.mxu1 %v1652_v9 }
  0x31   : > { %1538 = vmatpush3.bf16.msra.mxu0 %v1652_v9  ;;  %1619 = vmatpush3.bf16.msra.mxu1 %v1652_v9 }
  0x32   : > { %1539 = vmatprep.subr.bf16.mxu0 %v1653_v10  ;;  %1612 = vmatprep.subr.bf16.mxu1 %v1653_v10 }
  0x35   : > { %1540 = vmatpush3.bf16.msra.mxu0 %v1653_v10  ;;  %1620 = vmatpush3.bf16.msra.mxu1 %v1653_v10 }
  0x38   : > { %1542 = vmatmul.mubr.bf16.vlgmr.msra.gmra.mrb[0].mxu0 %v1656_v11  ;;  %1574 = vmatmul.mubr.bf16.vlgmr.msra.gmra.mrb[0].mxu1 %v1657_v12 }
  0x39   : > { %1545 = vmatprep.mubr.bf16.mxu0 %v1658_v13  ;;  %1577 = vmatprep.mubr.bf16.mxu1 %v1659_v14 }
  0x40   : > { %1546 = vmatmul.mubr.bf16.gmra.mrb[4].mxu0 %v1660_v15  ;;  %1578 = vmatmul.mubr.bf16.gmra.mrb[4].mxu1 %v1661_v16 }
  0x41   : > { %1549 = vmatprep.mubr.bf16.mxu0 %v1662_v17  ;;  %1581 = vmatprep.mubr.bf16.mxu1 %v1663_v18 }
  0x48   : > { %1550 = vmatmul.mubr.bf16.gmra.mrb[8].mxu0 %v1664_v19  ;;  %1582 = vmatmul.mubr.bf16.gmra.mrb[8].mxu1 %v1665_v20 }
  0x49   : > { %1553 = vmatprep.mubr.bf16.mxu0 %v1666_v21  ;;  %1585 = vmatprep.mubr.bf16.mxu1 %v1667_v22 }
  0x50   : > { %1554 = vmatmul.mubr.bf16.gmra.mrb[12].mxu0 %v1668_v23  ;;  %1586 = vmatmul.mubr.bf16.gmra.mrb[12].mxu1 %v1669_v24 }
  0x51   : > { %1557 = vmatprep.mubr.bf16.mxu0 %v1670_v25  ;;  %1589 = vmatprep.mubr.bf16.mxu1 %v1671_v26 }
  0x58   : > { %1558 = vmatmul.mubr.bf16.gmra.mrb[16].mxu0 %v1672_v27  ;;  %1590 = vmatmul.mubr.bf16.gmra.mrb[16].mxu1 %v1673_v28 }
  0x59   : > { %1561 = vmatprep.mubr.bf16.mxu0 %v1674_v29  ;;  %1593 = vmatprep.mubr.bf16.mxu1 %v1675_v30 }
  0x60   : > { %1562 = vmatmul.mubr.bf16.gmra.mrb[20].mxu0 %v1676_v31  ;;  %1594 = vmatmul.mubr.bf16.gmra.mrb[20].mxu1 %v1677_v32 }
  0x61   : > { %1565 = vmatprep.mubr.bf16.mxu0 %v1678_v33  ;;  %1597 = vmatprep.mubr.bf16.mxu1 %v1679_v34 }
  0x68   : > { %1566 = vmatmul.mubr.bf16.gmra.mrb[24].mxu0 %v1680_v35  ;;  %1598 = vmatmul.mubr.bf16.gmra.mrb[24].mxu1 %v1681_v36 }
  0x69   : > { %1569 = vmatprep.mubr.bf16.mxu0 %v1682_v37  ;;  %1601 = vmatprep.mubr.bf16.mxu1 %v1683_v38 }
  0x70   : > { %1570 = vmatmul.mubr.bf16.gmra.mrb[28].mxu0 %v1684_v39  ;;  %1602 = vmatmul.mubr.bf16.gmra.mrb[28].mxu1 %v1685_v40 }
 0x10b   : > { %v1874_v41 = vpop.f32.mrb[0].mxu0  ;;  %v1876_v42 = vpop.f32.mrb[0].mxu1 }
 0x10c   : > { %2414 = vst [vmem:[#allocation5_spill] sm:$0xff] %v1874_v41  ;;  %v1878_v43 = vpop.f32.mrb[1].mxu0  ;;  %v1880_v44 = vpop.f32.mrb[1].mxu1 }
 0x10d   : > { %2415 = vst [vmem:[#allocation6_spill] sm:$0xff] %v1878_v43  ;;  %v1882_v45 = vpop.f32.mrb[2].mxu0  ;;  %v1884_v46 = vpop.f32.mrb[2].mxu1 }
 0x10e   : > { %v1886_v47 = vpop.f32.mrb[3].mxu0  ;;  %v1888_v48 = vpop.f32.mrb[3].mxu1 }
 0x10f   : > { %2416 = vst [vmem:[#allocation7_spill] sm:$0xff] %v1886_v47 }
 0x113   : > { %v1890_v49 = vpop.f32.mrb[4].mxu0  ;;  %v1892_v50 = vpop.f32.mrb[4].mxu1 }
 0x114   : > { %v1894_v51 = vpop.f32.mrb[5].mxu0  ;;  %v1896_v52 = vpop.f32.mrb[5].mxu1 }
 0x115   : > { %v1898_v53 = vpop.f32.mrb[6].mxu0  ;;  %v1900_v54 = vpop.f32.mrb[6].mxu1 }
 0x116   : > { %v1902_v55 = vpop.f32.mrb[7].mxu0  ;;  %v1904_v56 = vpop.f32.mrb[7].mxu1 }
 0x11b   : > { %v1906_v57 = vpop.f32.mrb[8].mxu0  ;;  %v1908_v58 = vpop.f32.mrb[8].mxu1 }
 0x11c   : > { %v1910_v59 = vpop.f32.mrb[9].mxu0  ;;  %v1912_v60 = vpop.f32.mrb[9].mxu1 }
 0x11d   : > { %v1914_v61 = vpop.f32.mrb[10].mxu0  ;;  %v1916_v62 = vpop.f32.mrb[10].mxu1 }
 0x11e   : > { %v1918_v63 = vpop.f32.mrb[11].mxu0  ;;  %v1920_v0 = vpop.f32.mrb[11].mxu1 }
 0x123   : > { %v1922_v1 = vpop.f32.mrb[12].mxu0  ;;  %v1924_v2 = vpop.f32.mrb[12].mxu1 }
 0x124   : > { %2417 = vst [vmem:[#allocation8_spill] sm:$0xff] %v1922_v1  ;;  %2418 = vst [vmem:[#allocation9_spill] sm:$0xff] %v1924_v2  ;;  %v1926_v3 = vpop.f32.mrb[13].mxu0  ;;  %v1928_v4 = vpop.f32.mrb[13].mxu1 }
 0x125   : > { %2419 = vst [vmem:[#allocation10_spill] sm:$0xff] %v1928_v4  ;;  %v1930_v5 = vpop.f32.mrb[14].mxu0  ;;  %v1932_v6 = vpop.f32.mrb[14].mxu1 }
 0x126   : > { %2420 = vst [vmem:[#allocation11_spill] sm:$0xff] %v1930_v5  ;;  %2421 = vst [vmem:[#allocation12_spill] sm:$0xff] %v1932_v6  ;;  %v1934_v7 = vpop.f32.mrb[15].mxu0  ;;  %v1936_v8 = vpop.f32.mrb[15].mxu1 }
 0x127   : > { %2422 = vst [vmem:[#allocation13_spill] sm:$0xff] %v1934_v7  ;;  %2423 = vst [vmem:[#allocation14_spill] sm:$0xff] %v1936_v8 }
 0x12b   : > { %v1938_v9 = vpop.f32.mrb[16].mxu0  ;;  %v1940_v10 = vpop.f32.mrb[16].mxu1 }
 0x12c   : > { %v1942_v11 = vpop.f32.mrb[17].mxu0  ;;  %v1944_v12 = vpop.f32.mrb[17].mxu1 }
 0x12d   : > { %v1946_v13 = vpop.f32.mrb[18].mxu0  ;;  %v1948_v14 = vpop.f32.mrb[18].mxu1 }
 0x12e   : > { %v1950_v15 = vpop.f32.mrb[19].mxu0  ;;  %v1952_v16 = vpop.f32.mrb[19].mxu1 }
 0x133   : > { %v1954_v17 = vpop.f32.mrb[20].mxu0  ;;  %v1956_v18 = vpop.f32.mrb[20].mxu1 }
 0x134   : > { %2424 = vst [vmem:[#allocation15_spill] sm:$0xff] %v1956_v18  ;;  %v1958_v19 = vpop.f32.mrb[21].mxu0  ;;  %v1960_v20 = vpop.f32.mrb[21].mxu1  ;;  %v886_v18 = vmul.f32 (!%p1395_p5), %v1886_v47, %v1886_v47 }
 0x135   : > { %2425 = vst [vmem:[#allocation16_spill] sm:$0xff] %v1960_v20  ;;  %v1962_v21 = vpop.f32.mrb[22].mxu0  ;;  %v1964_v22 = vpop.f32.mrb[22].mxu1 }
 0x136   : > { %2426 = vst [vmem:[#allocation17_spill] sm:$0xff] %v1964_v22  ;;  %v1966_v23 = vpop.f32.mrb[23].mxu0  ;;  %v1968_v24 = vpop.f32.mrb[23].mxu1  ;;  %v885_v22 = vmul.f32 (!%p1395_p5), %v1878_v43, %v1878_v43 }
 0x137   : > { %2427 = vst [vmem:[#allocation18_spill] sm:$0xff] %v1968_v24 }
 0x13b   : > { %v1970_v25 = vpop.f32.mrb[24].mxu0  ;;  %v1972_v26 = vpop.f32.mrb[24].mxu1 }
 0x13c   : > { %2428 = vst [vmem:[#allocation19_spill] sm:$0xff] %v1972_v26  ;;  %v1974_v27 = vpop.f32.mrb[25].mxu0  ;;  %v1976_v28 = vpop.f32.mrb[25].mxu1 }
 0x13d   : > { %2429 = vst [vmem:[#allocation20_spill] sm:$0xff] %v1976_v28  ;;  %v1978_v29 = vpop.f32.mrb[26].mxu0  ;;  %v1980_v30 = vpop.f32.mrb[26].mxu1 }
 0x13e   : > { %2430 = vst [vmem:[#allocation21_spill] sm:$0xff] %v1980_v30  ;;  %v1982_v31 = vpop.f32.mrb[27].mxu0  ;;  %v1984_v32 = vpop.f32.mrb[27].mxu1  ;;  %v813_v30 = vadd.f32 (!%p1395_p5), %v1886_v47, %v1878_v43 }
 0x13f   : > { %2431 = vst [vmem:[#allocation22_spill] sm:$0xff] %v1984_v32 }
 0x141   : > { %811 = sbr.rel (%p1395_p5) target bundleno = 475 (0x1db), region = 40 }
 0x143   : > { %v1986_v33 = vpop.f32.mrb[28].mxu0  ;;  %v1988_v34 = vpop.f32.mrb[28].mxu1 }
 0x144   : > { %2432 = vst [vmem:[#allocation23_spill] sm:$0xff] %v1986_v33  ;;  %2433 = vst [vmem:[#allocation24_spill] sm:$0xff] %v1988_v34  ;;  %v1990_v35 = vpop.f32.mrb[29].mxu0  ;;  %v1992_v36 = vpop.f32.mrb[29].mxu1  ;;  %v814_v34 = vadd.f32 (!%p1395_p5), %v1874_v41, %v813_v30 }
 0x145   : > { %2434 = vst [vmem:[#allocation25_spill] sm:$0xff] %v1990_v35  ;;  %2435 = vst [vmem:[#allocation26_spill] sm:$0xff] %v1992_v36  ;;  %v1994_v37 = vpop.f32.mrb[30].mxu0  ;;  %v1996_v38 = vpop.f32.mrb[30].mxu1 }
 0x146   : > { %2436 = vst [vmem:[#allocation27_spill] sm:$0xff] %v1994_v37  ;;  %2437 = vst [vmem:[#allocation28_spill] sm:$0xff] %v1996_v38  ;;  %v1998_v39 = vpop.f32.mrb[31].mxu0  ;;  %v2000_v40 = vpop.f32.mrb[31].mxu1  ;;  %v815_v26 = vadd.f32 (!%p1395_p5), %v1882_v45, %v814_v34  ;;  %v887_v34 = vmul.f32 (!%p1395_p5), %v1874_v41, %v1874_v41 }
 0x147   : > { %2438 = vst [vmem:[#allocation29_spill] sm:$0xff] %v1998_v39  ;;  %2439 = vst [vmem:[#allocation30_spill] sm:$0xff] %v2000_v40 }
 0x148   : > { %v816_v36 = vadd.f32 %v815_v26, %v1894_v51 }
 0x14a   : > { %v817_v32 = vadd.f32 %v816_v36, %v1902_v55  ;;  %v949_v36 = vadd.f32 %v886_v18, %v885_v22  ;;  %v892_v22 = vmul.f32 %v1898_v53, %v1898_v53 }
 0x14c   : > { %v818_v38 = vadd.f32 %v1890_v49, %v817_v32  ;;  %v888_v32 = vmul.f32 %v1882_v45, %v1882_v45  ;;  %v950_v43 = vadd.f32 %v949_v36, %v887_v34  ;;  %v893_v36 = vmul.f32 %v1910_v59, %v1910_v59 }
 0x14e   : > { %v819_v28 = vadd.f32 %v1898_v53, %v818_v38  ;;  %v951_v47 = vadd.f32 %v950_v43, %v888_v32 }
 0x150   : > { %v820_v40 = vadd.f32 %v819_v28, %v1910_v59  ;;  %v889_v28 = vmul.f32 %v1894_v51, %v1894_v51 }
 0x152   : > { %v821_v30 = vadd.f32 %v820_v40, %v1918_v63  ;;  %v890_v40 = vmul.f32 %v1902_v55, %v1902_v55  ;;  %v952_v20 = vadd.f32 %v951_v47, %v889_v28 }
 0x154   : > { %v822_v26 = vadd.f32 %v1906_v57, %v821_v30  ;;  %v891_v30 = vmul.f32 %v1890_v49, %v1890_v49 }
 0x156   : > { %v823_v38 = vadd.f32 %v1914_v61, %v822_v26  ;;  %v953_v26 = vadd.f32 %v952_v20, %v890_v40  ;;  %v896_v40 = vmul.f32 %v1914_v61, %v1914_v61 }
 0x158   : > { %v824_v24 = vadd.f32 %v823_v38, %v1926_v3  ;;  %v954_v38 = vadd.f32 %v953_v26, %v891_v30  ;;  %v897_v26 = vmul.f32 %v1926_v3, %v1926_v3 }
 0x15a   : > { %v825_v41 = vadd.f32 %v824_v24, %v1934_v7  ;;  %v894_v24 = vmul.f32 %v1918_v63, %v1918_v63  ;;  %v955_v32 = vadd.f32 %v954_v38, %v892_v22  ;;  %v898_v38 = vmul.f32 %v1934_v7, %v1934_v7  ;;  %v2450_v7 = vld [vmem:[#allocation24_spill] sm:$0xff] }
 0x15c   : > { %v826_v18 = vadd.f32 %v1922_v1, %v825_v41  ;;  %v895_v41 = vmul.f32 %v1906_v57, %v1906_v57  ;;  %v956_v28 = vadd.f32 %v955_v32, %v893_v36  ;;  %v899_v32 = vmul.f32 %v1922_v1, %v1922_v1  ;;  %v2443_v1 = vld [vmem:[#allocation17_spill] sm:$0xff] }
 0x15e   : > { %v827_v34 = vadd.f32 %v1930_v5, %v826_v18  ;;  %v957_v18 = vadd.f32 %v956_v28, %v894_v24  ;;  %v900_v28 = vmul.f32 %v1930_v5, %v1930_v5  ;;  %v2442_v5 = vld [vmem:[#allocation15_spill] sm:$0xff] }
 0x160   : > { %v828_v43 = vadd.f32 %v827_v34, %v1942_v11  ;;  %v958_v34 = vadd.f32 %v957_v18, %v895_v41  ;;  %v901_v18 = vmul.f32 %v1942_v11, %v1942_v11 }
 0x162   : > { %v829_v47 = vadd.f32 %v828_v43, %v1950_v15  ;;  %v959_v43 = vadd.f32 %v958_v34, %v896_v40  ;;  %v902_v34 = vmul.f32 %v1950_v15, %v1950_v15 }
 0x164   : > { %v830_v20 = vadd.f32 %v1938_v9, %v829_v47  ;;  %v960_v47 = vadd.f32 %v959_v43, %v897_v26  ;;  %v903_v43 = vmul.f32 %v1938_v9, %v1938_v9 }
 0x166   : > { %v831_v30 = vadd.f32 %v1946_v13, %v830_v20  ;;  %v961_v20 = vadd.f32 %v960_v47, %v898_v38  ;;  %v904_v47 = vmul.f32 %v1946_v13, %v1946_v13 }
 0x168   : > { %v832_v22 = vadd.f32 %v831_v30, %v1958_v19  ;;  %v962_v30 = vadd.f32 %v961_v20, %v899_v32  ;;  %v905_v20 = vmul.f32 %v1958_v19, %v1958_v19 }
 0x16a   : > { %v833_v36 = vadd.f32 %v832_v22, %v1966_v23  ;;  %v963_v22 = vadd.f32 %v962_v30, %v900_v28  ;;  %v906_v30 = vmul.f32 %v1966_v23, %v1966_v23 }
 0x16c   : > { %v834_v24 = vadd.f32 %v1954_v17, %v833_v36  ;;  %v964_v36 = vadd.f32 %v963_v22, %v901_v18  ;;  %v907_v22 = vmul.f32 %v1954_v17, %v1954_v17 }
 0x16e   : > { %v835_v41 = vadd.f32 %v1962_v21, %v834_v24  ;;  %v965_v24 = vadd.f32 %v964_v36, %v902_v34  ;;  %v908_v36 = vmul.f32 %v1962_v21, %v1962_v21 }
 0x170   : > { %v836_v40 = vadd.f32 %v835_v41, %v1974_v27  ;;  %v966_v41 = vadd.f32 %v965_v24, %v903_v43  ;;  %v909_v24 = vmul.f32 %v1974_v27, %v1974_v27 }
 0x172   : > { %v837_v26 = vadd.f32 %v836_v40, %v1982_v31  ;;  %v967_v40 = vadd.f32 %v966_v41, %v904_v47  ;;  %v910_v41 = vmul.f32 %v1982_v31, %v1982_v31 }
 0x174   : > { %v838_v38 = vadd.f32 %v1970_v25, %v837_v26  ;;  %v968_v26 = vadd.f32 %v967_v40, %v905_v20  ;;  %v911_v40 = vmul.f32 %v1970_v25, %v1970_v25 }
 0x176   : > { %v839_v32 = vadd.f32 %v1978_v29, %v838_v38  ;;  %v969_v38 = vadd.f32 %v968_v26, %v906_v30  ;;  %v912_v26 = vmul.f32 %v1978_v29, %v1978_v29 }
 0x178   : > { %v840_v28 = vadd.f32 %v839_v32, %v1990_v35  ;;  %v970_v32 = vadd.f32 %v969_v38, %v907_v22  ;;  %v913_v38 = vmul.f32 %v1990_v35, %v1990_v35  ;;  %v2449_v35 = vld [vmem:[#allocation30_spill] sm:$0xff] }
 0x17a   : > { %v841_v18 = vadd.f32 %v840_v28, %v1998_v39  ;;  %v971_v28 = vadd.f32 %v970_v32, %v908_v36  ;;  %v914_v32 = vmul.f32 %v1998_v39, %v1998_v39  ;;  %v2448_v39 = vld [vmem:[#allocation26_spill] sm:$0xff] }
 0x17c   : > { %v842_v34 = vadd.f32 %v1986_v33, %v841_v18  ;;  %v972_v18 = vadd.f32 %v971_v28, %v909_v24  ;;  %v915_v28 = vmul.f32 %v1986_v33, %v1986_v33  ;;  %v2441_v33 = vld [vmem:[#allocation18_spill] sm:$0xff] }
 0x17e   : > { %v843_v43 = vadd.f32 %v1994_v37, %v842_v34  ;;  %v973_v34 = vadd.f32 %v972_v18, %v910_v41  ;;  %v916_v18 = vmul.f32 %v1994_v37, %v1994_v37  ;;  %v2440_v37 = vld [vmem:[#allocation16_spill] sm:$0xff] }
 0x180   : > { %v844_v47 = vadd.f32 %v843_v43, %v1880_v44  ;;  %v974_v43 = vadd.f32 %v973_v34, %v911_v40  ;;  %v917_v34 = vmul.f32 %v1880_v44, %v1880_v44 }
 0x182   : > { %v845_v20 = vadd.f32 %v844_v47, %v1888_v48  ;;  %v975_v47 = vadd.f32 %v974_v43, %v912_v26  ;;  %v918_v43 = vmul.f32 %v1888_v48, %v1888_v48 }
 0x184   : > { %v846_v30 = vadd.f32 %v1876_v42, %v845_v20  ;;  %v976_v20 = vadd.f32 %v975_v47, %v913_v38  ;;  %v919_v47 = vmul.f32 %v1876_v42, %v1876_v42 }
 0x186   : > { %v847_v22 = vadd.f32 %v1884_v46, %v846_v30  ;;  %v977_v30 = vadd.f32 %v976_v20, %v914_v32  ;;  %v920_v20 = vmul.f32 %v1884_v46, %v1884_v46 }
 0x188   : > { %v848_v36 = vadd.f32 %v847_v22, %v1896_v52  ;;  %v978_v22 = vadd.f32 %v977_v30, %v915_v28  ;;  %v921_v30 = vmul.f32 %v1896_v52, %v1896_v52 }
 0x18a   : > { %v849_v24 = vadd.f32 %v848_v36, %v1904_v56  ;;  %v979_v36 = vadd.f32 %v978_v22, %v916_v18  ;;  %v922_v22 = vmul.f32 %v1904_v56, %v1904_v56 }
 0x18c   : > { %v850_v41 = vadd.f32 %v1892_v50, %v849_v24  ;;  %v980_v24 = vadd.f32 %v979_v36, %v917_v34  ;;  %v923_v36 = vmul.f32 %v1892_v50, %v1892_v50 }
 0x18e   : > { %v851_v40 = vadd.f32 %v1900_v54, %v850_v41  ;;  %v981_v41 = vadd.f32 %v980_v24, %v918_v43  ;;  %v924_v24 = vmul.f32 %v1900_v54, %v1900_v54 }
 0x190   : > { %v852_v26 = vadd.f32 %v851_v40, %v1912_v60  ;;  %v982_v40 = vadd.f32 %v981_v41, %v919_v47  ;;  %v925_v41 = vmul.f32 %v1912_v60, %v1912_v60 }
 0x192   : > { %v853_v38 = vadd.f32 %v852_v26, %v1920_v0  ;;  %v983_v26 = vadd.f32 %v982_v40, %v920_v20  ;;  %v926_v40 = vmul.f32 %v1920_v0, %v1920_v0 }
 0x194   : > { %v854_v32 = vadd.f32 %v1908_v58, %v853_v38  ;;  %v984_v38 = vadd.f32 %v983_v26, %v921_v30  ;;  %v927_v26 = vmul.f32 %v1908_v58, %v1908_v58 }
 0x196   : > { %v855_v28 = vadd.f32 %v1916_v62, %v854_v32  ;;  %v985_v32 = vadd.f32 %v984_v38, %v922_v22  ;;  %v928_v38 = vmul.f32 %v1916_v62, %v1916_v62 }
 0x198   : > { %v856_v18 = vadd.f32 %v855_v28, %v1928_v4  ;;  %v986_v28 = vadd.f32 %v985_v32, %v923_v36  ;;  %v929_v32 = vmul.f32 %v1928_v4, %v1928_v4  ;;  %v2447_v4 = vld [vmem:[#allocation21_spill] sm:$0xff] }
 0x19a   : > { %v857_v34 = vadd.f32 %v856_v18, %v1936_v8  ;;  %v987_v18 = vadd.f32 %v986_v28, %v924_v24  ;;  %v930_v28 = vmul.f32 %v1936_v8, %v1936_v8  ;;  %v2444_v8 = vld [vmem:[#allocation20_spill] sm:$0xff] }
 0x19c   : > { %v858_v43 = vadd.f32 %v1924_v2, %v857_v34  ;;  %v988_v34 = vadd.f32 %v987_v18, %v925_v41  ;;  %v931_v18 = vmul.f32 %v1924_v2, %v1924_v2  ;;  %v2445_v2 = vld [vmem:[#allocation22_spill] sm:$0xff] }
 0x19e   : > { %v859_v47 = vadd.f32 %v1932_v6, %v858_v43  ;;  %v989_v43 = vadd.f32 %v988_v34, %v926_v40  ;;  %v932_v34 = vmul.f32 %v1932_v6, %v1932_v6  ;;  %v2446_v6 = vld [vmem:[#allocation19_spill] sm:$0xff] }
 0x1a0   : > { %v860_v20 = vadd.f32 %v859_v47, %v1944_v12  ;;  %v990_v47 = vadd.f32 %v989_v43, %v927_v26  ;;  %v933_v43 = vmul.f32 %v1944_v12, %v1944_v12 }
 0x1a2   : > { %v861_v30 = vadd.f32 %v860_v20, %v1952_v16  ;;  %v991_v20 = vadd.f32 %v990_v47, %v928_v38  ;;  %v934_v47 = vmul.f32 %v1952_v16, %v1952_v16 }
 0x1a4   : > { %v862_v22 = vadd.f32 %v1940_v10, %v861_v30  ;;  %v992_v30 = vadd.f32 %v991_v20, %v929_v32  ;;  %v935_v20 = vmul.f32 %v1940_v10, %v1940_v10 }
 0x1a6   : > { %v863_v36 = vadd.f32 %v1948_v14, %v862_v22  ;;  %v993_v22 = vadd.f32 %v992_v30, %v930_v28  ;;  %v936_v30 = vmul.f32 %v1948_v14, %v1948_v14 }
 0x1a8   : > { %v864_v24 = vadd.f32 %v863_v36, %v2440_v37  ;;  %v994_v36 = vadd.f32 %v993_v22, %v931_v18  ;;  %v937_v22 = vmul.f32 %v2440_v37, %v2440_v37  ;;  %v2451_v37 = vld [vmem:[#allocation28_spill] sm:$0xff] }
 0x1aa   : > { %v865_v41 = vadd.f32 %v864_v24, %v2441_v33  ;;  %v995_v24 = vadd.f32 %v994_v36, %v932_v34  ;;  %v938_v36 = vmul.f32 %v2441_v33, %v2441_v33 }
 0x1ac   : > { %v866_v40 = vadd.f32 %v2442_v5, %v865_v41  ;;  %v996_v41 = vadd.f32 %v995_v24, %v933_v43  ;;  %v939_v24 = vmul.f32 %v2442_v5, %v2442_v5  ;;  %v943_v5 = vmul.f32 %v2446_v6, %v2446_v6 }
 0x1ae   : > { %v867_v26 = vadd.f32 %v2443_v1, %v866_v40  ;;  %v997_v40 = vadd.f32 %v996_v41, %v934_v47  ;;  %v940_v41 = vmul.f32 %v2443_v1, %v2443_v1  ;;  %v944_v1 = vmul.f32 %v2447_v4, %v2447_v4 }
 0x1b0   : > { %v868_v38 = vadd.f32 %v867_v26, %v2444_v8  ;;  %v998_v26 = vadd.f32 %v997_v40, %v935_v20  ;;  %v941_v40 = vmul.f32 %v2444_v8, %v2444_v8  ;;  %v945_v8 = vmul.f32 %v2448_v39, %v2448_v39 }
 0x1b2   : > { %v869_v32 = vadd.f32 %v868_v38, %v2445_v2  ;;  %v999_v38 = vadd.f32 %v998_v26, %v936_v30  ;;  %v942_v30 = vmul.f32 %v2445_v2, %v2445_v2  ;;  %v946_v2 = vmul.f32 %v2449_v35, %v2449_v35 }
 0x1b4   : > { %v870_v28 = vadd.f32 %v2446_v6, %v869_v32  ;;  %v1000_v32 = vadd.f32 %v999_v38, %v937_v22  ;;  %v947_v6 = vmul.f32 %v2450_v7, %v2450_v7 }
 0x1b6   : > { %v871_v18 = vadd.f32 %v2447_v4, %v870_v28  ;;  %v1001_v28 = vadd.f32 %v1000_v32, %v938_v36  ;;  %v948_v4 = vmul.f32 %v2451_v37, %v2451_v37 }
 0x1b8   : > { %v872_v34 = vadd.f32 %v871_v18, %v2448_v39  ;;  %v1002_v18 = vadd.f32 %v1001_v28, %v939_v24 }
 0x1ba   : > { %v873_v43 = vadd.f32 %v872_v34, %v2449_v35  ;;  %v1003_v26 = vadd.f32 %v1002_v18, %v940_v41  ;;  %v812_v41 = vld [vmem:[#allocation2] sm:$0x1] }
 0x1bc   : > { %v874_v47 = vadd.f32 %v2450_v7, %v873_v43  ;;  %v1004_v22 = vadd.f32 %v1003_v26, %v941_v40 }
 0x1be   : > { %v875_v20 = vadd.f32 %v2451_v37, %v874_v47  ;;  %v1005_v36 = vadd.f32 %v1004_v22, %v942_v30  ;;  %v884_v22 = vld [vmem:[#allocation3] sm:$0x1] }
 0x1c0   : > { %v876_v33 = vrot.slane %v875_v20, 4  ;;  %v1006_v24 = vadd.f32 %v1005_v36, %v943_v5 }
 0x1c2   : > { %v877_v34 = vadd.f32 %v876_v33, %v875_v20  ;;  %v1007_v47 = vadd.f32 %v1006_v24, %v944_v1 }
 0x1c4   : > { %v878_v38 = vrot.slane %v877_v34, 2  ;;  %v1008_v20 = vadd.f32 %v1007_v47, %v945_v8 }
 0x1c6   : > { %v879_v43 = vadd.f32 %v878_v38, %v877_v34  ;;  %v1009_v18 = vadd.f32 %v1008_v20, %v946_v2 }
 0x1c8   : > { %v880_v32 = vrot.slane %v879_v43, 1  ;;  %v1010_v33 = vadd.f32 %v1009_v18, %v947_v6 }
 0x1ca   : > { %v881_v28 = vadd.f32 %v880_v32, %v879_v43  ;;  %v1011_v39 = vadd.f32 %v1010_v33, %v948_v4 }
 0x1cc   : > { %v882_v40 = vadd.f32 %v881_v28, %v812_v41  ;;  %v1012_v30 = vrot.slane %v1011_v39, 4 }
 0x1ce   : > { %883 = vst [vmem:[#allocation2] sm:$0x1] %v882_v40  ;;  %v1013_v26 = vadd.f32 %v1012_v30, %v1011_v39 }
 0x1d0   : > { %v1014_v34 = vrot.slane %v1013_v26, 2 }
 0x1d2   : > { %v1015_v5 = vadd.f32 %v1014_v34, %v1013_v26 }
 0x1d4   : > { %v1016_v35 = vrot.slane %v1015_v5, 1 }
 0x1d6   : > { %v1017_v38 = vadd.f32 %v1016_v35, %v1015_v5 }
 0x1d8   : > { %v1018_v1 = vadd.f32 %v1017_v38, %v884_v22 }
 0x1da   : > { %1019 = vst [vmem:[#allocation3] sm:$0x1] %v1018_v1 }
 0x1db PF: > { %p1020_p6 = scmp.eq.s32.totalorder %s1702_s12, 1 }
 0x1dc   : > { %v1025_v7 = vld [vmem:[#allocation2] sm:$0x1] (%p1020_p6)  ;;  %v1037_v6 = vld [vmem:[%s2386_s2 + $0x1] sm:$0x1] (%p1020_p6) }
 0x1dd   : > { %1024 = sbr.rel (!%p1020_p6) target bundleno = 508 (0x1fc), region = 44  ;;  %v1026_v37 = vmul.f32 (%p1020_p6), 0.001953125, %v1025_v7  ;;  %v1032_v47 = vld [vmem:[%s2386_s2] sm:$0x1] (%p1020_p6) }
 0x1df   : > { %v1029_v8 = vmul.f32 (%p1020_p6), %v1026_v37, %v1026_v37 }
 0x1e1   : > { %v1027_v36 = vld [vmem:[#allocation3] sm:$0x1] (%p1020_p6) }
 0x1e2   : > { %v1028_v43 = vmul.f32 (%p1020_p6), 0.001953125, %v1027_v36 }
 0x1e4   : > { %v1030_v24 = vsub.f32 %v1028_v43, %v1029_v8 }
 0x1e6   : > { %v1031_v32 = vmax.f32 %v1030_v24, 0.0 }
 0x1e8   : > { %v1033_v2 = vadd.f32 1e-05, %v1031_v32 }
 0x1ea   : > { %1686 = vrsqrt.f32 %v1033_v2 }
 0x1f4   : > { %v1687_v41 = vpop.eup %1686 }
 0x1f5   : > { %v1035_v28 = vmul.f32 %v1687_v41, %v1032_v47 }
 0x1f7   : > { %1036 = vst [vmem:[#allocation4] sm:$0x1] %v1035_v28  ;;  %v1038_v20 = vmul.f32 %v1035_v28, %v1026_v37 }
 0x1f9   : > { %v1039_v40 = vsub.f32 %v1037_v6, %v1038_v20 }
 0x1fb   : > { %1040 = vst [vmem:[#allocation4 + $0x1] sm:$0x1] %v1039_v40 }
 0x1fc PF: > { %p1397_p7 = scmp.ne.s32.totalorder %s1702_s12, 1 }
 0x1fd   : > { %v2452_v18 = vld [vmem:[#allocation6_spill] sm:$0xff] (!%p1397_p7)  ;;  %v2453_v39 = vld [vmem:[#allocation7_spill] sm:$0xff] (!%p1397_p7)  ;;  %v2454_v36 = vld [vmem:[#allocation5_spill] sm:$0xff] (!%p1397_p7) }
 0x1fe   : > { %1043 = sbr.rel (%p1397_p7) target bundleno = 557 (0x22d), region = 48  ;;  %v2203_v4 = vld [vmem:[#allocation4] ss:$0 sm:$0xff] (!%p1397_p7) }
 0x1ff   : > { %v1050_v33 = vmul.f32 (!%p1397_p7), %v2203_v4, %v2452_v18  ;;  %v1051_v30 = vmul.f32 (!%p1397_p7), %v2203_v4, %v2453_v39  ;;  %v1066_v26 = vmul.f32 (!%p1397_p7), %v2203_v4, %v1942_v11  ;;  %v1067_v34 = vmul.f32 (!%p1397_p7), %v2203_v4, %v1950_v15 }
 0x200   : > { %v1098_v5 = vmul.f32 (!%p1397_p7), %v2203_v4, %v1880_v44  ;;  %v1099_v35 = vmul.f32 (!%p1397_p7), %v2203_v4, %v1888_v48  ;;  %v1130_v22 = vmul.f32 (!%p1397_p7), %v2203_v4, %v1944_v12  ;;  %v1131_v38 = vmul.f32 (!%p1397_p7), %v2203_v4, %v1952_v16 }
 0x201   : > { %v1082_v1 = vmax.f32 (!%p1397_p7), %v1050_v33, %v1066_v26  ;;  %v1083_v7 = vmax.f32 (!%p1397_p7), %v1051_v30, %v1067_v34  ;;  %v1052_v11 = vmul.f32 (!%p1397_p7), %v2454_v36, %v2203_v4  ;;  %v1053_v15 = vmul.f32 (!%p1397_p7), %v1882_v45, %v2203_v4 }
 0x202   : > { %v1068_v44 = vmul.f32 (!%p1397_p7), %v1938_v9, %v2203_v4  ;;  %v1069_v48 = vmul.f32 (!%p1397_p7), %v1946_v13, %v2203_v4  ;;  %v1100_v12 = vmul.f32 (!%p1397_p7), %v1876_v42, %v2203_v4  ;;  %v1101_v16 = vmul.f32 (!%p1397_p7), %v1884_v46, %v2203_v4  ;;  %v2237_v24 = vld [vmem:[#allocation4 + $0x1] ss:$0 sm:$0xff] (!%p1397_p7) }
 0x203   : > { %v1114_v37 = vmax.f32 (!%p1397_p7), %v1082_v1, %v1098_v5  ;;  %v1115_v43 = vmax.f32 (!%p1397_p7), %v1083_v7, %v1099_v35  ;;  %v1132_v8 = vmul.f32 (!%p1397_p7), %v1940_v10, %v2203_v4  ;;  %v1133_v45 = vmul.f32 (!%p1397_p7), %v1948_v14, %v2203_v4 }
 0x204   : > { %v1084_v9 = vmax.f32 (!%p1397_p7), %v1052_v11, %v1068_v44  ;;  %v1085_v32 = vmax.f32 (!%p1397_p7), %v1053_v15, %v1069_v48  ;;  %v1054_v13 = vmul.f32 (!%p1397_p7), %v2203_v4, %v1894_v51  ;;  %v1055_v42 = vmul.f32 (!%p1397_p7), %v2203_v4, %v1902_v55 }
 0x205   : > { %v1146_v2 = vmax.f32 %v1114_v37, %v1130_v22  ;;  %v1147_v46 = vmax.f32 %v1115_v43, %v1131_v38  ;;  %v1070_v47 = vmul.f32 %v2203_v4, %v1958_v19  ;;  %v1071_v10 = vmul.f32 %v2203_v4, %v1966_v23  ;;  %v2455_v19 = vld [vmem:[#allocation16_spill] sm:$0xff]  ;;  %v2456_v23 = vld [vmem:[#allocation18_spill] sm:$0xff] }
 0x206   : > { %v1116_v41 = vmax.f32 %v1084_v9, %v1100_v12  ;;  %v1117_v14 = vmax.f32 %v1085_v32, %v1101_v16  ;;  %v1102_v28 = vmul.f32 %v2203_v4, %v1896_v52  ;;  %v1103_v6 = vmul.f32 %v2203_v4, %v1904_v56 }
 0x207   : > { %v1166_v51 = vadd.f32 %v2237_v24, %v1146_v2  ;;  %v1167_v55 = vadd.f32 %v2237_v24, %v1147_v46  ;;  %v1086_v20 = vmax.f32 %v1054_v13, %v1070_v47  ;;  %v1087_v40 = vmax.f32 %v1055_v42, %v1071_v10 }
 0x208   : > { %v1148_v18 = vmax.f32 %v1116_v41, %v1132_v8  ;;  %v1149_v33 = vmax.f32 %v1117_v14, %v1133_v45  ;;  %v1134_v39 = vmul.f32 %v2203_v4, %v2455_v19  ;;  %v1135_v30 = vmul.f32 %v2203_v4, %v2456_v23  ;;  %v2457_v8 = vld [vmem:[#allocation15_spill] sm:$0xff]  ;;  %v2458_v45 = vld [vmem:[#allocation17_spill] sm:$0xff] }
 0x209   : > { %v1182_v26 = vmax.f32 %v1166_v51, 0.0  ;;  %v1183_v34 = vmax.f32 %v1167_v55, 0.0  ;;  %v1118_v52 = vmax.f32 %v1086_v20, %v1102_v28  ;;  %v1119_v5 = vmax.f32 %v1087_v40, %v1103_v6  ;;  %v2459_v55 = vld [vmem:[#allocation20_spill] sm:$0xff] }
 0x20a   : > { %v1168_v56 = vadd.f32 %v2237_v24, %v1148_v18  ;;  %v1169_v35 = vadd.f32 %v2237_v24, %v1149_v33  ;;  %v1056_v22 = vmul.f32 %v1890_v49, %v2203_v4  ;;  %v1057_v38 = vmul.f32 %v1898_v53, %v2203_v4 }
 0x20b   : > { %v1441_v1 = vpack.c.bf16 %v1183_v34, %v1182_v26  ;;  %v1150_v7 = vmax.f32 %v1118_v52, %v1134_v39  ;;  %v1151_v36 = vmax.f32 %v1119_v5, %v1135_v30  ;;  %v1072_v11 = vmul.f32 %v1954_v17, %v2203_v4 }
 0x20c   : > { %v1184_v15 = vmax.f32 %v1168_v56, 0.0  ;;  %v1185_v44 = vmax.f32 %v1169_v35, 0.0  ;;  %v1073_v48 = vmul.f32 %v1962_v21, %v2203_v4  ;;  %v1104_v12 = vmul.f32 %v1892_v50, %v2203_v4  ;;  %v2461_v56 = vld [vmem:[#allocation19_spill] sm:$0xff] }
 0x20d   : > { %1442 = vst [vmem:[%s2387_s3] sm:$0xff] %v1441_v1   ;;  %v1170_v49 = vadd.f32 %v2237_v24, %v1150_v7  ;;  %v1171_v53 = vadd.f32 %v2237_v24, %v1151_v36  ;;  %v1088_v16 = vmax.f32 %v1056_v22, %v1072_v11  ;;  %v1105_v17 = vmul.f32 %v1900_v54, %v2203_v4  ;;  %v2463_v36 = vld [vmem:[#allocation13_spill] sm:$0xff] }
 0x20e   : > { %v1446_v37 = vpack.c.bf16 %v1185_v44, %v1184_v15  ;;  %v1089_v43 = vmax.f32 %v1057_v38, %v1073_v48  ;;  %v1136_v21 = vmul.f32 %v2457_v8, %v2203_v4  ;;  %v1137_v50 = vmul.f32 %v2458_v45, %v2203_v4  ;;  %v2464_v15 = vld [vmem:[#allocation25_spill] sm:$0xff] }
 0x20f   : > { %v1186_v9 = vmax.f32 %v1170_v49, 0.0  ;;  %v1187_v32 = vmax.f32 %v1171_v53, 0.0  ;;  %v1120_v13 = vmax.f32 %v1088_v16, %v1104_v12  ;;  %v1058_v42 = vmul.f32 %v2203_v4, %v1910_v59  ;;  %v2465_v48 = vld [vmem:[#allocation29_spill] sm:$0xff]  ;;  %v2466_v16 = vld [vmem:[#allocation10_spill] sm:$0xff] }
 0x210   : > { %1478 = vst [vmem:[%s2387_s3 + $0x8] sm:$0xff] %v1446_v37   ;;  %v1121_v2 = vmax.f32 %v1089_v43, %v1105_v17  ;;  %v1059_v54 = vmul.f32 %v2203_v4, %v1918_v63  ;;  %v1074_v46 = vmul.f32 %v2203_v4, %v1974_v27  ;;  %v1075_v47 = vmul.f32 %v2203_v4, %v1982_v31  ;;  %v2460_v31 = vld [vmem:[#allocation22_spill] sm:$0xff] }
 0x211   : > { %v1451_v10 = vpack.c.bf16 %v1187_v32, %v1186_v9  ;;  %v1152_v41 = vmax.f32 %v1120_v13, %v1136_v21  ;;  %v1106_v14 = vmul.f32 %v2203_v4, %v1912_v60  ;;  %v1107_v59 = vmul.f32 %v2203_v4, %v1920_v0  ;;  %v2467_v21 = vld [vmem:[#allocation14_spill] sm:$0xff] }
 0x212   : > { %v1153_v28 = vmax.f32 %v1121_v2, %v1137_v50  ;;  %v1090_v6 = vmax.f32 %v1058_v42, %v1074_v46  ;;  %v1091_v51 = vmax.f32 %v1059_v54, %v1075_v47  ;;  %v1138_v63 = vmul.f32 %v2203_v4, %v2459_v55  ;;  %v2468_v32 = vld [vmem:[#allocation26_spill] sm:$0xff]  ;;  %v2473_v55 = vld [vmem:[#allocation27_spill] sm:$0xff] }
 0x213   : > { %1479 = vst [vmem:[%s2387_s3 + $0x10] sm:$0xff] %v1451_v10   ;;  %v1172_v27 = vadd.f32 %v2237_v24, %v1152_v41  ;;  %v1139_v20 = vmul.f32 %v2203_v4, %v2460_v31  ;;  %v1060_v60 = vmul.f32 %v1906_v57, %v2203_v4  ;;  %v1061_v0 = vmul.f32 %v1914_v61, %v2203_v4  ;;  %v2469_v42 = vld [vmem:[#allocation30_spill] sm:$0xff]  ;;  %v2470_v10 = vld [vmem:[#allocation8_spill] sm:$0xff] }
 0x214   : > { %v1173_v40 = vadd.f32 %v2237_v24, %v1153_v28  ;;  %v1122_v18 = vmax.f32 %v1090_v6, %v1106_v14  ;;  %v1123_v33 = vmax.f32 %v1091_v51, %v1107_v59  ;;  %v1076_v19 = vmul.f32 %v1970_v25, %v2203_v4  ;;  %v2462_v25 = vld [vmem:[#allocation21_spill] sm:$0xff]  ;;  %v2471_v59 = vld [vmem:[#allocation11_spill] sm:$0xff] }
 0x215   : > { %v1188_v39 = vmax.f32 %v1172_v27, 0.0  ;;  %v1077_v23 = vmul.f32 %v1978_v29, %v2203_v4  ;;  %v1108_v30 = vmul.f32 %v1908_v58, %v2203_v4  ;;  %v1109_v57 = vmul.f32 %v1916_v62, %v2203_v4  ;;  %v2472_v6 = vld [vmem:[#allocation23_spill] sm:$0xff] }
 0x216   : > { %v1189_v26 = vmax.f32 %v1173_v40, 0.0  ;;  %v1154_v34 = vmax.f32 %v1122_v18, %v1138_v63  ;;  %v1155_v61 = vmax.f32 %v1123_v33, %v1139_v20  ;;  %v1092_v52 = vmax.f32 %v1060_v60, %v1076_v19  ;;  %v2474_v60 = vld [vmem:[#allocation9_spill] sm:$0xff]  ;;  %v2475_v33 = vld [vmem:[#allocation12_spill] sm:$0xff] }
 0x217   : > { %v1093_v5 = vmax.f32 %v1061_v0, %v1077_v23  ;;  %v1140_v35 = vmul.f32 %v2461_v56, %v2203_v4  ;;  %v1141_v22 = vmul.f32 %v2462_v25, %v2203_v4  ;;  %v1062_v29 = vmul.f32 %v2203_v4, %v1926_v3 }
 0x218   : > { %v1456_v38 = vpack.c.bf16 %v1189_v26, %v1188_v39  ;;  %v1174_v58 = vadd.f32 %v2237_v24, %v1154_v34  ;;  %v1175_v1 = vadd.f32 %v2237_v24, %v1155_v61  ;;  %v1124_v62 = vmax.f32 %v1092_v52, %v1108_v30  ;;  %v2476_v39 = vld [vmem:[#allocation24_spill] sm:$0xff] }
 0x219   : > { %v1125_v7 = vmax.f32 %v1093_v5, %v1109_v57  ;;  %v1063_v11 = vmul.f32 %v2203_v4, %v2463_v36  ;;  %v1078_v44 = vmul.f32 %v2203_v4, %v2464_v15  ;;  %v1079_v12 = vmul.f32 %v2203_v4, %v2465_v48  ;;  %v2477_v34 = vld [vmem:[#allocation28_spill] sm:$0xff] }
 0x21a   : > { %1480 = vst [vmem:[%s2387_s3 + $0x18] sm:$0xff] %v1456_v38   ;;  %v1190_v3 = vmax.f32 %v1174_v58, 0.0  ;;  %v1191_v49 = vmax.f32 %v1175_v1, 0.0  ;;  %v1156_v53 = vmax.f32 %v1124_v62, %v1140_v35  ;;  %v1110_v17 = vmul.f32 %v2203_v4, %v2466_v16 }
 0x21b   : > { %v1157_v37 = vmax.f32 %v1125_v7, %v1141_v22  ;;  %v1094_v43 = vmax.f32 %v1062_v29, %v1078_v44  ;;  %v1095_v8 = vmax.f32 %v1063_v11, %v1079_v12  ;;  %v1111_v45 = vmul.f32 %v2203_v4, %v2467_v21 }
 0x21c   : > { %v1461_v50 = vpack.c.bf16 %v1191_v49, %v1190_v3  ;;  %v1176_v9 = vadd.f32 %v2237_v24, %v1156_v53  ;;  %v1142_v13 = vmul.f32 %v2203_v4, %v2468_v32  ;;  %v1143_v2 = vmul.f32 %v2203_v4, %v2469_v42 }
 0x21d   : > { %v1177_v54 = vadd.f32 %v2237_v24, %v1157_v37  ;;  %v1126_v46 = vmax.f32 %v1094_v43, %v1110_v17  ;;  %v1127_v47 = vmax.f32 %v1095_v8, %v1111_v45  ;;  %v1064_v41 = vmul.f32 %v2470_v10, %v2203_v4 }
 0x21e   : > { %1481 = vst [vmem:[%s2387_s3 + $0x20] sm:$0xff] %v1461_v50   ;;  %v1192_v14 = vmax.f32 %v1176_v9, 0.0  ;;  %v1065_v28 = vmul.f32 %v2471_v59, %v2203_v4  ;;  %v1080_v51 = vmul.f32 %v2472_v6, %v2203_v4  ;;  %v1081_v63 = vmul.f32 %v2473_v55, %v2203_v4 }
 0x21f   : > { %v1193_v27 = vmax.f32 %v1177_v54, 0.0  ;;  %v1158_v31 = vmax.f32 %v1126_v46, %v1142_v13  ;;  %v1159_v20 = vmax.f32 %v1127_v47, %v1143_v2  ;;  %v1112_v0 = vmul.f32 %v2474_v60, %v2203_v4 }
 0x220   : > { %v1096_v40 = vmax.f32 %v1064_v41, %v1080_v51  ;;  %v1097_v18 = vmax.f32 %v1065_v28, %v1081_v63  ;;  %v1113_v19 = vmul.f32 %v2475_v33, %v2203_v4  ;;  %v1144_v23 = vmul.f32 %v2476_v39, %v2203_v4 }
 0x221   : > { %v1466_v30 = vpack.c.bf16 %v1193_v27, %v1192_v14  ;;  %v1178_v57 = vadd.f32 %v2237_v24, %v1158_v31  ;;  %v1179_v26 = vadd.f32 %v2237_v24, %v1159_v20  ;;  %v1145_v61 = vmul.f32 %v2477_v34, %v2203_v4 }
 0x222   : > { %v1128_v52 = vmax.f32 %v1096_v40, %v1112_v0  ;;  %v1129_v5 = vmax.f32 %v1097_v18, %v1113_v19 }
 0x223   : > { %1482 = vst [vmem:[%s2387_s3 + $0x28] sm:$0xff] %v1466_v30   ;;  %v1194_v56 = vmax.f32 %v1178_v57, 0.0  ;;  %v1195_v35 = vmax.f32 %v1179_v26, 0.0 }
 0x224   : > { %v1160_v25 = vmax.f32 %v1128_v52, %v1144_v23  ;;  %v1161_v22 = vmax.f32 %v1129_v5, %v1145_v61 }
 0x225   : > { %v1471_v29 = vpack.c.bf16 %v1195_v35, %v1194_v56 }
 0x226   : > { %v1180_v38 = vadd.f32 %v2237_v24, %v1160_v25  ;;  %v1181_v58 = vadd.f32 %v2237_v24, %v1161_v22 }
 0x227   : > { %1483 = vst [vmem:[%s2387_s3 + $0x30] sm:$0xff] %v1471_v29  }
 0x228   : > { %v1196_v4 = vmax.f32 %v1180_v38, 0.0  ;;  %v1197_v1 = vmax.f32 %v1181_v58, 0.0 }
 0x22a   : > { %v1476_v62 = vpack.c.bf16 %v1197_v1, %v1196_v4 }
 0x22c   : > { %1484 = vst [vmem:[%s2387_s3 + $0x38] sm:$0xff] %v1476_v62  }
 0x22d PF: > { %s13_s14 = sadd.s32 1, %s1710_s14   ;;  %s2478_s12 = smov %s1706_s13 }
 0x22e   : > { %p10_p8 = scmp.ge.s32.totalorder %s13_s14, 4   ;;  %s2479_s13 = smov %s2481_s15 }
 0x230   :  { %12 = sbr.rel (!%p10_p8) target bundleno = 2 (0x2), region = 78 }

// kernel: cnn_encoder_forward.5
= control target key start
LH: loop header
LB: loop body
LE: loop exit
PB: predicated region body
PF: predicated region fallthrough
CT: control target
= control target key end

     0   :  { %s1301_s12 = smov 0   ;;  %s1303_s13 = smov 0   ;;  %s1586_s0 = inlined_call_operand.vmem [shape: bf16[4,32,384], index: 0, kind: input, shape index: {}]   ;;  %s1587_s1 = inlined_call_operand.vmem [shape: bf16[384,128], index: 1, kind: input, shape index: {}]   ;;  %s1588_s2 = inlined_call_operand.vmem [shape: f32[2,128], index: 2, kind: input, shape index: {}]   ;;  %s1589_s3 = inlined_call_operand.vmem [shape: bf16[32,128], index: 3, kind: output, shape index: {}]  }
   0x1   :  { %s1305_s14 = smov 0  }
   0x2 LB: > { %s25_s15 = sadd.s32 1, %s1274_s13  ;;  %p981_p0 = scmp.ge.s32.totalorder %s1278_s14, 1  ;;  %s1278_s14 = sphi %s1305_s14, %s13_s14   ;;  %s1274_s13 = sphi %s1303_s13, %s1591_s13   ;;  %s1270_s12 = sphi %s1301_s12, %s1590_s12  }
   0x3   : > { %p27_p1 = scmp.ge.s32.totalorder %s25_s15, 2  ;;  %p153_p2 = scmp.lt.s32.totalorder %s1278_s14, 3 }
   0x5   : > { %s1593_s15 = smov (%p27_p1, %s25_s15), 0  ;;  %p154_p3 = pnand %p981_p0, %p153_p2 }
   0x6   : > { %p195_p4 = scmp.eq.s32.totalorder (!%p154_p3), %s1270_s12, 0 }
   0x7   : > { %157 = sbr.rel (%p154_p3) target bundleno = 416 (0x1a0), region = 32 }
   0xe   : > { %200 = sbr.rel (!%p195_p4) target bundleno = 21 (0x15), region = 36  ;;  %v1280_v0 = vmov (%p195_p4), 0.0  }
   0xf   : > { %201 = vst [vmem:[#allocation2] sm:$0x1] (%p195_p4), %v1280_v0  ;;  %202 = vst [vmem:[#allocation3] sm:$0x1] (%p195_p4), %v1280_v0 }
  0x15 PF: > { %v1198_v1 = vld [vmem:[%s1587_s1 + $0x40] sm:$0xff]   ;;  %v1201_v4 = vld [vmem:[%s1587_s1 + $0x48] sm:$0xff]   ;;  %v1204_v7 = vld [vmem:[%s1587_s1 + $0x50] sm:$0xff]   ;;  %p1031_p5 = scmp.ne.s32.totalorder %s1270_s12, 0 }
  0x16   : > { %v1199_v2 = vld [vmem:[%s1587_s1] sm:$0xff]   ;;  %1061 = vmatprep.subr.bf16.mxu0 %v1198_v1  ;;  %v1202_v5 = vld [vmem:[%s1587_s1 + $0x8] sm:$0xff]   ;;  %v1205_v8 = vld [vmem:[%s1587_s1 + $0x10] sm:$0xff]  }
  0x17   : > { %v1200_v3 = vld [vmem:[%s1587_s1 + $0x80] sm:$0xff]   ;;  %1062 = vmatpush3.bf16.msra.mxu0 %v1199_v2  ;;  %v1203_v6 = vld [vmem:[%s1587_s1 + $0x88] sm:$0xff]   ;;  %v1206_v9 = vld [vmem:[%s1587_s1 + $0x90] sm:$0xff]  }
  0x18   : > { %1141 = vmatprep.subr.bf16.mxu1 %v1200_v3  ;;  %1063 = vmatprep.subr.bf16.mxu0 %v1201_v4  ;;  %v1207_v10 = vld [vmem:[%s1587_s1 + $0x58] sm:$0xff]   ;;  %v1210_v13 = vld [vmem:[%s1587_s1 + $0x60] sm:$0xff]   ;;  %v1213_v16 = vld [vmem:[%s1587_s1 + $0x68] sm:$0xff]  }
  0x19   : > { %1142 = vmatpush3.bf16.msra.mxu1 %v1200_v3  ;;  %v1208_v11 = vld [vmem:[%s1587_s1 + $0x18] sm:$0xff]   ;;  %v1212_v14 = vld [vmem:[%s1587_s1 + $0xa0] sm:$0xff]   ;;  %v1215_v17 = vld [vmem:[%s1587_s1 + $0xa8] sm:$0xff]  }
  0x1a   : > { %1143 = vmatprep.subr.bf16.mxu1 %v1203_v6  ;;  %v1209_v12 = vld [vmem:[%s1587_s1 + $0x98] sm:$0xff]   ;;  %v1211_v15 = vld [vmem:[%s1587_s1 + $0x20] sm:$0xff]   ;;  %v1214_v18 = vld [vmem:[%s1587_s1 + $0x28] sm:$0xff]  }
  0x1b   : > { %1064 = vmatpush3.bf16.msra.mxu0 %v1202_v5  ;;  %v1216_v19 = vld [vmem:[%s1587_s1 + $0x70] sm:$0xff]   ;;  %v1219_v22 = vld [vmem:[%s1587_s1 + $0x78] sm:$0xff]   ;;  %v1222_v27 = vld [vmem:[%s1586_s0] ss:$12 sps:$4 sm:$0xff]  }
  0x1c   : > { %1065 = vmatprep.subr.bf16.mxu0 %v1204_v7  ;;  %v1217_v20 = vld [vmem:[%s1587_s1 + $0x30] sm:$0xff]   ;;  %v1221_v23 = vld [vmem:[%s1587_s1 + $0xb8] sm:$0xff]   ;;  %v1226_v29 = vld [vmem:[%s1586_s0 + $0x20] ss:$12 sps:$4 sm:$0xff]  }
  0x1d   : > { %1144 = vmatpush3.bf16.msra.mxu1 %v1203_v6  ;;  %v1218_v21 = vld [vmem:[%s1587_s1 + $0xb0] sm:$0xff]   ;;  %v1220_v26 = vld [vmem:[%s1587_s1 + $0x38] sm:$0xff]   ;;  %v1242_v37 = vld [vmem:[%s1586_s0 + $0x80] ss:$12 sps:$4 sm:$0xff]  }
  0x1e   : > { %1145 = vmatprep.subr.bf16.mxu1 %v1206_v9  ;;  %v1224_v24 = vld [vmem:[%s1586_s0 + $0x4] ss:$12 sps:$4 sm:$0xff]   ;;  %v1225_v25 = vld [vmem:[%s1586_s0 + $0x8] ss:$12 sps:$4 sm:$0xff]   ;;  %v1235_v36 = vld [vmem:[%s1586_s0 + $0x4c] ss:$12 sps:$4 sm:$0xff]  }
  0x1f   : > { %1066 = vmatpush3.bf16.msra.mxu0 %v1205_v8  ;;  %587 = vmatprep.mubr.bf16.mxu0 %v1224_v24  ;;  %v1227_v28 = vld [vmem:[%s1586_s0 + $0x1c] ss:$12 sps:$4 sm:$0xff]   ;;  %v1233_v30 = vld [vmem:[%s1586_s0 + $0x38] ss:$12 sps:$4 sm:$0xff]   ;;  %v1230_v32 = vld [vmem:[%s1586_s0 + $0x34] ss:$12 sps:$4 sm:$0xff]  }
  0x20   : > { %1067 = vmatprep.subr.bf16.mxu0 %v1207_v10  ;;  %1157 = vmatprep.mubr.bf16.mxu1 %v1225_v25  ;;  %v1229_v31 = vld [vmem:[%s1586_s0 + $0x18] ss:$12 sps:$4 sm:$0xff]   ;;  %v1234_v33 = vld [vmem:[%s1586_s0 + $0x50] ss:$12 sps:$4 sm:$0xff]   ;;  %v1241_v34 = vld [vmem:[%s1586_s0 + $0x68] ss:$12 sps:$4 sm:$0xff]  }
  0x21   : > { %1146 = vmatpush3.bf16.msra.mxu1 %v1206_v9  ;;  %v1232_v35 = vld [vmem:[%s1586_s0 + $0x30] ss:$12 sps:$4 sm:$0xff]   ;;  %v1249_v38 = vld [vmem:[%s1586_s0 + $0x98] ss:$12 sps:$4 sm:$0xff]   ;;  %v1237_v39 = vld [vmem:[%s1586_s0 + $0x48] ss:$12 sps:$4 sm:$0xff]  }
  0x22   : > { %1147 = vmatprep.subr.bf16.mxu1 %v1209_v12  ;;  %v1238_v40 = vld [vmem:[%s1586_s0 + $0x64] ss:$12 sps:$4 sm:$0xff]   ;;  %v1240_v42 = vld [vmem:[%s1586_s0 + $0x60] ss:$12 sps:$4 sm:$0xff]   ;;  %v1243_v43 = vld [vmem:[%s1586_s0 + $0x7c] ss:$12 sps:$4 sm:$0xff]  }
  0x23   : > { %1068 = vmatpush3.bf16.msra.mxu0 %v1208_v11  ;;  %v1250_v41 = vld [vmem:[%s1586_s0 + $0xb0] ss:$12 sps:$4 sm:$0xff]   ;;  %v1245_v44 = vld [vmem:[%s1586_s0 + $0x78] ss:$12 sps:$4 sm:$0xff]   ;;  %v1246_v45 = vld [vmem:[%s1586_s0 + $0x94] ss:$12 sps:$4 sm:$0xff]  }
  0x24   : > { %1069 = vmatprep.subr.bf16.mxu0 %v1210_v13  ;;  %v1248_v46 = vld [vmem:[%s1586_s0 + $0x90] ss:$12 sps:$4 sm:$0xff]   ;;  %v1251_v47 = vld [vmem:[%s1586_s0 + $0xac] ss:$12 sps:$4 sm:$0xff]   ;;  %v1253_v48 = vld [vmem:[%s1586_s0 + $0xa8] ss:$12 sps:$4 sm:$0xff]  }
  0x25   : > { %1148 = vmatpush3.bf16.msra.mxu1 %v1209_v12 }
  0x26   : > { %1149 = vmatprep.subr.bf16.mxu1 %v1212_v14 }
  0x27   : > { %1070 = vmatpush3.bf16.msra.mxu0 %v1211_v15 }
  0x28   : > { %1071 = vmatprep.subr.bf16.mxu0 %v1213_v16 }
  0x29   : > { %1150 = vmatpush3.bf16.msra.mxu1 %v1212_v14 }
  0x2a   : > { %1151 = vmatprep.subr.bf16.mxu1 %v1215_v17 }
  0x2b   : > { %1072 = vmatpush3.bf16.msra.mxu0 %v1214_v18 }
  0x2c   : > { %1073 = vmatprep.subr.bf16.mxu0 %v1216_v19 }
  0x2d   : > { %1152 = vmatpush3.bf16.msra.mxu1 %v1215_v17 }
  0x2e   : > { %1153 = vmatprep.subr.bf16.mxu1 %v1218_v21 }
  0x2f   : > { %1074 = vmatpush3.bf16.msra.mxu0 %v1217_v20 }
  0x30   : > { %1075 = vmatprep.subr.bf16.mxu0 %v1219_v22 }
  0x31   : > { %1154 = vmatpush3.bf16.msra.mxu1 %v1218_v21 }
  0x32   : > { %1155 = vmatprep.subr.bf16.mxu1 %v1221_v23 }
  0x33   : > { %1076 = vmatpush3.bf16.msra.mxu0 %v1220_v26 }
  0x35   : > { %1156 = vmatpush3.bf16.msra.mxu1 %v1221_v23 }
  0x36   : > { %588 = vmatmul.mubr.bf16.vlgmr.msra.gmra.mrb[0].mxu0 %v1222_v27 }
  0x37   : > { %595 = vmatprep.mubr.bf16.mxu0 %v1227_v28 }
  0x38   : > { %1158 = vmatmul.mubr.bf16.vlgmr.msra.gmra.mrb[0].mxu1 %v1226_v29 }
  0x39   : > { %1161 = vmatprep.mubr.bf16.mxu1 %v1233_v30 }
  0x3e   : > { %596 = vmatmul.mubr.bf16.gmra.mrb[4].mxu0 %v1229_v31 }
  0x3f   : > { %603 = vmatprep.mubr.bf16.mxu0 %v1230_v32 }
  0x40   : > { %1162 = vmatmul.mubr.bf16.gmra.mrb[4].mxu1 %v1234_v33 }
  0x41   : > { %1165 = vmatprep.mubr.bf16.mxu1 %v1241_v34 }
  0x46   : > { %604 = vmatmul.mubr.bf16.gmra.mrb[8].mxu0 %v1232_v35 }
  0x47   : > { %611 = vmatprep.mubr.bf16.mxu0 %v1235_v36 }
  0x48   : > { %1166 = vmatmul.mubr.bf16.gmra.mrb[8].mxu1 %v1242_v37 }
  0x49   : > { %1169 = vmatprep.mubr.bf16.mxu1 %v1249_v38 }
  0x4e   : > { %612 = vmatmul.mubr.bf16.gmra.mrb[12].mxu0 %v1237_v39 }
  0x4f   : > { %619 = vmatprep.mubr.bf16.mxu0 %v1238_v40 }
  0x50   : > { %1170 = vmatmul.mubr.bf16.gmra.mrb[12].mxu1 %v1250_v41 }
  0x56   : > { %620 = vmatmul.mubr.bf16.gmra.mrb[16].mxu0 %v1240_v42 }
  0x57   : > { %627 = vmatprep.mubr.bf16.mxu0 %v1243_v43 }
  0x5e   : > { %628 = vmatmul.mubr.bf16.gmra.mrb[20].mxu0 %v1245_v44 }
  0x5f   : > { %635 = vmatprep.mubr.bf16.mxu0 %v1246_v45 }
  0x66   : > { %636 = vmatmul.mubr.bf16.gmra.mrb[24].mxu0 %v1248_v46 }
  0x67   : > { %643 = vmatprep.mubr.bf16.mxu0 %v1251_v47 }
  0x6e   : > { %644 = vmatmul.mubr.bf16.gmra.mrb[28].mxu0 %v1253_v48 }
 0x109   : > { %v1077_v49 = vpop.f32.mrb[0].mxu0 }
 0x10a   : > { %v1078_v50 = vpop.f32.mrb[1].mxu0 }
 0x10b   : > { %v1079_v51 = vadd.f32 %v1078_v50, %v1077_v49  ;;  %v1080_v52 = vpop.f32.mrb[2].mxu0  ;;  %v1159_v53 = vpop.f32.mrb[0].mxu1 }
 0x10c   : > { %v1081_v54 = vpop.f32.mrb[3].mxu0  ;;  %v686_v55 = vpop.f32.mrb[1].mxu1 }
 0x10d   : > { %v1082_v56 = vadd.f32 %v1081_v54, %v1080_v52  ;;  %v1466_v57 = vadd.f32 %v1079_v51, %v686_v55  ;;  %v1160_v58 = vpop.f32.mrb[2].mxu1 }
 0x10e   : > { %v689_v59 = vpop.f32.mrb[3].mxu1 }
 0x10f   : > { %v1468_v60 = vadd.f32 %v1082_v56, %v689_v59 }
 0x111   : > { %v1083_v61 = vpop.f32.mrb[4].mxu0 }
 0x112   : > { %v1084_v62 = vpop.f32.mrb[5].mxu0 }
 0x113   : > { %v1085_v63 = vadd.f32 %v1084_v62, %v1083_v61  ;;  %v1086_v0 = vpop.f32.mrb[6].mxu0  ;;  %v1163_v1 = vpop.f32.mrb[4].mxu1 }
 0x114   : > { %v1087_v2 = vpop.f32.mrb[7].mxu0  ;;  %v702_v3 = vpop.f32.mrb[5].mxu1 }
 0x115   : > { %v1470_v4 = vadd.f32 %v1159_v53, %v1085_v63  ;;  %v1088_v5 = vadd.f32 %v1087_v2, %v1086_v0  ;;  %v1164_v6 = vpop.f32.mrb[6].mxu1 }
 0x116   : > { %v705_v7 = vpop.f32.mrb[7].mxu1 }
 0x117   : > { %v1472_v8 = vadd.f32 %v1160_v58, %v1088_v5  ;;  %v777_v5 = vmul.f32 (!%p1031_p5), %v1466_v57, %v1466_v57 }
 0x119   : > { %v1089_v9 = vpop.f32.mrb[8].mxu0 }
 0x11a   : > { %v1090_v10 = vpop.f32.mrb[9].mxu0 }
 0x11b   : > { %v1091_v11 = vadd.f32 %v1090_v10, %v1089_v9  ;;  %v1092_v12 = vpop.f32.mrb[10].mxu0  ;;  %v1167_v13 = vpop.f32.mrb[8].mxu1  ;;  %v779_v9 = vmul.f32 (!%p1031_p5), %v1470_v4, %v1470_v4 }
 0x11c   : > { %v1093_v14 = vpop.f32.mrb[11].mxu0  ;;  %v718_v15 = vpop.f32.mrb[9].mxu1 }
 0x11d   : > { %v1094_v16 = vadd.f32 %v1093_v14, %v1092_v12  ;;  %v1474_v17 = vadd.f32 %v1091_v11, %v702_v3  ;;  %v1168_v18 = vpop.f32.mrb[10].mxu1  ;;  %v753_v3 = vadd.f32 (!%p1031_p5), %v1468_v60, %v1466_v57  ;;  %v780_v11 = vmul.f32 (!%p1031_p5), %v1472_v8, %v1472_v8 }
 0x11e   : > { %v721_v19 = vpop.f32.mrb[11].mxu1 }
 0x11f   : > { %v1476_v20 = vadd.f32 %v1094_v16, %v705_v7  ;;  %v754_v7 = vadd.f32 (!%p1031_p5), %v753_v3, %v1470_v4  ;;  %v781_v14 = vmul.f32 (!%p1031_p5), %v1474_v17, %v1474_v17 }
 0x121   : > { %v1095_v21 = vpop.f32.mrb[12].mxu0  ;;  %v755_v10 = vadd.f32 (!%p1031_p5), %v754_v7, %v1472_v8 }
 0x122   : > { %v1096_v22 = vpop.f32.mrb[13].mxu0 }
 0x123   : > { %v1097_v23 = vadd.f32 %v1096_v22, %v1095_v21  ;;  %v1098_v24 = vpop.f32.mrb[14].mxu0  ;;  %v1171_v25 = vpop.f32.mrb[12].mxu1 }
 0x124   : > { %v1099_v26 = vpop.f32.mrb[15].mxu0  ;;  %v734_v27 = vpop.f32.mrb[13].mxu1 }
 0x125   : > { %v1478_v28 = vadd.f32 %v1163_v1, %v1097_v23  ;;  %v1100_v29 = vadd.f32 %v1099_v26, %v1098_v24  ;;  %v1172_v30 = vpop.f32.mrb[14].mxu1 }
 0x126   : > { %v737_v31 = vpop.f32.mrb[15].mxu1 }
 0x127   : > { %v1480_v32 = vadd.f32 %v1164_v6, %v1100_v29  ;;  %v778_v6 = vmul.f32 (!%p1031_p5), %v1468_v60, %v1468_v60  ;;  %v783_v22 = vmul.f32 (!%p1031_p5), %v1478_v28, %v1478_v28 }
 0x129   : > { %v1101_v33 = vpop.f32.mrb[16].mxu0  ;;  %v793_v12 = vadd.f32 (!%p1031_p5), %v778_v6, %v777_v5 }
 0x12a   : > { %v1102_v34 = vpop.f32.mrb[17].mxu0 }
 0x12b   : > { %v1103_v35 = vadd.f32 %v1102_v34, %v1101_v33  ;;  %v1104_v36 = vpop.f32.mrb[18].mxu0 }
 0x12c   : > { %v1105_v37 = vpop.f32.mrb[19].mxu0 }
 0x12d   : > { %v1106_v38 = vadd.f32 %v1105_v37, %v1104_v36  ;;  %v1482_v39 = vadd.f32 %v1103_v35, %v718_v15  ;;  %v794_v15 = vadd.f32 (!%p1031_p5), %v793_v12, %v779_v9 }
 0x12f   : > { %v1484_v40 = vadd.f32 %v1106_v38, %v721_v19  ;;  %v795_v19 = vadd.f32 (!%p1031_p5), %v794_v15, %v780_v11  ;;  %v785_v29 = vmul.f32 (!%p1031_p5), %v1482_v39, %v1482_v39  ;;  %v752_v11 = vld [vmem:[#allocation2] sm:$0x1] (!%p1031_p5) }
 0x131   : > { %v1107_v41 = vpop.f32.mrb[20].mxu0  ;;  %v796_v23 = vadd.f32 (!%p1031_p5), %v795_v19, %v781_v14  ;;  %v786_v33 = vmul.f32 (!%p1031_p5), %v1484_v40, %v1484_v40 }
 0x132   : > { %v1108_v42 = vpop.f32.mrb[21].mxu0 }
 0x133   : > { %v1109_v43 = vadd.f32 %v1108_v42, %v1107_v41  ;;  %v1110_v44 = vpop.f32.mrb[22].mxu0 }
 0x134   : > { %v1111_v45 = vpop.f32.mrb[23].mxu0 }
 0x135   : > { %v1486_v46 = vadd.f32 %v1167_v13, %v1109_v43  ;;  %v1112_v47 = vadd.f32 %v1111_v45, %v1110_v44  ;;  %v756_v13 = vadd.f32 (!%p1031_p5), %v755_v10, %v1474_v17 }
 0x137   : > { %v1488_v48 = vadd.f32 %v1168_v18, %v1112_v47  ;;  %v757_v16 = vadd.f32 (!%p1031_p5), %v756_v13, %v1476_v20  ;;  %v782_v18 = vmul.f32 (!%p1031_p5), %v1476_v20, %v1476_v20  ;;  %v787_v36 = vmul.f32 (!%p1031_p5), %v1486_v46, %v1486_v46 }
 0x139   : > { %v1113_v49 = vpop.f32.mrb[24].mxu0  ;;  %v758_v21 = vadd.f32 (!%p1031_p5), %v757_v16, %v1478_v28  ;;  %v797_v26 = vadd.f32 (!%p1031_p5), %v796_v23, %v782_v18  ;;  %v788_v41 = vmul.f32 (!%p1031_p5), %v1488_v48, %v1488_v48  ;;  %v776_v16 = vld [vmem:[#allocation3] sm:$0x1] (!%p1031_p5) }
 0x13a   : > { %v1114_v50 = vpop.f32.mrb[25].mxu0 }
 0x13b   : > { %v1115_v51 = vadd.f32 %v1114_v50, %v1113_v49  ;;  %v1116_v52 = vpop.f32.mrb[26].mxu0  ;;  %v759_v24 = vadd.f32 (!%p1031_p5), %v758_v21, %v1480_v32 }
 0x13c   : > { %v1117_v53 = vpop.f32.mrb[27].mxu0 }
 0x13d   : > { %v1118_v54 = vadd.f32 %v1117_v53, %v1116_v52  ;;  %v1490_v55 = vadd.f32 %v1115_v51, %v734_v27  ;;  %v760_v27 = vadd.f32 (!%p1031_p5), %v759_v24, %v1482_v39 }
 0x13f   : > { %v1492_v56 = vadd.f32 %v1118_v54, %v737_v31  ;;  %v761_v31 = vadd.f32 (!%p1031_p5), %v760_v27, %v1484_v40  ;;  %v789_v44 = vmul.f32 (!%p1031_p5), %v1490_v55, %v1490_v55 }
 0x141   : > { %v1119_v58 = vpop.f32.mrb[28].mxu0  ;;  %751 = sbr.rel (%p1031_p5) target bundleno = 362 (0x16a), region = 40  ;;  %v762_v35 = vadd.f32 (!%p1031_p5), %v761_v31, %v1486_v46  ;;  %v790_v49 = vmul.f32 (!%p1031_p5), %v1492_v56, %v1492_v56 }
 0x142   : > { %v1120_v59 = vpop.f32.mrb[29].mxu0 }
 0x143   : > { %v1121_v61 = vadd.f32 %v1120_v59, %v1119_v58  ;;  %v1122_v62 = vpop.f32.mrb[30].mxu0  ;;  %v763_v38 = vadd.f32 (!%p1031_p5), %v762_v35, %v1488_v48 }
 0x144   : > { %v1123_v63 = vpop.f32.mrb[31].mxu0 }
 0x145   : > { %v1494_v0 = vadd.f32 %v1171_v25, %v1121_v61  ;;  %v1124_v1 = vadd.f32 %v1123_v63, %v1122_v62  ;;  %v784_v25 = vmul.f32 (!%p1031_p5), %v1480_v32, %v1480_v32  ;;  %v764_v43 = vadd.f32 (!%p1031_p5), %v763_v38, %v1490_v55 }
 0x147   : > { %v1496_v2 = vadd.f32 %v1172_v30, %v1124_v1  ;;  %v798_v30 = vadd.f32 (!%p1031_p5), %v797_v26, %v783_v22  ;;  %v765_v47 = vadd.f32 (!%p1031_p5), %v764_v43, %v1492_v56  ;;  %v791_v52 = vmul.f32 (!%p1031_p5), %v1494_v0, %v1494_v0 }
 0x149   : > { %v799_v34 = vadd.f32 %v798_v30, %v784_v25  ;;  %v766_v51 = vadd.f32 %v765_v47, %v1494_v0  ;;  %v792_v58 = vmul.f32 %v1496_v2, %v1496_v2 }
 0x14b   : > { %v800_v37 = vadd.f32 %v799_v34, %v785_v29  ;;  %v767_v54 = vadd.f32 %v766_v51, %v1496_v2 }
 0x14d   : > { %v801_v42 = vadd.f32 %v800_v37, %v786_v33  ;;  %v768_v61 = vrot.slane %v767_v54, 4 }
 0x14f   : > { %v802_v45 = vadd.f32 %v801_v42, %v787_v36  ;;  %v769_v63 = vadd.f32 %v768_v61, %v767_v54 }
 0x151   : > { %v803_v50 = vadd.f32 %v802_v45, %v788_v41  ;;  %v770_v3 = vrot.slane %v769_v63, 2 }
 0x153   : > { %v804_v53 = vadd.f32 %v803_v50, %v789_v44  ;;  %v771_v6 = vadd.f32 %v770_v3, %v769_v63 }
 0x155   : > { %v805_v59 = vadd.f32 %v804_v53, %v790_v49  ;;  %v772_v9 = vrot.slane %v771_v6, 1 }
 0x157   : > { %v806_v62 = vadd.f32 %v805_v59, %v791_v52  ;;  %v773_v12 = vadd.f32 %v772_v9, %v771_v6 }
 0x159   : > { %v807_v1 = vadd.f32 %v806_v62, %v792_v58  ;;  %v774_v14 = vadd.f32 %v773_v12, %v752_v11 }
 0x15b   : > { %v808_v5 = vrot.slane %v807_v1, 4  ;;  %775 = vst [vmem:[#allocation2] sm:$0x1] %v774_v14 }
 0x15d   : > { %v809_v7 = vadd.f32 %v808_v5, %v807_v1 }
 0x15f   : > { %v810_v10 = vrot.slane %v809_v7, 2 }
 0x161   : > { %v811_v13 = vadd.f32 %v810_v10, %v809_v7 }
 0x163   : > { %v812_v15 = vrot.slane %v811_v13, 1 }
 0x165   : > { %v813_v18 = vadd.f32 %v812_v15, %v811_v13 }
 0x167   : > { %v814_v19 = vadd.f32 %v813_v18, %v776_v16 }
 0x169   : > { %815 = vst [vmem:[#allocation3] sm:$0x1] %v814_v19 }
 0x16a PF: > { %p816_p6 = scmp.eq.s32.totalorder %s1270_s12, 1 }
 0x16b   : > { %v821_v21 = vld [vmem:[#allocation2] sm:$0x1] (%p816_p6)  ;;  %v833_v34 = vld [vmem:[%s1588_s2 + $0x1] sm:$0x1] (%p816_p6) }
 0x16c   : > { %820 = sbr.rel (!%p816_p6) target bundleno = 395 (0x18b), region = 44  ;;  %v822_v23 = vmul.f32 (%p816_p6), 0.0078125, %v821_v21  ;;  %v828_v30 = vld [vmem:[%s1588_s2] sm:$0x1] (%p816_p6) }
 0x16e   : > { %v825_v25 = vmul.f32 (%p816_p6), %v822_v23, %v822_v23 }
 0x170   : > { %v823_v22 = vld [vmem:[#allocation3] sm:$0x1] (%p816_p6) }
 0x171   : > { %v824_v24 = vmul.f32 (%p816_p6), 0.0078125, %v823_v22 }
 0x173   : > { %v826_v26 = vsub.f32 %v824_v24, %v825_v25 }
 0x175   : > { %v827_v27 = vmax.f32 %v826_v26, 0.0 }
 0x177   : > { %v829_v29 = vadd.f32 1e-05, %v827_v27 }
 0x179   : > { %1254 = vrsqrt.f32 %v829_v29 }
 0x183   : > { %v1255_v31 = vpop.eup %1254 }
 0x184   : > { %v831_v33 = vmul.f32 %v1255_v31, %v828_v30 }
 0x186   : > { %832 = vst [vmem:[#allocation4] sm:$0x1] %v831_v33  ;;  %v834_v35 = vmul.f32 %v831_v33, %v822_v23 }
 0x188   : > { %v835_v36 = vsub.f32 %v833_v34, %v834_v35 }
 0x18a   : > { %836 = vst [vmem:[#allocation4 + $0x1] sm:$0x1] %v835_v36 }
 0x18b PF: > { %p1033_p7 = scmp.ne.s32.totalorder %s1270_s12, 1 }
 0x18d   : > { %839 = sbr.rel (%p1033_p7) target bundleno = 416 (0x1a0), region = 48  ;;  %v1034_v37 = vld [vmem:[#allocation4] ss:$0 sm:$0xff] (!%p1033_p7) }
 0x18e   : > { %v846_v38 = vmul.f32 (!%p1033_p7), %v1034_v37, %v1466_v57  ;;  %v847_v41 = vmul.f32 (!%p1033_p7), %v1034_v37, %v1468_v60  ;;  %v850_v42 = vmul.f32 (!%p1033_p7), %v1034_v37, %v1474_v17  ;;  %v851_v43 = vmul.f32 (!%p1033_p7), %v1034_v37, %v1476_v20 }
 0x18f   : > { %v858_v44 = vmul.f32 (!%p1033_p7), %v1034_v37, %v1482_v39  ;;  %v859_v45 = vmul.f32 (!%p1033_p7), %v1034_v37, %v1484_v40  ;;  %v866_v47 = vmul.f32 (!%p1033_p7), %v1034_v37, %v1490_v55  ;;  %v867_v49 = vmul.f32 (!%p1033_p7), %v1034_v37, %v1492_v56 }
 0x190   : > { %v854_v50 = vmax.f32 (!%p1033_p7), %v846_v38, %v850_v42  ;;  %v855_v51 = vmax.f32 (!%p1033_p7), %v847_v41, %v851_v43  ;;  %v848_v52 = vmul.f32 (!%p1033_p7), %v1034_v37, %v1470_v4  ;;  %v849_v57 = vmul.f32 (!%p1033_p7), %v1034_v37, %v1472_v8 }
 0x191   : > { %v852_v60 = vmul.f32 (!%p1033_p7), %v1034_v37, %v1478_v28  ;;  %v853_v17 = vmul.f32 (!%p1033_p7), %v1034_v37, %v1480_v32  ;;  %v860_v20 = vmul.f32 (!%p1033_p7), %v1034_v37, %v1486_v46  ;;  %v861_v39 = vmul.f32 (!%p1033_p7), %v1034_v37, %v1488_v48  ;;  %v1035_v54 = vld [vmem:[#allocation4 + $0x1] ss:$0 sm:$0xff] (!%p1033_p7) }
 0x192   : > { %v862_v53 = vmax.f32 (!%p1033_p7), %v854_v50, %v858_v44  ;;  %v863_v40 = vmax.f32 (!%p1033_p7), %v855_v51, %v859_v45  ;;  %v868_v56 = vmul.f32 (!%p1033_p7), %v1034_v37, %v1494_v0  ;;  %v869_v59 = vmul.f32 (!%p1033_p7), %v1034_v37, %v1496_v2 }
 0x193   : > { %v856_v55 = vmax.f32 (!%p1033_p7), %v848_v52, %v852_v60  ;;  %v857_v58 = vmax.f32 (!%p1033_p7), %v849_v57, %v853_v17 }
 0x194   : > { %v870_v4 = vmax.f32 %v862_v53, %v866_v47  ;;  %v871_v61 = vmax.f32 %v863_v40, %v867_v49 }
 0x195   : > { %v864_v8 = vmax.f32 %v856_v55, %v860_v20  ;;  %v865_v62 = vmax.f32 %v857_v58, %v861_v39 }
 0x196   : > { %v878_v28 = vadd.f32 %v1035_v54, %v870_v4  ;;  %v879_v63 = vadd.f32 %v1035_v54, %v871_v61 }
 0x197   : > { %v872_v32 = vmax.f32 %v864_v8, %v868_v56  ;;  %v873_v1 = vmax.f32 %v865_v62, %v869_v59 }
 0x198   : > { %v882_v46 = vmax.f32 %v878_v28, 0.0  ;;  %v883_v3 = vmax.f32 %v879_v63, 0.0 }
 0x199   : > { %v880_v48 = vadd.f32 %v1035_v54, %v872_v32  ;;  %v881_v5 = vadd.f32 %v1035_v54, %v873_v1 }
 0x19a   : > { %v1053_v6 = vpack.c.bf16 %v883_v3, %v882_v46 }
 0x19b   : > { %v884_v7 = vmax.f32 %v880_v48, 0.0  ;;  %v885_v9 = vmax.f32 %v881_v5, 0.0 }
 0x19c   : > { %1054 = vst [vmem:[%s1589_s3] sm:$0xff] %v1053_v6  }
 0x19d   : > { %v1058_v0 = vpack.c.bf16 %v885_v9, %v884_v7 }
 0x19f   : > { %1060 = vst [vmem:[%s1589_s3 + $0x8] sm:$0xff] %v1058_v0  }
 0x1a0 PF: > { %s13_s14 = sadd.s32 1, %s1278_s14   ;;  %s1590_s12 = smov %s1274_s13 }
 0x1a1   : > { %p10_p8 = scmp.ge.s32.totalorder %s13_s14, 4   ;;  %s1591_s13 = smov %s1593_s15 }
 0x1a3   :  { %12 = sbr.rel (!%p10_p8) target bundleno = 2 (0x2), region = 78 }

// kernel: cnn_encoder_forward.6
= control target key start
LH: loop header
LB: loop body
LE: loop exit
PB: predicated region body
PF: predicated region fallthrough
CT: control target
= control target key end

     0   :  { %s878_s12 = smov 0   ;;  %s880_s13 = smov 0   ;;  %s1022_s0 = inlined_call_operand.vmem [shape: bf16[4,8,384], index: 0, kind: input, shape index: {}]   ;;  %s1023_s1 = inlined_call_operand.vmem [shape: bf16[384,128], index: 1, kind: input, shape index: {}]   ;;  %s1024_s2 = inlined_call_operand.vmem [shape: f32[2,128], index: 2, kind: input, shape index: {}]   ;;  %s1025_s3 = inlined_call_operand.vmem [shape: bf16[8,128], index: 3, kind: output, shape index: {}]  }
   0x1   :  { %s882_s14 = smov 0  }
   0x2 LB: > { %s25_s15 = sadd.s32 1, %s851_s13  ;;  %p673_p0 = scmp.ge.s32.totalorder %s855_s14, 1  ;;  %s855_s14 = sphi %s882_s14, %s13_s14   ;;  %s851_s13 = sphi %s880_s13, %s1027_s13   ;;  %s847_s12 = sphi %s878_s12, %s1026_s12  }
   0x3   : > { %p27_p1 = scmp.ge.s32.totalorder %s25_s15, 2  ;;  %p151_p2 = scmp.lt.s32.totalorder %s855_s14, 3 }
   0x5   : > { %s1029_s15 = smov (%p27_p1, %s25_s15), 0  ;;  %p152_p3 = pnand %p673_p0, %p151_p2 }
   0x6   : > { %p187_p4 = scmp.eq.s32.totalorder (!%p152_p3), %s847_s12, 0 }
   0x7   : > { %155 = sbr.rel (%p152_p3) target bundleno = 351 (0x15f), region = 32 }
   0xe   : > { %192 = sbr.rel (!%p187_p4) target bundleno = 21 (0x15), region = 36  ;;  %v857_v0 = vmov (%p187_p4), 0.0  }
   0xf   : > { %193 = vst [vmem:[#allocation2] sm:$0x1] (%p187_p4), %v857_v0  ;;  %194 = vst [vmem:[#allocation3] sm:$0x1] (%p187_p4), %v857_v0 }
  0x15 PF: > { %v799_v1 = vld [vmem:[%s1023_s1 + $0x40] sm:$0xff]   ;;  %v802_v4 = vld [vmem:[%s1023_s1 + $0x48] sm:$0xff]   ;;  %v805_v7 = vld [vmem:[%s1023_s1 + $0x50] sm:$0xff]   ;;  %p705_p5 = scmp.ne.s32.totalorder %s847_s12, 0 }
  0x16   : > { %v800_v2 = vld [vmem:[%s1023_s1] sm:$0xff]   ;;  %716 = vmatprep.subr.bf16.mxu0 %v799_v1  ;;  %v803_v5 = vld [vmem:[%s1023_s1 + $0x8] sm:$0xff]   ;;  %v806_v8 = vld [vmem:[%s1023_s1 + $0x10] sm:$0xff]  }
  0x17   : > { %v801_v3 = vld [vmem:[%s1023_s1 + $0x80] sm:$0xff]   ;;  %717 = vmatpush3.bf16.msra.mxu0 %v800_v2  ;;  %v804_v6 = vld [vmem:[%s1023_s1 + $0x88] sm:$0xff]   ;;  %v807_v9 = vld [vmem:[%s1023_s1 + $0x90] sm:$0xff]  }
  0x18   : > { %754 = vmatprep.subr.bf16.mxu1 %v801_v3  ;;  %718 = vmatprep.subr.bf16.mxu0 %v802_v4  ;;  %v808_v10 = vld [vmem:[%s1023_s1 + $0x58] sm:$0xff]   ;;  %v811_v13 = vld [vmem:[%s1023_s1 + $0x60] sm:$0xff]   ;;  %v814_v16 = vld [vmem:[%s1023_s1 + $0x68] sm:$0xff]  }
  0x19   : > { %755 = vmatpush3.bf16.msra.mxu1 %v801_v3  ;;  %v809_v11 = vld [vmem:[%s1023_s1 + $0x18] sm:$0xff]   ;;  %v813_v14 = vld [vmem:[%s1023_s1 + $0xa0] sm:$0xff]   ;;  %v816_v17 = vld [vmem:[%s1023_s1 + $0xa8] sm:$0xff]  }
  0x1a   : > { %756 = vmatprep.subr.bf16.mxu1 %v804_v6  ;;  %v810_v12 = vld [vmem:[%s1023_s1 + $0x98] sm:$0xff]   ;;  %v812_v15 = vld [vmem:[%s1023_s1 + $0x20] sm:$0xff]   ;;  %v815_v18 = vld [vmem:[%s1023_s1 + $0x28] sm:$0xff]  }
  0x1b   : > { %719 = vmatpush3.bf16.msra.mxu0 %v803_v5  ;;  %v817_v19 = vld [vmem:[%s1023_s1 + $0x70] sm:$0xff]   ;;  %v820_v22 = vld [vmem:[%s1023_s1 + $0x78] sm:$0xff]   ;;  %v823_v27 = vld [vmem:[%s1022_s0] ss:$12 sps:$4 sm:$0xff]  }
  0x1c   : > { %720 = vmatprep.subr.bf16.mxu0 %v805_v7  ;;  %v818_v20 = vld [vmem:[%s1023_s1 + $0x30] sm:$0xff]   ;;  %v822_v23 = vld [vmem:[%s1023_s1 + $0xb8] sm:$0xff]   ;;  %v827_v29 = vld [vmem:[%s1022_s0 + $0x20] ss:$12 sps:$4 sm:$0xff]  }
  0x1d   : > { %757 = vmatpush3.bf16.msra.mxu1 %v804_v6  ;;  %v819_v21 = vld [vmem:[%s1023_s1 + $0xb0] sm:$0xff]   ;;  %v821_v26 = vld [vmem:[%s1023_s1 + $0x38] sm:$0xff]   ;;  %v528_v6 = vld [vmem:[#allocation2] sm:$0x1] (!%p705_p5) }
  0x1e   : > { %758 = vmatprep.subr.bf16.mxu1 %v807_v9  ;;  %v825_v24 = vld [vmem:[%s1022_s0 + $0x4] ss:$12 sps:$4 sm:$0xff]   ;;  %v826_v25 = vld [vmem:[%s1022_s0 + $0x8] ss:$12 sps:$4 sm:$0xff]  }
  0x1f   : > { %721 = vmatpush3.bf16.msra.mxu0 %v806_v8  ;;  %459 = vmatprep.mubr.bf16.mxu0 %v825_v24  ;;  %v828_v28 = vld [vmem:[%s1022_s0 + $0x1c] ss:$12 sps:$4 sm:$0xff]   ;;  %v830_v30 = vld [vmem:[%s1022_s0 + $0x18] ss:$12 sps:$4 sm:$0xff]  }
  0x20   : > { %722 = vmatprep.subr.bf16.mxu0 %v808_v10  ;;  %770 = vmatprep.mubr.bf16.mxu1 %v826_v25 }
  0x21   : > { %759 = vmatpush3.bf16.msra.mxu1 %v807_v9  ;;  %v540_v9 = vld [vmem:[#allocation3] sm:$0x1] (!%p705_p5) }
  0x22   : > { %760 = vmatprep.subr.bf16.mxu1 %v810_v12 }
  0x23   : > { %723 = vmatpush3.bf16.msra.mxu0 %v809_v11 }
  0x24   : > { %724 = vmatprep.subr.bf16.mxu0 %v811_v13 }
  0x25   : > { %761 = vmatpush3.bf16.msra.mxu1 %v810_v12 }
  0x26   : > { %762 = vmatprep.subr.bf16.mxu1 %v813_v14 }
  0x27   : > { %725 = vmatpush3.bf16.msra.mxu0 %v812_v15 }
  0x28   : > { %726 = vmatprep.subr.bf16.mxu0 %v814_v16 }
  0x29   : > { %763 = vmatpush3.bf16.msra.mxu1 %v813_v14 }
  0x2a   : > { %764 = vmatprep.subr.bf16.mxu1 %v816_v17 }
  0x2b   : > { %727 = vmatpush3.bf16.msra.mxu0 %v815_v18 }
  0x2c   : > { %728 = vmatprep.subr.bf16.mxu0 %v817_v19 }
  0x2d   : > { %765 = vmatpush3.bf16.msra.mxu1 %v816_v17 }
  0x2e   : > { %766 = vmatprep.subr.bf16.mxu1 %v819_v21 }
  0x2f   : > { %729 = vmatpush3.bf16.msra.mxu0 %v818_v20 }
  0x30   : > { %730 = vmatprep.subr.bf16.mxu0 %v820_v22 }
  0x31   : > { %767 = vmatpush3.bf16.msra.mxu1 %v819_v21 }
  0x32   : > { %768 = vmatprep.subr.bf16.mxu1 %v822_v23 }
  0x33   : > { %731 = vmatpush3.bf16.msra.mxu0 %v821_v26 }
  0x35   : > { %769 = vmatpush3.bf16.msra.mxu1 %v822_v23 }
  0x36   : > { %460 = vmatmul.mubr.bf16.vlgmr.msra.gmra.mrb[0].mxu0 %v823_v27 }
  0x37   : > { %467 = vmatprep.mubr.bf16.mxu0 %v828_v28 }
  0x38   : > { %771 = vmatmul.mubr.bf16.vlgmr.msra.gmra.mrb[0].mxu1 %v827_v29 }
  0x3e   : > { %468 = vmatmul.mubr.bf16.gmra.mrb[4].mxu0 %v830_v30 }
 0x109   : > { %v732_v31 = vpop.f32.mrb[0].mxu0 }
 0x10a   : > { %v733_v32 = vpop.f32.mrb[1].mxu0 }
 0x10b   : > { %v734_v33 = vadd.f32 %v733_v32, %v732_v31  ;;  %v735_v34 = vpop.f32.mrb[2].mxu0  ;;  %v772_v35 = vpop.f32.mrb[0].mxu1 }
 0x10c   : > { %v736_v36 = vpop.f32.mrb[3].mxu0  ;;  %v510_v37 = vpop.f32.mrb[1].mxu1 }
 0x10d   : > { %v737_v38 = vadd.f32 %v736_v36, %v735_v34  ;;  %v989_v39 = vadd.f32 %v734_v33, %v510_v37  ;;  %v773_v40 = vpop.f32.mrb[2].mxu1 }
 0x10e   : > { %v513_v41 = vpop.f32.mrb[3].mxu1 }
 0x10f   : > { %v991_v42 = vadd.f32 %v737_v38, %v513_v41  ;;  %v541_v52 = vmul.f32 (!%p705_p5), %v989_v39, %v989_v39 }
 0x111   : > { %v738_v43 = vpop.f32.mrb[4].mxu0  ;;  %527 = sbr.rel (%p705_p5) target bundleno = 300 (0x12c), region = 40  ;;  %v529_v51 = vadd.f32 (!%p705_p5), %v991_v42, %v989_v39  ;;  %v542_v53 = vmul.f32 (!%p705_p5), %v991_v42, %v991_v42 }
 0x112   : > { %v739_v44 = vpop.f32.mrb[5].mxu0 }
 0x113   : > { %v740_v45 = vadd.f32 %v739_v44, %v738_v43  ;;  %v741_v46 = vpop.f32.mrb[6].mxu0  ;;  %v545_v57 = vadd.f32 (!%p705_p5), %v542_v53, %v541_v52 }
 0x114   : > { %v742_v47 = vpop.f32.mrb[7].mxu0 }
 0x115   : > { %v519_v48 = vadd.f32 %v772_v35, %v740_v45  ;;  %v743_v49 = vadd.f32 %v742_v47, %v741_v46 }
 0x117   : > { %v522_v50 = vadd.f32 %v773_v40, %v743_v49  ;;  %v543_v54 = vmul.f32 (!%p705_p5), %v519_v48, %v519_v48  ;;  %v530_v55 = vadd.f32 (!%p705_p5), %v529_v51, %v519_v48 }
 0x119   : > { %v544_v56 = vmul.f32 %v522_v50, %v522_v50  ;;  %v531_v58 = vadd.f32 %v530_v55, %v522_v50  ;;  %v546_v59 = vadd.f32 %v545_v57, %v543_v54 }
 0x11b   : > { %v532_v60 = vrot.slane %v531_v58, 4  ;;  %v547_v61 = vadd.f32 %v546_v59, %v544_v56 }
 0x11d   : > { %v533_v62 = vadd.f32 %v532_v60, %v531_v58  ;;  %v548_v63 = vrot.slane %v547_v61, 4 }
 0x11f   : > { %v534_v0 = vrot.slane %v533_v62, 2  ;;  %v549_v1 = vadd.f32 %v548_v63, %v547_v61 }
 0x121   : > { %v535_v2 = vadd.f32 %v534_v0, %v533_v62  ;;  %v550_v3 = vrot.slane %v549_v1, 2 }
 0x123   : > { %v536_v4 = vrot.slane %v535_v2, 1  ;;  %v551_v5 = vadd.f32 %v550_v3, %v549_v1 }
 0x125   : > { %v537_v7 = vadd.f32 %v536_v4, %v535_v2  ;;  %v552_v8 = vrot.slane %v551_v5, 1 }
 0x127   : > { %v538_v10 = vadd.f32 %v537_v7, %v528_v6  ;;  %v553_v11 = vadd.f32 %v552_v8, %v551_v5 }
 0x129   : > { %539 = vst [vmem:[#allocation2] sm:$0x1] %v538_v10  ;;  %v554_v12 = vadd.f32 %v553_v11, %v540_v9 }
 0x12b   : > { %555 = vst [vmem:[#allocation3] sm:$0x1] %v554_v12 }
 0x12c PF: > { %p556_p6 = scmp.eq.s32.totalorder %s847_s12, 1 }
 0x12d   : > { %v568_v21 = vld [vmem:[%s1024_s2] sm:$0x1] (%p556_p6)  ;;  %v573_v24 = vld [vmem:[%s1024_s2 + $0x1] sm:$0x1] (%p556_p6) }
 0x12e   : > { %560 = sbr.rel (!%p556_p6) target bundleno = 333 (0x14d), region = 44 }
 0x130   : > { %v561_v13 = vld [vmem:[#allocation2] sm:$0x1] (%p556_p6) }
 0x131   : > { %v562_v15 = vmul.f32 (%p556_p6), 0.03125, %v561_v13 }
 0x132   : > { %v563_v14 = vld [vmem:[#allocation3] sm:$0x1] (%p556_p6) }
 0x133   : > { %v564_v16 = vmul.f32 (%p556_p6), 0.03125, %v563_v14  ;;  %v565_v17 = vmul.f32 (%p556_p6), %v562_v15, %v562_v15 }
 0x135   : > { %v566_v18 = vsub.f32 %v564_v16, %v565_v17 }
 0x137   : > { %v567_v19 = vmax.f32 %v566_v18, 0.0 }
 0x139   : > { %v569_v20 = vadd.f32 1e-05, %v567_v19 }
 0x13b   : > { %831 = vrsqrt.f32 %v569_v20 }
 0x145   : > { %v832_v22 = vpop.eup %831 }
 0x146   : > { %v571_v23 = vmul.f32 %v832_v22, %v568_v21 }
 0x148   : > { %572 = vst [vmem:[#allocation4] sm:$0x1] %v571_v23  ;;  %v574_v25 = vmul.f32 %v571_v23, %v562_v15 }
 0x14a   : > { %v575_v26 = vsub.f32 %v573_v24, %v574_v25 }
 0x14c   : > { %576 = vst [vmem:[#allocation4 + $0x1] sm:$0x1] %v575_v26 }
 0x14d PF: > { %p707_p7 = scmp.ne.s32.totalorder %s847_s12, 1 }
 0x14f   : > { %579 = sbr.rel (%p707_p7) target bundleno = 351 (0x15f), region = 48  ;;  %v708_v27 = vld [vmem:[#allocation4] ss:$0 sm:$0xff] (!%p707_p7) }
 0x150   : > { %v586_v28 = vmul.f32 (!%p707_p7), %v708_v27, %v989_v39  ;;  %v587_v29 = vmul.f32 (!%p707_p7), %v708_v27, %v991_v42  ;;  %v589_v30 = vmul.f32 (!%p707_p7), %v708_v27, %v519_v48  ;;  %v591_v32 = vmul.f32 (!%p707_p7), %v708_v27, %v522_v50 }
 0x152   : > { %v588_v31 = vmax.f32 (!%p707_p7), %v586_v28, %v587_v29 }
 0x153   : > { %v709_v34 = vld [vmem:[#allocation4 + $0x1] ss:$0 sm:$0xff] (!%p707_p7) }
 0x154   : > { %v590_v33 = vmax.f32 (!%p707_p7), %v588_v31, %v589_v30 }
 0x156   : > { %v592_v35 = vmax.f32 %v590_v33, %v591_v32 }
 0x158   : > { %v597_v36 = vadd.f32 %v709_v34, %v592_v35 }
 0x15a   : > { %v598_v37 = vmax.f32 %v597_v36, 0.0 }
 0x15c   : > { %v599_v38 = vpack.c.bf16 %v598_v37, %v598_v37 }
 0x15e   : > { %600 = vst [vmem:[%s1025_s3] sm:$0xf] %v599_v38 }
 0x15f PF: > { %s13_s14 = sadd.s32 1, %s855_s14   ;;  %s1026_s12 = smov %s851_s13 }
 0x160   : > { %p10_p8 = scmp.ge.s32.totalorder %s13_s14, 4   ;;  %s1027_s13 = smov %s1029_s15 }
 0x162   :  { %12 = sbr.rel (!%p10_p8) target bundleno = 2 (0x2), region = 78 }

// kernel: cnn_encoder_forward.7
= control target key start
LH: loop header
LB: loop body
LE: loop exit
PB: predicated region body
PF: predicated region fallthrough
CT: control target
= control target key end

     0   :  { %s1117_s18 = smov 0   ;;  %s1119_s19 = smov 0   ;;  %s1324_s0 = inlined_call_operand.vmem [shape: bf16[4,8,384], index: 0, kind: input, shape index: {}]   ;;  %s1325_s1 = inlined_call_operand.vmem [shape: bf16[384,128], index: 1, kind: input, shape index: {}]   ;;  %s1326_s2 = inlined_call_operand.vmem [shape: f32[2,128], index: 2, kind: input, shape index: {}]   ;;  %s1327_s3 = inlined_call_operand.vmem [shape: f32[128,128], index: 3, kind: input, shape index: {}]   ;;  %s1328_s4 = inlined_call_operand.vmem [shape: f32[1,128], index: 4, kind: input, shape index: {}]   ;;  %s1329_s5 = inlined_call_operand.vmem [shape: f32[8,128], index: 5, kind: output, shape index: {}]  }
   0x1   :  { %s1121_s20 = smov 0  }
   0x2 LB: > { %s27_s21 = sadd.s32 1, %s1077_s19  ;;  %p819_p0 = scmp.ge.s32.totalorder %s1081_s20, 1  ;;  %s1081_s20 = sphi %s1121_s20, %s15_s20   ;;  %s1077_s19 = sphi %s1119_s19, %s1331_s19   ;;  %s1073_s18 = sphi %s1117_s18, %s1330_s18  }
   0x3   : > { %p29_p1 = scmp.ge.s32.totalorder %s27_s21, 2  ;;  %p201_p2 = scmp.lt.s32.totalorder %s1081_s20, 3 }
   0x5   : > { %s1333_s21 = smov (%p29_p1, %s27_s21), 0  ;;  %p202_p3 = pnand %p819_p0, %p201_p2 }
   0x6   : > { %p241_p4 = scmp.eq.s32.totalorder (!%p202_p3), %s1073_s18, 0 }
   0x7   : > { %205 = sbr.rel (%p202_p3) target bundleno = 583 (0x247), region = 40 }
   0xe   : > { %246 = sbr.rel (!%p241_p4) target bundleno = 21 (0x15), region = 44  ;;  %v1083_v0 = vmov (%p241_p4), 0.0  }
   0xf   : > { %247 = vst [vmem:[#allocation2] sm:$0x1] (%p241_p4), %v1083_v0  ;;  %248 = vst [vmem:[#allocation3] sm:$0x1] (%p241_p4), %v1083_v0 }
  0x15 PF: > { %v1025_v1 = vld [vmem:[%s1325_s1 + $0x40] sm:$0xff]   ;;  %v1028_v4 = vld [vmem:[%s1325_s1 + $0x48] sm:$0xff]   ;;  %v1031_v7 = vld [vmem:[%s1325_s1 + $0x50] sm:$0xff]   ;;  %p851_p5 = scmp.ne.s32.totalorder %s1073_s18, 0 }
  0x16   : > { %v1026_v2 = vld [vmem:[%s1325_s1] sm:$0xff]   ;;  %863 = vmatprep.subr.bf16.mxu0 %v1025_v1  ;;  %v1029_v5 = vld [vmem:[%s1325_s1 + $0x8] sm:$0xff]   ;;  %v1032_v8 = vld [vmem:[%s1325_s1 + $0x10] sm:$0xff]  }
  0x17   : > { %v1027_v3 = vld [vmem:[%s1325_s1 + $0x80] sm:$0xff]   ;;  %864 = vmatpush3.bf16.msra.mxu0 %v1026_v2  ;;  %v1030_v6 = vld [vmem:[%s1325_s1 + $0x88] sm:$0xff]   ;;  %v1033_v9 = vld [vmem:[%s1325_s1 + $0x90] sm:$0xff]  }
  0x18   : > { %918 = vmatprep.subr.bf16.mxu1 %v1027_v3  ;;  %865 = vmatprep.subr.bf16.mxu0 %v1028_v4  ;;  %v1034_v10 = vld [vmem:[%s1325_s1 + $0x58] sm:$0xff]   ;;  %v1037_v13 = vld [vmem:[%s1325_s1 + $0x60] sm:$0xff]   ;;  %v1040_v16 = vld [vmem:[%s1325_s1 + $0x68] sm:$0xff]  }
  0x19   : > { %919 = vmatpush3.bf16.msra.mxu1 %v1027_v3  ;;  %v1035_v11 = vld [vmem:[%s1325_s1 + $0x18] sm:$0xff]   ;;  %v1039_v14 = vld [vmem:[%s1325_s1 + $0xa0] sm:$0xff]   ;;  %v1042_v17 = vld [vmem:[%s1325_s1 + $0xa8] sm:$0xff]  }
  0x1a   : > { %920 = vmatprep.subr.bf16.mxu1 %v1030_v6  ;;  %v1036_v12 = vld [vmem:[%s1325_s1 + $0x98] sm:$0xff]   ;;  %v1038_v15 = vld [vmem:[%s1325_s1 + $0x20] sm:$0xff]   ;;  %v1041_v18 = vld [vmem:[%s1325_s1 + $0x28] sm:$0xff]  }
  0x1b   : > { %866 = vmatpush3.bf16.msra.mxu0 %v1029_v5  ;;  %v1043_v19 = vld [vmem:[%s1325_s1 + $0x70] sm:$0xff]   ;;  %v1046_v22 = vld [vmem:[%s1325_s1 + $0x78] sm:$0xff]   ;;  %v1049_v27 = vld [vmem:[%s1324_s0] ss:$12 sps:$4 sm:$0xff]  }
  0x1c   : > { %867 = vmatprep.subr.bf16.mxu0 %v1031_v7  ;;  %v1044_v20 = vld [vmem:[%s1325_s1 + $0x30] sm:$0xff]   ;;  %v1048_v23 = vld [vmem:[%s1325_s1 + $0xb8] sm:$0xff]   ;;  %v1053_v29 = vld [vmem:[%s1324_s0 + $0x20] ss:$12 sps:$4 sm:$0xff]  }
  0x1d   : > { %921 = vmatpush3.bf16.msra.mxu1 %v1030_v6  ;;  %v1045_v21 = vld [vmem:[%s1325_s1 + $0xb0] sm:$0xff]   ;;  %v1047_v26 = vld [vmem:[%s1325_s1 + $0x38] sm:$0xff]   ;;  %v582_v6 = vld [vmem:[#allocation2] sm:$0x1] (!%p851_p5) }
  0x1e   : > { %922 = vmatprep.subr.bf16.mxu1 %v1033_v9  ;;  %v1051_v24 = vld [vmem:[%s1324_s0 + $0x4] ss:$12 sps:$4 sm:$0xff]   ;;  %v1052_v25 = vld [vmem:[%s1324_s0 + $0x8] ss:$12 sps:$4 sm:$0xff]  }
  0x1f   : > { %868 = vmatpush3.bf16.msra.mxu0 %v1032_v8  ;;  %513 = vmatprep.mubr.bf16.mxu0 %v1051_v24  ;;  %v1054_v28 = vld [vmem:[%s1324_s0 + $0x1c] ss:$12 sps:$4 sm:$0xff]   ;;  %v1056_v30 = vld [vmem:[%s1324_s0 + $0x18] ss:$12 sps:$4 sm:$0xff]  }
  0x20   : > { %869 = vmatprep.subr.bf16.mxu0 %v1034_v10  ;;  %934 = vmatprep.mubr.bf16.mxu1 %v1052_v25 }
  0x21   : > { %923 = vmatpush3.bf16.msra.mxu1 %v1033_v9  ;;  %v594_v9 = vld [vmem:[#allocation3] sm:$0x1] (!%p851_p5) }
  0x22   : > { %924 = vmatprep.subr.bf16.mxu1 %v1036_v12 }
  0x23   : > { %870 = vmatpush3.bf16.msra.mxu0 %v1035_v11 }
  0x24   : > { %871 = vmatprep.subr.bf16.mxu0 %v1037_v13 }
  0x25   : > { %925 = vmatpush3.bf16.msra.mxu1 %v1036_v12 }
  0x26   : > { %926 = vmatprep.subr.bf16.mxu1 %v1039_v14 }
  0x27   : > { %872 = vmatpush3.bf16.msra.mxu0 %v1038_v15 }
  0x28   : > { %873 = vmatprep.subr.bf16.mxu0 %v1040_v16 }
  0x29   : > { %927 = vmatpush3.bf16.msra.mxu1 %v1039_v14 }
  0x2a   : > { %928 = vmatprep.subr.bf16.mxu1 %v1042_v17 }
  0x2b   : > { %874 = vmatpush3.bf16.msra.mxu0 %v1041_v18 }
  0x2c   : > { %875 = vmatprep.subr.bf16.mxu0 %v1043_v19 }
  0x2d   : > { %929 = vmatpush3.bf16.msra.mxu1 %v1042_v17 }
  0x2e   : > { %930 = vmatprep.subr.bf16.mxu1 %v1045_v21 }
  0x2f   : > { %876 = vmatpush3.bf16.msra.mxu0 %v1044_v20 }
  0x30   : > { %877 = vmatprep.subr.bf16.mxu0 %v1046_v22 }
  0x31   : > { %931 = vmatpush3.bf16.msra.mxu1 %v1045_v21 }
  0x32   : > { %932 = vmatprep.subr.bf16.mxu1 %v1048_v23 }
  0x33   : > { %878 = vmatpush3.bf16.msra.mxu0 %v1047_v26 }
  0x35   : > { %933 = vmatpush3.bf16.msra.mxu1 %v1048_v23 }
  0x36   : > { %514 = vmatmul.mubr.bf16.vlgmr.msra.gmra.mrb[0].mxu0 %v1049_v27 }
  0x37   : > { %521 = vmatprep.mubr.bf16.mxu0 %v1054_v28 }
  0x38   : > { %935 = vmatmul.mubr.bf16.vlgmr.msra.gmra.mrb[0].mxu1 %v1053_v29 }
  0x3e   : > { %522 = vmatmul.mubr.bf16.gmra.mrb[4].mxu0 %v1056_v30 }
 0x109   : > { %v879_v31 = vpop.f32.mrb[0].mxu0 }
 0x10a   : > { %v880_v32 = vpop.f32.mrb[1].mxu0 }
 0x10b   : > { %v881_v33 = vadd.f32 %v880_v32, %v879_v31  ;;  %v882_v34 = vpop.f32.mrb[2].mxu0  ;;  %v936_v35 = vpop.f32.mrb[0].mxu1 }
 0x10c   : > { %v883_v36 = vpop.f32.mrb[3].mxu0  ;;  %v564_v37 = vpop.f32.mrb[1].mxu1 }
 0x10d   : > { %v884_v38 = vadd.f32 %v883_v36, %v882_v34  ;;  %v1228_v39 = vadd.f32 %v881_v33, %v564_v37  ;;  %v937_v40 = vpop.f32.mrb[2].mxu1 }
 0x10e   : > { %v567_v41 = vpop.f32.mrb[3].mxu1 }
 0x10f   : > { %v1230_v42 = vadd.f32 %v884_v38, %v567_v41  ;;  %v595_v52 = vmul.f32 (!%p851_p5), %v1228_v39, %v1228_v39 }
 0x111   : > { %v885_v43 = vpop.f32.mrb[4].mxu0  ;;  %581 = sbr.rel (%p851_p5) target bundleno = 300 (0x12c), region = 48  ;;  %v583_v51 = vadd.f32 (!%p851_p5), %v1230_v42, %v1228_v39  ;;  %v596_v53 = vmul.f32 (!%p851_p5), %v1230_v42, %v1230_v42 }
 0x112   : > { %v886_v44 = vpop.f32.mrb[5].mxu0 }
 0x113   : > { %v887_v45 = vadd.f32 %v886_v44, %v885_v43  ;;  %v888_v46 = vpop.f32.mrb[6].mxu0  ;;  %v599_v57 = vadd.f32 (!%p851_p5), %v596_v53, %v595_v52 }
 0x114   : > { %v889_v47 = vpop.f32.mrb[7].mxu0 }
 0x115   : > { %v1232_v48 = vadd.f32 %v936_v35, %v887_v45  ;;  %v890_v49 = vadd.f32 %v889_v47, %v888_v46 }
 0x117   : > { %v1234_v50 = vadd.f32 %v937_v40, %v890_v49  ;;  %v597_v54 = vmul.f32 (!%p851_p5), %v1232_v48, %v1232_v48  ;;  %v584_v55 = vadd.f32 (!%p851_p5), %v583_v51, %v1232_v48 }
 0x119   : > { %v598_v56 = vmul.f32 %v1234_v50, %v1234_v50  ;;  %v585_v58 = vadd.f32 %v584_v55, %v1234_v50  ;;  %v600_v59 = vadd.f32 %v599_v57, %v597_v54 }
 0x11b   : > { %v586_v60 = vrot.slane %v585_v58, 4  ;;  %v601_v61 = vadd.f32 %v600_v59, %v598_v56 }
 0x11d   : > { %v587_v62 = vadd.f32 %v586_v60, %v585_v58  ;;  %v602_v63 = vrot.slane %v601_v61, 4 }
 0x11f   : > { %v588_v0 = vrot.slane %v587_v62, 2  ;;  %v603_v1 = vadd.f32 %v602_v63, %v601_v61 }
 0x121   : > { %v589_v2 = vadd.f32 %v588_v0, %v587_v62  ;;  %v604_v3 = vrot.slane %v603_v1, 2 }
 0x123   : > { %v590_v4 = vrot.slane %v589_v2, 1  ;;  %v605_v5 = vadd.f32 %v604_v3, %v603_v1 }
 0x125   : > { %v591_v7 = vadd.f32 %v590_v4, %v589_v2  ;;  %v606_v8 = vrot.slane %v605_v5, 1 }
 0x127   : > { %v592_v10 = vadd.f32 %v591_v7, %v582_v6  ;;  %v607_v11 = vadd.f32 %v606_v8, %v605_v5 }
 0x129   : > { %593 = vst [vmem:[#allocation2] sm:$0x1] %v592_v10  ;;  %v608_v12 = vadd.f32 %v607_v11, %v594_v9 }
 0x12b   : > { %609 = vst [vmem:[#allocation3] sm:$0x1] %v608_v12 }
 0x12c PF: > { %p610_p6 = scmp.eq.s32.totalorder %s1073_s18, 1 }
 0x12d   : > { %v622_v21 = vld [vmem:[%s1326_s2] sm:$0x1] (%p610_p6)  ;;  %v627_v24 = vld [vmem:[%s1326_s2 + $0x1] sm:$0x1] (%p610_p6) }
 0x12e   : > { %614 = sbr.rel (!%p610_p6) target bundleno = 333 (0x14d), region = 52 }
 0x130   : > { %v615_v13 = vld [vmem:[#allocation2] sm:$0x1] (%p610_p6) }
 0x131   : > { %v616_v15 = vmul.f32 (%p610_p6), 0.125, %v615_v13 }
 0x132   : > { %v617_v14 = vld [vmem:[#allocation3] sm:$0x1] (%p610_p6) }
 0x133   : > { %v618_v16 = vmul.f32 (%p610_p6), 0.125, %v617_v14  ;;  %v619_v17 = vmul.f32 (%p610_p6), %v616_v15, %v616_v15 }
 0x135   : > { %v620_v18 = vsub.f32 %v618_v16, %v619_v17 }
 0x137   : > { %v621_v19 = vmax.f32 %v620_v18, 0.0 }
 0x139   : > { %v623_v20 = vadd.f32 1e-05, %v621_v19 }
 0x13b   : > { %1057 = vrsqrt.f32 %v623_v20 }
 0x145   : > { %v1058_v22 = vpop.eup %1057 }
 0x146   : > { %v625_v23 = vmul.f32 %v1058_v22, %v622_v21 }
 0x148   : > { %626 = vst [vmem:[#allocation4] sm:$0x1] %v625_v23  ;;  %v628_v25 = vmul.f32 %v625_v23, %v616_v15 }
 0x14a   : > { %v629_v26 = vsub.f32 %v627_v24, %v628_v25 }
 0x14c   : > { %630 = vst [vmem:[#allocation4 + $0x1] sm:$0x1] %v629_v26 }
 0x14d PF: > { %p853_p7 = scmp.ne.s32.totalorder %s1073_s18, 1 }
 0x14e   : > { %v653_v27 = vld [vmem:[%s1327_s3] sm:$0xff] (!%p853_p7)  ;;  %v654_v28 = vld [vmem:[%s1327_s3 + $0x8] sm:$0xff] (!%p853_p7)  ;;  %v655_v29 = vld [vmem:[%s1327_s3 + $0x10] sm:$0xff] (!%p853_p7)  ;;  %v1084_v30 = vmov (!%p853_p7), 0.0|0.0   ;;  %vm1085_vm0 = vmmov (!%p853_p7), 0   ;;  %v1086_v33 = vmov (!%p853_p7), 0.0  }
 0x14f   : > { %633 = sbr.rel (%p853_p7) target bundleno = 583 (0x247), region = 56  ;;  %973 = vmatprep.subr.bf16.mxu0 (!%p853_p7), %v1084_v30  ;;  %v974_v31 = vpack.c.bf16 (!%p853_p7), %v654_v28, %v653_v27  ;;  %v656_v32 = vld [vmem:[%s1327_s3 + $0x18] sm:$0xff] (!%p853_p7)  ;;  %970 = vmatprep.mubr.msk.f32.mxu0 (!%p853_p7), %vm1085_vm0, %v1086_v33  ;;  %v657_v35 = vld [vmem:[%s1327_s3 + $0x20] sm:$0xff] (!%p853_p7)  ;;  %v658_v36 = vld [vmem:[%s1327_s3 + $0x28] sm:$0xff] (!%p853_p7) }
 0x150   : > { %v977_v34 = vpack.c.bf16 (!%p853_p7), %v656_v32, %v655_v29  ;;  %v980_v37 = vpack.c.bf16 (!%p853_p7), %v658_v36, %v657_v35  ;;  %v854_v38 = vld [vmem:[#allocation4] ss:$0 sm:$0xff] (!%p853_p7)  ;;  %v659_v40 = vld [vmem:[%s1327_s3 + $0x30] sm:$0xff] (!%p853_p7)  ;;  %v660_v41 = vld [vmem:[%s1327_s3 + $0x38] sm:$0xff] (!%p853_p7) }
 0x151   : > { %975 = vmatpush3.bf16.msra.mxu0 (!%p853_p7), %v974_v31  ;;  %v640_v43 = vmul.f32 (!%p853_p7), %v854_v38, %v1228_v39  ;;  %v641_v44 = vmul.f32 (!%p853_p7), %v854_v38, %v1230_v42  ;;  %v983_v45 = vpack.c.bf16 (!%p853_p7), %v660_v41, %v659_v40  ;;  %v661_v46 = vld [vmem:[%s1327_s3 + $0x40] sm:$0xff] (!%p853_p7)  ;;  %v662_v47 = vld [vmem:[%s1327_s3 + $0x48] sm:$0xff] (!%p853_p7)  ;;  %v643_v51 = vmul.f32 (!%p853_p7), %v854_v38, %v1232_v48  ;;  %v663_v39 = vld [vmem:[%s1327_s3 + $0x50] sm:$0xff] (!%p853_p7) }
 0x152   : > { %976 = vmatprep.subr.bf16.mxu0 (!%p853_p7), %v1084_v30  ;;  %v986_v52 = vpack.c.bf16 (!%p853_p7), %v662_v47, %v661_v46  ;;  %v664_v42 = vld [vmem:[%s1327_s3 + $0x58] sm:$0xff] (!%p853_p7)  ;;  %v645_v54 = vmul.f32 (!%p853_p7), %v854_v38, %v1234_v50  ;;  %v665_v48 = vld [vmem:[%s1327_s3 + $0x60] sm:$0xff] (!%p853_p7)  ;;  %v666_v56 = vld [vmem:[%s1327_s3 + $0x68] sm:$0xff] (!%p853_p7) }
 0x153   : > { %v642_v49 = vmax.f32 (!%p853_p7), %v640_v43, %v641_v44  ;;  %v989_v55 = vpack.c.bf16 (!%p853_p7), %v664_v42, %v663_v39  ;;  %v992_v58 = vpack.c.bf16 (!%p853_p7), %v666_v56, %v665_v48  ;;  %v855_v59 = vld [vmem:[#allocation4 + $0x1] ss:$0 sm:$0xff] (!%p853_p7)  ;;  %v667_v50 = vld [vmem:[%s1327_s3 + $0x70] sm:$0xff] (!%p853_p7)  ;;  %v668_v60 = vld [vmem:[%s1327_s3 + $0x78] sm:$0xff] (!%p853_p7) }
 0x154   : > { %v995_v62 = vpack.c.bf16 (!%p853_p7), %v668_v60, %v667_v50  ;;  %v856_v0 = vld [vmem:[%s1328_s4] ss:$0 sm:$0xff] (!%p853_p7) }
 0x155   : > { %978 = vmatpush3.bf16.msra.mxu0 (!%p853_p7), %v977_v34  ;;  %v644_v53 = vmax.f32 (!%p853_p7), %v642_v49, %v643_v51 }
 0x156   : > { %979 = vmatprep.subr.bf16.mxu0 %v1084_v30 }
 0x157   : > { %v646_v57 = vmax.f32 %v644_v53, %v645_v54 }
 0x159   : > { %981 = vmatpush3.bf16.msra.mxu0 %v980_v37  ;;  %v651_v61 = vadd.f32 %v855_v59, %v646_v57 }
 0x15a   : > { %982 = vmatprep.subr.bf16.mxu0 %v1084_v30 }
 0x15b   : > { %v652_v63 = vmax.f32 %v651_v61, 0.0 }
 0x15d   : > { %984 = vmatpush3.bf16.msra.mxu0 %v983_v45 }
 0x15e   : > { %985 = vmatprep.subr.bf16.mxu0 %v1084_v30 }
 0x161   : > { %987 = vmatpush3.bf16.msra.mxu0 %v986_v52 }
 0x162   : > { %988 = vmatprep.subr.bf16.mxu0 %v1084_v30 }
 0x165   : > { %990 = vmatpush3.bf16.msra.mxu0 %v989_v55 }
 0x166   : > { %991 = vmatprep.subr.bf16.mxu0 %v1084_v30 }
 0x169   : > { %993 = vmatpush3.bf16.msra.mxu0 %v992_v58 }
 0x16a   : > { %994 = vmatprep.subr.bf16.mxu0 %v1084_v30 }
 0x16d   : > { %996 = vmatpush3.bf16.msra.mxu0 %v995_v62 }
 0x170   : > { %971 = vmatmul.mubr.f32.vlgmr.msra.gmra.mrb[0].mxu0 %v652_v63 }
 0x243   : > { %v742_v1 = vpop.f32.mrb[0].mxu0 }
 0x244   : > { %v743_v2 = vadd.f32 %v856_v0, %v742_v1  ;;  %v972_v3 = vpop.f32.mrb[1].mxu0 }
 0x246   : > { %746 = vst [vmem:[%s1329_s5] sm:$0xff] %v743_v2 }
 0x247 PF: > { %s15_s20 = sadd.s32 1, %s1081_s20   ;;  %s1330_s18 = smov %s1077_s19 }
 0x248   : > { %p12_p8 = scmp.ge.s32.totalorder %s15_s20, 4   ;;  %s1331_s19 = smov %s1333_s21 }
 0x24a   :  { %14 = sbr.rel (!%p12_p8) target bundleno = 2 (0x2), region = 86 }

</bundles_post_ra>
